<compile_context>
chip_gen: v7x
topology: tpu7x:2x2x1
jax: 0.10.0
libtpu: 0.0.40
codegen_flags: <defaults>
</compile_context>

<pallas_src>
import functools

import jax
import jax.numpy as jnp
from jax.experimental import pallas as pl
from jax.experimental.pallas import tpu as pltpu


def _vq2_kernel(z_ref, embt2_ref, esq_ref, ehi_ref, elo_ref,
                zq_ref, idx_ref, sse_ref, *,
                n_valid_rows, mask_tail, ne_chunk, matmul_dtype):
    """One row tile of the VQ bottleneck.

    z_ref     : (tm, e_dim)       caller dtype  input rows
    embt2_ref : (e_dim, n_e_pad)  matmul dtype  2 * codebook^T (hoisted cast/scale)
    esq_ref   : (1, n_e_pad)      f32           ||e_k||^2 (1e30 on padded codes)
    ehi_ref   : (n_e_pad, e_dim)  bf16          codebook high bf16 half
    elo_ref   : (n_e_pad, e_dim)  bf16          codebook residual (low) half
    zq_ref    : (tm, e_dim)       caller dtype  quantized rows
    idx_ref   : (tm, 1)           i32           chosen codebook indices
    sse_ref   : (1, 1, e_dim)     f32           partial column sums of (z_q - z)^2
    """
    tm, e_dim = z_ref.shape
    n_e_pad = embt2_ref.shape[1]
    n_chunks = n_e_pad // ne_chunk

    z_in = z_ref[...]
    z_f32 = z_in.astype(jnp.float32)
    z_mm = z_in.astype(matmul_dtype)

    embt2 = embt2_ref[...]
    esq = esq_ref[...]

    # ---- distances + argmin, chunked over the codebook (lane) axis ----------
    run_d = None
    run_i = None
    for c in range(n_chunks):          # static unroll; n_chunks is small
        c0 = c * ne_chunk
        dots = jnp.dot(z_mm, embt2[:, c0:c0 + ne_chunk],
                       preferred_element_type=jnp.float32)        # (tm, tc) MXU
        d_c = esq[:, c0:c0 + ne_chunk] - dots                     # ||e||^2 - 2<z,e>
        i_c = jax.lax.broadcasted_iota(jnp.int32, d_c.shape, 1) + c0
        if run_d is None:
            run_d, run_i = d_c, i_c
        else:
            upd = d_c < run_d                 # strict <: earlier chunk wins ties
            run_d = jnp.where(upd, d_c, run_d)
            run_i = jnp.where(upd, i_c, run_i)

    d_min = jnp.min(run_d, axis=1, keepdims=True)                 # narrow XLU reduce
    idx2d = jnp.min(jnp.where(run_d == d_min, run_i, n_e_pad), axis=1,
                    keepdims=True).astype(jnp.int32)              # (tm, 1)
    idx_ref[...] = idx2d

    # ---- z_q gather: bf16 one-hot @ (hi + lo) codebook halves, f32 acc ------
    # TODO(synk): a direct jnp.take row gather on the VMEM codebook would drop
    # these matmuls entirely; kept on the MXU (bf16-native) for lowering safety.
    zq = jnp.zeros((tm, e_dim), jnp.float32)
    for c in range(n_chunks):
        c0 = c * ne_chunk
        lane = jax.lax.broadcasted_iota(jnp.int32, (tm, ne_chunk), 1) + c0
        onehot = (lane == idx2d).astype(jnp.bfloat16)
        zq = zq + jnp.dot(onehot, ehi_ref[c0:c0 + ne_chunk, :],
                          preferred_element_type=jnp.float32)
        zq = zq + jnp.dot(onehot, elo_ref[c0:c0 + ne_chunk, :],
                          preferred_element_type=jnp.float32)
    zq_ref[...] = zq.astype(zq_ref.dtype)

    # ---- per-tile partial SSE (kept in f32; wrapper does the final reduce) --
    diff = zq - z_f32
    if mask_tail:                      # static flag: only emitted when N padded
        rows = (jax.lax.broadcasted_iota(jnp.int32, (tm, 1), 0)
                + pl.program_id(0) * tm)
        diff = jnp.where(rows < n_valid_rows, diff, 0.0)
    sse_ref[...] = jnp.sum(diff * diff, axis=0, keepdims=True)[None]


def _tile_workset_bytes(tm, e_dim, n_e_pad, ne_chunk, in_bytes, mm_bytes,
                        const_bufs):
    f32 = 4
    io = 2 * tm * e_dim * in_bytes * 2                 # z in + z_q out (2x buffers)
    small_out = 2 * (tm * 4 + max(e_dim, 128) * f32)   # idx + SSE outputs
    consts = const_bufs * (e_dim * n_e_pad * mm_bytes  # 2*emb^T (distance)
                           + n_e_pad * f32             # ||e||^2
                           + 2 * n_e_pad * e_dim * 2)  # hi + lo bf16 halves
    # live chunk temporaries: dots/d/iota/run_d/run_i (4B each) + bf16 one-hot
    tmp = tm * ne_chunk * (5 * f32 + 2)
    tmp += 3 * tm * e_dim * f32                        # z_f32 / zq / diff
    return io + small_out + consts + tmp


def _choose_row_tile(n_rows, fits):
    candidates = (4096, 2048, 1024, 512, 256, 128)
    fitting = [t for t in candidates if fits(t)] or [128]
    ntiles = lambda t: -(-n_rows // t)
    padded = lambda t: ntiles(t) * t
    # Prefer >=2 grid tiles (v7x has 2 TensorCores), then minimize padded rows
    # plus a per-grid-step overhead charge, then prefer the larger tile.
    return min(fitting,
               key=lambda t: (0 if ntiles(t) >= 2 else 1,
                              padded(t) + 512 * ntiles(t),
                              -t))


def vector_quantizer2_forward(z_nchw, embedding, beta, *, legacy=True,
                              matmul_dtype=jnp.bfloat16, ne_chunk=None):
    """Forward pass of VectorQuantizer2 (remap=None, sane_index_shape=False).

    Returns (z_q_nchw, loss, (perplexity=None, min_encodings=None, indices)).
    """
    B, C, H, W = z_nchw.shape
    n_e, e_dim = embedding.shape
    assert C == e_dim
    in_dtype = z_nchw.dtype
    in_bytes = jnp.dtype(in_dtype).itemsize
    mm_bytes = jnp.dtype(matmul_dtype).itemsize

    # Keep activations in the caller's dtype (no f32 inflation of bf16 inputs).
    z_flat = jnp.transpose(z_nchw, (0, 2, 3, 1)).reshape(-1, e_dim)
    # TODO(synk): consuming NCHW directly (in-kernel transpose) would remove two
    # wrapper-side HBM round trips; kept out of scope in this revision.
    n = z_flat.shape[0]

    # Codebook operands, hoisted out of the kernel (cast, scale, norms, split).
    emb_f32 = embedding.astype(jnp.float32)
    n_e_pad = -(-n_e // 128) * 128
    if n_e_pad != n_e:
        emb_f32 = jnp.pad(emb_f32, ((0, n_e_pad - n_e), (0, 0)))
    esq = jnp.sum(emb_f32 * emb_f32, axis=1)[None, :]
    if n_e_pad != n_e:
        # Padded codes must never win the argmin.
        esq = jnp.where(jnp.arange(n_e_pad)[None, :] < n_e, esq,
                        jnp.float32(1e30))
    embt2 = (2.0 * emb_f32.T).astype(matmul_dtype)     # (e_dim, n_e_pad)
    emb_hi = emb_f32.astype(jnp.bfloat16)              # exact-split gather operands
    emb_lo = (emb_f32 - emb_hi.astype(jnp.float32)).astype(jnp.bfloat16)

    # Codebook chunking (bounds (tm, n_e) temporaries for large codebooks).
    if ne_chunk is None:
        ne_chunk = min(n_e_pad, 2048)
    ne_chunk = max(128, min(int(ne_chunk), n_e_pad))
    while n_e_pad % ne_chunk:
        ne_chunk -= 128

    try:
        vmem_cap = int(pltpu.get_tpu_info().vmem_capacity_bytes)
    except Exception:
        vmem_cap = 64 * 1024 * 1024                    # v7x-safe fallback
    vmem_budget = (vmem_cap * 3) // 4

    def run(single_buffer_consts):
        const_bufs = 1 if single_buffer_consts else 2
        fits = lambda t: _tile_workset_bytes(
            t, e_dim, n_e_pad, ne_chunk, in_bytes, mm_bytes,
            const_bufs) <= vmem_budget
        tm = _choose_row_tile(n, fits)
        n_pad = -(-n // tm) * tm
        num_tiles = n_pad // tm
        zf = z_flat if n_pad == n else jnp.pad(z_flat, ((0, n_pad - n), (0, 0)))

        work = _tile_workset_bytes(tm, e_dim, n_e_pad, ne_chunk, in_bytes,
                                   mm_bytes, const_bufs)
        vmem_limit = int(min(vmem_cap - (2 << 20),
                             max(work + (work >> 2) + (8 << 20), 32 << 20)))

        kernel = functools.partial(
            _vq2_kernel, n_valid_rows=n, mask_tail=(n_pad != n),
            ne_chunk=ne_chunk, matmul_dtype=matmul_dtype)

        const_kw = dict(pipeline_mode=pl.Buffered(1)) if single_buffer_consts else {}
        grid_spec = pltpu.PrefetchScalarGridSpec(
            num_scalar_prefetch=0,
            grid=(num_tiles,),
            in_specs=[
                pl.BlockSpec((tm, e_dim), lambda i: (i, 0)),                # z rows
                pl.BlockSpec((e_dim, n_e_pad), lambda i: (0, 0), **const_kw),
                pl.BlockSpec((1, n_e_pad), lambda i: (0, 0), **const_kw),
                pl.BlockSpec((n_e_pad, e_dim), lambda i: (0, 0), **const_kw),
                pl.BlockSpec((n_e_pad, e_dim), lambda i: (0, 0), **const_kw),
            ],
            out_specs=[
                pl.BlockSpec((tm, e_dim), lambda i: (i, 0)),                # z_q
                pl.BlockSpec((tm, 1), lambda i: (i, 0)),                    # indices
                pl.BlockSpec((1, 1, e_dim), lambda i: (i, 0, 0)),           # SSE
            ],
        )
        out_shapes = (
            jax.ShapeDtypeStruct((n_pad, e_dim), in_dtype),
            jax.ShapeDtypeStruct((n_pad, 1), jnp.int32),
            jax.ShapeDtypeStruct((num_tiles, 1, e_dim), jnp.float32),
        )
        flops = 6 * n_pad * n_e_pad * e_dim + 8 * n_pad * n_e_pad
        bytes_accessed = (2 * n_pad * e_dim * in_bytes + n_pad * 4
                          + num_tiles * e_dim * 4
                          + n_e_pad * e_dim * (mm_bytes + 4) + n_e_pad * 4)
        return pl.pallas_call(
            kernel,
            out_shape=out_shapes,
            grid_spec=grid_spec,
            compiler_params=pltpu.CompilerParams(
                dimension_semantics=("parallel",),     # no cross-tile state
                vmem_limit_bytes=vmem_limit),
            cost_estimate=pl.CostEstimate(flops=int(flops), transcendentals=0,
                                          bytes_accessed=int(bytes_accessed)),
        )(zf, embt2, esq, emb_hi, emb_lo)

    try:
        zq_flat, idx_col, sse_partials = run(single_buffer_consts=True)
    except Exception:
        # pl.Buffered(1) (single-buffered grid-constant codebook inputs) not
        # supported on this build -> fall back to default double buffering.
        zq_flat, idx_col, sse_partials = run(single_buffer_consts=False)

    min_encoding_indices = idx_col[:n, 0]
    mse = jnp.sum(sse_partials) / jnp.float32(n * e_dim)
    # Forward value of both loss variants (detach only changes gradients).
    loss = (mse + beta * mse) if legacy else (beta * mse + mse)
    # TODO(synk): straight-through / .detach() gradient semantics would require
    # a custom_vjp; this kernel implements the forward values only.

    z_q = jnp.transpose(zq_flat[:n].reshape(B, H, W, C), (0, 3, 1, 2))
    # VectorQuantizer2 returns perplexity=None and min_encodings=None.
    return z_q, loss, (None, None, min_encoding_indices)


def _reference_forward(z_nchw, embedding, beta, legacy=True):
    """Pure-JAX reference mirroring the PyTorch module's forward values."""
    B, C, H, W = z_nchw.shape
    z = jnp.transpose(z_nchw, (0, 2, 3, 1))
    zf = z.reshape(-1, C).astype(jnp.float32)
    emb = embedding.astype(jnp.float32)
    dots = jnp.dot(zf, emb.T, precision=jax.lax.Precision.HIGHEST)
    d = (jnp.sum(zf ** 2, axis=1, keepdims=True)
         + jnp.sum(emb ** 2, axis=1) - 2.0 * dots)
    idx = jnp.argmin(d, axis=1)
    zq = emb[idx].reshape(z.shape)
    mse = jnp.mean((zq - z.astype(jnp.float32)) ** 2)
    loss = (mse + beta * mse) if legacy else (beta * mse + mse)
    return jnp.transpose(zq, (0, 3, 1, 2)), loss, idx, d


if __name__ == "__main__":
    n_e, e_dim, beta = 200, 32, 0.25
    B, H, W = 2, 16, 15            # N = 480 rows: exercises the padded-tail path;
                                   # n_e = 200: exercises codebook lane padding.

    key = jax.random.PRNGKey(0)
    k_emb, k_z = jax.random.split(key)
    # nn.Embedding(n_e, e_dim).weight.data.uniform_(-1/n_e, 1/n_e)
    embedding = jax.random.uniform(
        k_emb, (n_e, e_dim), minval=-1.0 / n_e, maxval=1.0 / n_e,
        dtype=jnp.float32)
    z = jax.random.normal(k_z, (B, e_dim, H, W), dtype=jnp.float32)

    zq_ref, loss_ref, idx_ref, d_ref = _reference_forward(z, embedding, beta)
    d_min_ref = d_ref.min(axis=1)
    rows = jnp.arange(d_ref.shape[0])

    # Default path: bf16 distance matmul, single codebook chunk, 2 row tiles.
    z_q, loss, (perp, min_enc, idx) = jax.block_until_ready(
        vector_quantizer2_forward(z, embedding, beta))

    assert perp is None and min_enc is None
    assert idx.shape == (B * H * W,) and idx.dtype == jnp.int32
    assert bool(jnp.all(idx < n_e))
    # Chosen codes are optimal up to bf16 near-tie tolerance; almost all indices
    # match torch.argmin exactly (documented deviation only on near-ties).
    assert bool(jnp.all(d_ref[rows, idx] <= d_min_ref + 5e-3))
    assert float(jnp.mean((idx == idx_ref).astype(jnp.float32))) >= 0.95
    # z_q equals the f32 codebook gather of the kernel's own indices.
    zq_from_idx = jnp.transpose(embedding[idx].reshape(B, H, W, e_dim),
                                (0, 3, 1, 2))
    assert z_q.shape == zq_ref.shape and z_q.dtype == z.dtype
    assert jnp.allclose(z_q, zq_from_idx, atol=1e-5, rtol=1e-5)
    assert jnp.allclose(loss, loss_ref, atol=1e-5, rtol=1e-3)

    # Multi-chunk codebook path (same math split over two lane chunks) must
    # agree with the single-chunk path.
    z_q2, loss2, (_, _, idx2) = jax.block_until_ready(
        vector_quantizer2_forward(z, embedding, beta, ne_chunk=128))
    assert bool(jnp.array_equal(idx2, idx))
    assert jnp.allclose(z_q2, z_q, atol=0.0, rtol=0.0)
    assert jnp.allclose(loss2, loss, atol=1e-6, rtol=1e-6)

    print("KERNEL_OK")
</pallas_src>

<mosaic_0001>
module attributes {stable_mosaic.version = 11 : i64} {
  func.func @_vq2_kernel(%arg0: i32, %arg1: memref<256x32xf32, #tpu.memory_space<vmem>>, %arg2: memref<32x256xbf16, #tpu.memory_space<vmem>>, %arg3: memref<1x256xf32, #tpu.memory_space<vmem>>, %arg4: memref<256x32xbf16, #tpu.memory_space<vmem>>, %arg5: memref<256x32xbf16, #tpu.memory_space<vmem>>, %arg6: memref<256x32xf32, #tpu.memory_space<vmem>>, %arg7: memref<256x1xi32, #tpu.memory_space<vmem>>, %arg8: memref<1x1x32xf32, #tpu.memory_space<vmem>>) attributes {dimension_semantics = [#tpu.dimension_semantics<parallel>], iteration_bounds = array<i64: 2>, scalar_prefetch = 0 : i64, scratch_operands = 0 : i64, tpu.core_type = #tpu.core_type<tc>, window_params = [{transform_indices = @transform_0, window_bounds = array<i64: 256, 32>}, {pipeline_mode = #tpu.pipeline_mode<synchronous>, transform_indices = @transform_1, window_bounds = array<i64: 32, 256>}, {pipeline_mode = #tpu.pipeline_mode<synchronous>, transform_indices = @transform_2, window_bounds = array<i64: 1, 256>}, {pipeline_mode = #tpu.pipeline_mode<synchronous>, transform_indices = @transform_3, window_bounds = array<i64: 256, 32>}, {pipeline_mode = #tpu.pipeline_mode<synchronous>, transform_indices = @transform_4, window_bounds = array<i64: 256, 32>}, {transform_indices = @transform_5, window_bounds = array<i64: 256, 32>}, {transform_indices = @transform_6, window_bounds = array<i64: 256, 1>}, {transform_indices = @transform_7, window_bounds = array<i64: 1, 1, 32>}]} {
    %c0 = arith.constant 0 : index
    %c0_0 = arith.constant 0 : index
    %0 = vector.load %arg1[%c0, %c0_0] : memref<256x32xf32, #tpu.memory_space<vmem>>, vector<256x32xf32>
    %1 = arith.truncf %0 : vector<256x32xf32> to vector<256x32xbf16>
    %c0_1 = arith.constant 0 : index
    %c0_2 = arith.constant 0 : index
    %2 = vector.load %arg2[%c0_1, %c0_2] : memref<32x256xbf16, #tpu.memory_space<vmem>>, vector<32x256xbf16>
    %c0_3 = arith.constant 0 : index
    %c0_4 = arith.constant 0 : index
    %3 = vector.load %arg3[%c0_3, %c0_4] : memref<1x256xf32, #tpu.memory_space<vmem>>, vector<1x256xf32>
    %cst = arith.constant dense<0.000000e+00> : vector<256x256xf32>
    %4 = tpu.matmul %1, %2, %cst {dimension_numbers = #tpu.dot_dimension_numbers<[1], [0], [0], [1], [0, 0, 1, 1], [], []>} : vector<256x32xbf16>, vector<32x256xbf16>, vector<256x256xf32> -> vector<256x256xf32>
    %5 = vector.broadcast %3 : vector<1x256xf32> to vector<256x256xf32>
    %6 = arith.subf %5, %4 : vector<256x256xf32>
    %7 = tpu.iota {dimensions = array<i32: 1>} : vector<256x256xi32>
    %c0_i32 = arith.constant 0 : i32
    %8 = vector.broadcast %c0_i32 : i32 to vector<256x256xi32>
    %9 = arith.addi %7, %8 : vector<256x256xi32>
    %cst_5 = arith.constant dense<0x7F800000> : vector<256xf32>
    %10 = vector.multi_reduction <minimumf>, %6, %cst_5 [1] : vector<256x256xf32> to vector<256xf32>
    %11 = vector.shape_cast %10 : vector<256xf32> to vector<256x1xf32>
    %12 = vector.broadcast %11 : vector<256x1xf32> to vector<256x256xf32>
    %13 = arith.cmpf oeq, %6, %12 : vector<256x256xf32>
    %c256_i32 = arith.constant 256 : i32
    %14 = vector.broadcast %c256_i32 : i32 to vector<256x256xi32>
    %15 = arith.select %13, %9, %14 : vector<256x256xi1>, vector<256x256xi32>
    %cst_6 = arith.constant dense<2147483647> : vector<256xi32>
    %16 = vector.multi_reduction <minsi>, %15, %cst_6 [1] : vector<256x256xi32> to vector<256xi32>
    %17 = vector.shape_cast %16 : vector<256xi32> to vector<256x1xi32>
    %c0_7 = arith.constant 0 : index
    %c0_8 = arith.constant 0 : index
    %18 = vector.load %arg7[%c0_7, %c0_8] : memref<256x1xi32, #tpu.memory_space<vmem>>, vector<256x1xi32>
    tpu.vector_store %arg7[%c0_7, %c0_8], %17 {strides = array<i32>} : memref<256x1xi32, #tpu.memory_space<vmem>>, vector<256x1xi32>,
    %cst_9 = arith.constant 0.000000e+00 : f32
    %19 = vector.broadcast %cst_9 : f32 to vector<256x32xf32>
    %20 = tpu.iota {dimensions = array<i32: 1>} : vector<256x256xi32>
    %c0_i32_10 = arith.constant 0 : i32
    %21 = vector.broadcast %c0_i32_10 : i32 to vector<256x256xi32>
    %22 = arith.addi %20, %21 : vector<256x256xi32>
    %23 = vector.broadcast %17 : vector<256x1xi32> to vector<256x256xi32>
    %24 = arith.cmpi eq, %22, %23 : vector<256x256xi32>
    %25 = arith.extui %24 : vector<256x256xi1> to vector<256x256xi32>
    %26 = arith.sitofp %25 : vector<256x256xi32> to vector<256x256xf32>
    %27 = arith.truncf %26 : vector<256x256xf32> to vector<256x256xbf16>
    %c0_11 = arith.constant 0 : index
    %c0_12 = arith.constant 0 : index
    %28 = vector.load %arg4[%c0_11, %c0_12] : memref<256x32xbf16, #tpu.memory_space<vmem>>, vector<256x32xbf16>
    %cst_13 = arith.constant dense<0.000000e+00> : vector<256x32xf32>
    %29 = tpu.matmul %27, %28, %cst_13 {dimension_numbers = #tpu.dot_dimension_numbers<[1], [0], [0], [1], [0, 0, 1, 1], [], []>} : vector<256x256xbf16>, vector<256x32xbf16>, vector<256x32xf32> -> vector<256x32xf32>
    %30 = arith.addf %19, %29 : vector<256x32xf32>
    %c0_14 = arith.constant 0 : index
    %c0_15 = arith.constant 0 : index
    %31 = vector.load %arg5[%c0_14, %c0_15] : memref<256x32xbf16, #tpu.memory_space<vmem>>, vector<256x32xbf16>
    %cst_16 = arith.constant dense<0.000000e+00> : vector<256x32xf32>
    %32 = tpu.matmul %27, %31, %cst_16 {dimension_numbers = #tpu.dot_dimension_numbers<[1], [0], [0], [1], [0, 0, 1, 1], [], []>} : vector<256x256xbf16>, vector<256x32xbf16>, vector<256x32xf32> -> vector<256x32xf32>
    %33 = arith.addf %30, %32 : vector<256x32xf32>
    %c0_17 = arith.constant 0 : index
    %c0_18 = arith.constant 0 : index
    %34 = vector.load %arg6[%c0_17, %c0_18] : memref<256x32xf32, #tpu.memory_space<vmem>>, vector<256x32xf32>
    tpu.vector_store %arg6[%c0_17, %c0_18], %33 {strides = array<i32>} : memref<256x32xf32, #tpu.memory_space<vmem>>, vector<256x32xf32>,
    %35 = arith.subf %33, %0 : vector<256x32xf32>
    %36 = tpu.iota {dimensions = array<i32: 0>} : vector<256x1xi32>
    %c256_i32_19 = arith.constant 256 : i32
    %37 = arith.muli %arg0, %c256_i32_19 : i32
    %38 = vector.broadcast %37 : i32 to vector<256x1xi32>
    %39 = arith.addi %36, %38 : vector<256x1xi32>
    %c480_i32 = arith.constant 480 : i32
    %40 = vector.broadcast %c480_i32 : i32 to vector<256x1xi32>
    %41 = arith.cmpi slt, %39, %40 : vector<256x1xi32>
    %cst_20 = arith.constant 0.000000e+00 : f32
    %42 = vector.shape_cast %41 : vector<256x1xi1> to vector<256x1xi1>
    %43 = vector.broadcast %42 : vector<256x1xi1> to vector<256x32xi1>
    %44 = vector.broadcast %cst_20 : f32 to vector<256x32xf32>
    %45 = arith.select %43, %35, %44 : vector<256x32xi1>, vector<256x32xf32>
    %46 = arith.mulf %45, %45 : vector<256x32xf32>
    %cst_21 = arith.constant dense<0.000000e+00> : vector<32xf32>
    %47 = vector.multi_reduction <add>, %46, %cst_21 [0] : vector<256x32xf32> to vector<32xf32>
    %48 = vector.shape_cast %47 : vector<32xf32> to vector<1x32xf32>
    %49 = vector.shape_cast %48 : vector<1x32xf32> to vector<1x1x32xf32>
    %c0_22 = arith.constant 0 : index
    %c0_23 = arith.constant 0 : index
    %c0_24 = arith.constant 0 : index
    %50 = vector.load %arg8[%c0_22, %c0_23, %c0_24] : memref<1x1x32xf32, #tpu.memory_space<vmem>>, vector<1x1x32xf32>
    tpu.vector_store %arg8[%c0_22, %c0_23, %c0_24], %49 {strides = array<i32>} : memref<1x1x32xf32, #tpu.memory_space<vmem>>, vector<1x1x32xf32>,
    return
  }
  func.func @transform_0(%arg0: i32) -> (i32, i32) {
    %c0_i32 = arith.constant 0 : i32
    %c0_i32_0 = arith.constant 0 : i32
    return %arg0, %c0_i32 : i32, i32
  }
  func.func @transform_1(%arg0: i32) -> (i32, i32) {
    %c0_i32 = arith.constant 0 : i32
    %c0_i32_0 = arith.constant 0 : i32
    %c0_i32_1 = arith.constant 0 : i32
    return %c0_i32, %c0_i32_0 : i32, i32
  }
  func.func @transform_2(%arg0: i32) -> (i32, i32) {
    %c0_i32 = arith.constant 0 : i32
    %c0_i32_0 = arith.constant 0 : i32
    %c0_i32_1 = arith.constant 0 : i32
    return %c0_i32, %c0_i32_0 : i32, i32
  }
  func.func @transform_3(%arg0: i32) -> (i32, i32) {
    %c0_i32 = arith.constant 0 : i32
    %c0_i32_0 = arith.constant 0 : i32
    %c0_i32_1 = arith.constant 0 : i32
    return %c0_i32, %c0_i32_0 : i32, i32
  }
  func.func @transform_4(%arg0: i32) -> (i32, i32) {
    %c0_i32 = arith.constant 0 : i32
    %c0_i32_0 = arith.constant 0 : i32
    %c0_i32_1 = arith.constant 0 : i32
    return %c0_i32, %c0_i32_0 : i32, i32
  }
  func.func @transform_5(%arg0: i32) -> (i32, i32) {
    %c0_i32 = arith.constant 0 : i32
    %c0_i32_0 = arith.constant 0 : i32
    return %arg0, %c0_i32 : i32, i32
  }
  func.func @transform_6(%arg0: i32) -> (i32, i32) {
    %c0_i32 = arith.constant 0 : i32
    %c0_i32_0 = arith.constant 0 : i32
    return %arg0, %c0_i32 : i32, i32
  }
  func.func @transform_7(%arg0: i32) -> (i32, i32, i32) {
    %c0_i32 = arith.constant 0 : i32
    %c0_i32_0 = arith.constant 0 : i32
    %c0_i32_1 = arith.constant 0 : i32
    return %arg0, %c0_i32, %c0_i32_0 : i32, i32, i32
  }
}

module attributes {stable_mosaic.version = 11 : i64} {
  func.func @_vq2_kernel(%arg0: i32, %arg1: memref<256x32xf32, #tpu.memory_space<vmem>>, %arg2: memref<32x256xbf16, #tpu.memory_space<vmem>>, %arg3: memref<1x256xf32, #tpu.memory_space<vmem>>, %arg4: memref<256x32xbf16, #tpu.memory_space<vmem>>, %arg5: memref<256x32xbf16, #tpu.memory_space<vmem>>, %arg6: memref<256x32xf32, #tpu.memory_space<vmem>>, %arg7: memref<256x1xi32, #tpu.memory_space<vmem>>, %arg8: memref<1x1x32xf32, #tpu.memory_space<vmem>>) attributes {dimension_semantics = [#tpu.dimension_semantics<parallel>], iteration_bounds = array<i64: 2>, scalar_prefetch = 0 : i64, scratch_operands = 0 : i64, tpu.core_type = #tpu.core_type<tc>, window_params = [{transform_indices = @transform_0, window_bounds = array<i64: 256, 32>}, {pipeline_mode = #tpu.pipeline_mode<synchronous>, transform_indices = @transform_1, window_bounds = array<i64: 32, 256>}, {pipeline_mode = #tpu.pipeline_mode<synchronous>, transform_indices = @transform_2, window_bounds = array<i64: 1, 256>}, {pipeline_mode = #tpu.pipeline_mode<synchronous>, transform_indices = @transform_3, window_bounds = array<i64: 256, 32>}, {pipeline_mode = #tpu.pipeline_mode<synchronous>, transform_indices = @transform_4, window_bounds = array<i64: 256, 32>}, {transform_indices = @transform_5, window_bounds = array<i64: 256, 32>}, {transform_indices = @transform_6, window_bounds = array<i64: 256, 1>}, {transform_indices = @transform_7, window_bounds = array<i64: 1, 1, 32>}]} {
    %c0 = arith.constant 0 : index
    %c0_0 = arith.constant 0 : index
    %0 = vector.load %arg1[%c0, %c0_0] : memref<256x32xf32, #tpu.memory_space<vmem>>, vector<256x32xf32>
    %1 = arith.truncf %0 : vector<256x32xf32> to vector<256x32xbf16>
    %c0_1 = arith.constant 0 : index
    %c0_2 = arith.constant 0 : index
    %2 = vector.load %arg2[%c0_1, %c0_2] : memref<32x256xbf16, #tpu.memory_space<vmem>>, vector<32x256xbf16>
    %c0_3 = arith.constant 0 : index
    %c0_4 = arith.constant 0 : index
    %3 = vector.load %arg3[%c0_3, %c0_4] : memref<1x256xf32, #tpu.memory_space<vmem>>, vector<1x256xf32>
    %cst = arith.constant dense<0.000000e+00> : vector<256x256xf32>
    %4 = tpu.matmul %1, %2, %cst {dimension_numbers = #tpu.dot_dimension_numbers<[1], [0], [0], [1], [0, 0, 1, 1], [], []>} : vector<256x32xbf16>, vector<32x256xbf16>, vector<256x256xf32> -> vector<256x256xf32>
    %5 = vector.broadcast %3 : vector<1x256xf32> to vector<256x256xf32>
    %6 = arith.subf %5, %4 : vector<256x256xf32>
    %7 = tpu.iota {dimensions = array<i32: 1>} : vector<256x256xi32>
    %c0_i32 = arith.constant 0 : i32
    %8 = vector.broadcast %c0_i32 : i32 to vector<256x256xi32>
    %9 = arith.addi %7, %8 : vector<256x256xi32>
    %cst_5 = arith.constant dense<0x7F800000> : vector<256xf32>
    %10 = vector.multi_reduction <minimumf>, %6, %cst_5 [1] : vector<256x256xf32> to vector<256xf32>
    %11 = vector.shape_cast %10 : vector<256xf32> to vector<256x1xf32>
    %12 = vector.broadcast %11 : vector<256x1xf32> to vector<256x256xf32>
    %13 = arith.cmpf oeq, %6, %12 : vector<256x256xf32>
    %c256_i32 = arith.constant 256 : i32
    %14 = vector.broadcast %c256_i32 : i32 to vector<256x256xi32>
    %15 = arith.select %13, %9, %14 : vector<256x256xi1>, vector<256x256xi32>
    %cst_6 = arith.constant dense<2147483647> : vector<256xi32>
    %16 = vector.multi_reduction <minsi>, %15, %cst_6 [1] : vector<256x256xi32> to vector<256xi32>
    %17 = vector.shape_cast %16 : vector<256xi32> to vector<256x1xi32>
    %c0_7 = arith.constant 0 : index
    %c0_8 = arith.constant 0 : index
    %18 = vector.load %arg7[%c0_7, %c0_8] : memref<256x1xi32, #tpu.memory_space<vmem>>, vector<256x1xi32>
    tpu.vector_store %arg7[%c0_7, %c0_8], %17 {strides = array<i32>} : memref<256x1xi32, #tpu.memory_space<vmem>>, vector<256x1xi32>,
    %cst_9 = arith.constant 0.000000e+00 : f32
    %19 = vector.broadcast %cst_9 : f32 to vector<256x32xf32>
    %20 = tpu.iota {dimensions = array<i32: 1>} : vector<256x256xi32>
    %c0_i32_10 = arith.constant 0 : i32
    %21 = vector.broadcast %c0_i32_10 : i32 to vector<256x256xi32>
    %22 = arith.addi %20, %21 : vector<256x256xi32>
    %23 = vector.broadcast %17 : vector<256x1xi32> to vector<256x256xi32>
    %24 = arith.cmpi eq, %22, %23 : vector<256x256xi32>
    %25 = arith.extui %24 : vector<256x256xi1> to vector<256x256xi32>
    %26 = arith.sitofp %25 : vector<256x256xi32> to vector<256x256xf32>
    %27 = arith.truncf %26 : vector<256x256xf32> to vector<256x256xbf16>
    %c0_11 = arith.constant 0 : index
    %c0_12 = arith.constant 0 : index
    %28 = vector.load %arg4[%c0_11, %c0_12] : memref<256x32xbf16, #tpu.memory_space<vmem>>, vector<256x32xbf16>
    %cst_13 = arith.constant dense<0.000000e+00> : vector<256x32xf32>
    %29 = tpu.matmul %27, %28, %cst_13 {dimension_numbers = #tpu.dot_dimension_numbers<[1], [0], [0], [1], [0, 0, 1, 1], [], []>} : vector<256x256xbf16>, vector<256x32xbf16>, vector<256x32xf32> -> vector<256x32xf32>
    %30 = arith.addf %19, %29 : vector<256x32xf32>
    %c0_14 = arith.constant 0 : index
    %c0_15 = arith.constant 0 : index
    %31 = vector.load %arg5[%c0_14, %c0_15] : memref<256x32xbf16, #tpu.memory_space<vmem>>, vector<256x32xbf16>
    %cst_16 = arith.constant dense<0.000000e+00> : vector<256x32xf32>
    %32 = tpu.matmul %27, %31, %cst_16 {dimension_numbers = #tpu.dot_dimension_numbers<[1], [0], [0], [1], [0, 0, 1, 1], [], []>} : vector<256x256xbf16>, vector<256x32xbf16>, vector<256x32xf32> -> vector<256x32xf32>
    %33 = arith.addf %30, %32 : vector<256x32xf32>
    %c0_17 = arith.constant 0 : index
    %c0_18 = arith.constant 0 : index
    %34 = vector.load %arg6[%c0_17, %c0_18] : memref<256x32xf32, #tpu.memory_space<vmem>>, vector<256x32xf32>
    tpu.vector_store %arg6[%c0_17, %c0_18], %33 {strides = array<i32>} : memref<256x32xf32, #tpu.memory_space<vmem>>, vector<256x32xf32>,
    %35 = arith.subf %33, %0 : vector<256x32xf32>
    %36 = tpu.iota {dimensions = array<i32: 0>} : vector<256x1xi32>
    %c256_i32_19 = arith.constant 256 : i32
    %37 = arith.muli %arg0, %c256_i32_19 : i32
    %38 = vector.broadcast %37 : i32 to vector<256x1xi32>
    %39 = arith.addi %36, %38 : vector<256x1xi32>
    %c480_i32 = arith.constant 480 : i32
    %40 = vector.broadcast %c480_i32 : i32 to vector<256x1xi32>
    %41 = arith.cmpi slt, %39, %40 : vector<256x1xi32>
    %cst_20 = arith.constant 0.000000e+00 : f32
    %42 = vector.shape_cast %41 : vector<256x1xi1> to vector<256x1xi1>
    %43 = vector.broadcast %42 : vector<256x1xi1> to vector<256x32xi1>
    %44 = vector.broadcast %cst_20 : f32 to vector<256x32xf32>
    %45 = arith.select %43, %35, %44 : vector<256x32xi1>, vector<256x32xf32>
    %46 = arith.mulf %45, %45 : vector<256x32xf32>
    %cst_21 = arith.constant dense<0.000000e+00> : vector<32xf32>
    %47 = vector.multi_reduction <add>, %46, %cst_21 [0] : vector<256x32xf32> to vector<32xf32>
    %48 = vector.shape_cast %47 : vector<32xf32> to vector<1x32xf32>
    %49 = vector.shape_cast %48 : vector<1x32xf32> to vector<1x1x32xf32>
    %c0_22 = arith.constant 0 : index
    %c0_23 = arith.constant 0 : index
    %c0_24 = arith.constant 0 : index
    %50 = vector.load %arg8[%c0_22, %c0_23, %c0_24] : memref<1x1x32xf32, #tpu.memory_space<vmem>>, vector<1x1x32xf32>
    tpu.vector_store %arg8[%c0_22, %c0_23, %c0_24], %49 {strides = array<i32>} : memref<1x1x32xf32, #tpu.memory_space<vmem>>, vector<1x1x32xf32>,
    return
  }
  func.func @transform_0(%arg0: i32) -> (i32, i32) {
    %c0_i32 = arith.constant 0 : i32
    %c0_i32_0 = arith.constant 0 : i32
    return %arg0, %c0_i32 : i32, i32
  }
  func.func @transform_1(%arg0: i32) -> (i32, i32) {
    %c0_i32 = arith.constant 0 : i32
    %c0_i32_0 = arith.constant 0 : i32
    %c0_i32_1 = arith.constant 0 : i32
    return %c0_i32, %c0_i32_0 : i32, i32
  }
  func.func @transform_2(%arg0: i32) -> (i32, i32) {
    %c0_i32 = arith.constant 0 : i32
    %c0_i32_0 = arith.constant 0 : i32
    %c0_i32_1 = arith.constant 0 : i32
    return %c0_i32, %c0_i32_0 : i32, i32
  }
  func.func @transform_3(%arg0: i32) -> (i32, i32) {
    %c0_i32 = arith.constant 0 : i32
    %c0_i32_0 = arith.constant 0 : i32
    %c0_i32_1 = arith.constant 0 : i32
    return %c0_i32, %c0_i32_0 : i32, i32
  }
  func.func @transform_4(%arg0: i32) -> (i32, i32) {
    %c0_i32 = arith.constant 0 : i32
    %c0_i32_0 = arith.constant 0 : i32
    %c0_i32_1 = arith.constant 0 : i32
    return %c0_i32, %c0_i32_0 : i32, i32
  }
  func.func @transform_5(%arg0: i32) -> (i32, i32) {
    %c0_i32 = arith.constant 0 : i32
    %c0_i32_0 = arith.constant 0 : i32
    return %arg0, %c0_i32 : i32, i32
  }
  func.func @transform_6(%arg0: i32) -> (i32, i32) {
    %c0_i32 = arith.constant 0 : i32
    %c0_i32_0 = arith.constant 0 : i32
    return %arg0, %c0_i32 : i32, i32
  }
  func.func @transform_7(%arg0: i32) -> (i32, i32, i32) {
    %c0_i32 = arith.constant 0 : i32
    %c0_i32_0 = arith.constant 0 : i32
    %c0_i32_1 = arith.constant 0 : i32
    return %arg0, %c0_i32, %c0_i32_0 : i32, i32, i32
  }
}

</mosaic_0001>

<bundles_post_ra>
// kernel: tpu_custom_call.1
= control target key start
LH: loop header
LB: loop body
LE: loop exit
PB: predicated region body
PF: predicated region fallthrough
CT: control target
= control target key end

     0   :  { %13 = vsyncpa [#allocation3], 0  ;;  %s4953_s0 = inlined_call_operand.vmem [shape: f32[512,32], index: 0, kind: input, shape index: {}]   ;;  %s4954_s1 = inlined_call_operand.vmem [shape: bf16[32,256], index: 1, kind: input, shape index: {}]   ;;  %s4955_s2 = inlined_call_operand.vmem [shape: f32[1,256], index: 2, kind: input, shape index: {}]   ;;  %s4956_s3 = inlined_call_operand.vmem [shape: bf16[256,32], index: 3, kind: input, shape index: {}]   ;;  %s4957_s4 = inlined_call_operand.vmem [shape: bf16[256,32], index: 4, kind: input, shape index: {}]   ;;  %s4958_s5 = inlined_call_operand.vmem [shape: f32[512,32], index: 5, kind: output, shape index: {0}]   ;;  %s4959_s6 = inlined_call_operand.vmem [shape: s32[512,1], index: 6, kind: output, shape index: {1}]   ;;  %s4960_s7 = inlined_call_operand.hbm [shape: f32[2,1,32], index: 7, kind: output, shape index: {2}]  }
   0x1   :  { %15 = vsyncpa [#allocation3 + $0x1], 0  ;;  %s3472_s24 = smov 0   ;;  %s3474_s25 = smov 0  }
   0x2   :  { %s3476_s26 = smov 0   ;;  %s3478_s27 = smov 0  }
   0x3 LB: > { %s3493_s28 = sadd.s32 4294967295, %s3427_s27   ;;  %s2768_s29 = sadd.s32 4294967294, %s3427_s27   ;;  %s3427_s27 = sphi %s3478_s27, %s5040_s27   ;;  %s3423_s26 = sphi %s3476_s26, %s5039_s26   ;;  %s3419_s25 = sphi %s3474_s25, %s5038_s25   ;;  %s3415_s24 = sphi %s3472_s24, %s5037_s24  }
   0x4   : > { %s3497_s30 = sadd.s32 1, %s3427_s27   ;;  %s190_s8 = sadd.s32 1, %s3423_s26 }
   0x5   : > { %s187_s9 = ssub.s32 %s3427_s27, %s3497_s30  ;;  %p200_p0 = scmp.ne.s32.totalorder %s3423_s26, %s3419_s25 }
   0x6   : > { %p188_p1 = scmp.eq.s32.totalorder %s187_s9, 0  ;;  %p201_p2 = scmp.eq.s32.totalorder %s3493_s28, 1 }
   0x7   : > { %p206_p3 = scmp.ne.s32.totalorder %s3419_s25, %s3415_s24  ;;  %p207_p4 = scmp.eq.s32.totalorder %s2768_s29, 1 }
   0x8   : > { %s3508_s10 = scalar_select %p188_p1, %s3423_s26, %s190_s8  }
   0x9   : > { %p3510_p5 = por %p201_p2, %p200_p0  ;;  %p3514_p6 = por %p207_p4, %p206_p3 }
   0xa   : > { %p2771_p7 = scmp.ge.s32.totalorder %s3427_s27, 1  ;;  %p246_p8 = scmp.lt.s32.totalorder %s3427_s27, 3 }
   0xc   : > { %p247_p9 = pnand %p2771_p7, %p246_p8 }
   0xe   : > { %250 = sbr.rel (%p247_p9) target bundleno = 1137 (0x471), region = 40 }
  0x15   : > { %v3295_v0 = vld [vmem:[%s4954_s1 + $0x4] ss:$8 sps:$4 sm:$0xff]   ;;  %s2772_s15 = sshll.u32 %s3493_s28, 5  ;;  %v3297_v1 = vld [vmem:[%s4954_s1] ss:$8 sps:$4 sm:$0xff]   ;;  %v3429_v2 = vmov 0   ;;  %v4961_v53 = vlaneseq }
  0x16   : > { %460 = vmatprep.mubr.bf16.mxu0 %v3429_v2  ;;  %p288_p10 = scmp.lt.s32.totalorder %s2772_s15, 63  ;;  %540 = vmatprep.mubr.bf16.mxu1 %v3429_v2  ;;  %v3298_v3 = vld [vmem:[%s4954_s1 + $0x14] ss:$8 sps:$4 sm:$0xff]   ;;  %v3300_v4 = vld [vmem:[%s4954_s1 + $0x10] ss:$8 sps:$4 sm:$0xff]   ;;  %vm379_vm0 = vcmask 261120  }
  0x17   : > { %428 = vmatprep.subr.bf16.mxu0 %v3295_v0  ;;  %3250 = vmatprep.subr.bf16.mxu1 %v3295_v0  ;;  %v3606_v54 = vshrl.u32 %v4961_v53, 7  ;;  %v358_v56 = vld [vmem:[%s4955_s2] sm:$0x3]  ;;  %s3022_s21 = sshll.u32 %s3493_s28, 8  ;;  %s3023_s13 = sshll.u32 %s3493_s28, 4 }
  0x18   : > { %429 = vmatpush1.bf16.msra.mxu0 %v3297_v1  ;;  %s5042_s15 = smov (!%p288_p10, %s2772_s15), 63  ;;  %3252 = vmatpush1.bf16.msra.mxu1 %v3297_v1  ;;  %s4911_s17 = scalar_lea.hbm %s4960_s7, %s3023_s13 }
  0x19   : > { %430 = vmatprep.subr.bf16.mxu0 %v3298_v3  ;;  %3251 = vmatprep.subr.bf16.mxu1 %v3298_v3  ;;  %s3535_s22 = sshll.u32 %s5042_s15, 3  ;;  %4988 = vst [vmem:[#allocation5_spill] sm:$0xff] %v3606_v54  ;;  %v624_v55 = vsub.s32 0, %v3606_v54  ;;  %v628_v57 = vsub.s32 1, %v3606_v54  ;;  %s3431_s28 = smov [#allocation2]  }
  0x1a   : > { %s3541_s8 = scalar_lea.vmem %s4953_s0, %s3535_s22  ;;  %s4414_s20 = scalar_lea.vmem %s4959_s6, %s3535_s22 }
  0x1b   : > { %v306_v5 = vld [vmem:[%s3541_s8] sm:$0xff]  ;;  %v307_v6 = vld [vmem:[%s3541_s8 + $0x8] sm:$0xff]  ;;  %v308_v8 = vld [vmem:[%s3541_s8 + $0x10] sm:$0xff]  ;;  %v3613_v58 = vrot.slane %v358_v56, %v624_v55  ;;  %v3615_v59 = vrot.slane %v358_v56, %v628_v57  ;;  %s4715_s9 = scalar_lea.vmem %s4958_s5, %s3535_s22  ;;  %s285_s22 = sand.u32 1, %s3419_s25  }
  0x1c   : > { %431 = vmatpush1.bf16.msra.mxu0 %v3300_v4  ;;  %3253 = vmatpush1.bf16.msra.mxu1 %v3300_v4  ;;  %v338_v7 = vpack.c.bf16 %v307_v6, %v306_v5  ;;  %v309_v9 = vld [vmem:[%s3541_s8 + $0x18] sm:$0xff]  ;;  %v322_v10 = vld [vmem:[%s3541_s8 + $0x80] sm:$0xff]  ;;  %v323_v11 = vld [vmem:[%s3541_s8 + $0x88] sm:$0xff]  ;;  %s286_s14 = scalar_lea.vmem [#allocation2], %s285_s22  ;;  %s2643_s18 = scalar_lea.sflag [#allocation3], %s285_s22 }
  0x1d   : > { %v346_v12 = vpack.c.bf16 %v323_v11, %v322_v10  ;;  %v339_v13 = vpack.c.bf16 %v309_v9, %v308_v8  ;;  %v324_v14 = vld [vmem:[%s3541_s8 + $0x90] sm:$0xff]  ;;  %v325_v15 = vld [vmem:[%s3541_s8 + $0x98] sm:$0xff]  ;;  %v310_v16 = vld [vmem:[%s3541_s8 + $0x20] sm:$0xff]  ;;  %s2663_s15 = sshll.u32 %s286_s14, 4  ;;  %s4913_s15 = int_to_ptr.vmem [resolvable:$true] %s2663_s15 }
  0x1e   : > { %v311_v17 = vld [vmem:[%s3541_s8 + $0x28] sm:$0xff]  ;;  %v347_v18 = vpack.c.bf16 %v325_v15, %v324_v14  ;;  %v326_v20 = vld [vmem:[%s3541_s8 + $0xa0] sm:$0xff]  ;;  %v312_v22 = vld [vmem:[%s3541_s8 + $0x30] sm:$0xff]  ;;  %s3365_s19 = scalar_lea.vmem %s4913_s15, 16 }
  0x1f   : > { %2782 = vmatmul.mubr.msk.bf16.vlgmr.msra.gmra.mrb[0].mxu0 %vm379_vm0, %v338_v7  ;;  %2790 = vmatmul.mubr.msk.bf16.vlgmr.msra.gmra.mrb[0].mxu1 %vm379_vm0, %v346_v12  ;;  %v340_v19 = vpack.c.bf16 %v311_v17, %v310_v16  ;;  %v327_v21 = vld [vmem:[%s3541_s8 + $0xa8] sm:$0xff]  ;;  %v313_v23 = vld [vmem:[%s3541_s8 + $0x38] sm:$0xff]  ;;  %v328_v26 = vld [vmem:[%s3541_s8 + $0xb0] sm:$0xff]  ;;  %p3366_p11 = scmp.ne.s32.totalorder %s4913_s15, %s3365_s19 }
  0x20   : > { %470 = vmatprep.mubr.bf16.mxu0 %v3429_v2  ;;  %550 = vmatprep.mubr.bf16.mxu1 %v3429_v2  ;;  %v348_v24 = vpack.c.bf16 %v327_v21, %v326_v20  ;;  %v341_v25 = vpack.c.bf16 %v313_v23, %v312_v22  ;;  %v329_v27 = vld [vmem:[%s3541_s8 + $0xb8] sm:$0xff]  ;;  %v314_v28 = vld [vmem:[%s3541_s8 + $0x40] sm:$0xff]  ;;  %v315_v29 = vld [vmem:[%s3541_s8 + $0x48] sm:$0xff] }
  0x21   : > { %v349_v30 = vpack.c.bf16 %v329_v27, %v328_v26  ;;  %v342_v31 = vpack.c.bf16 %v315_v29, %v314_v28  ;;  %v330_v32 = vld [vmem:[%s3541_s8 + $0xc0] sm:$0xff]  ;;  %v331_v33 = vld [vmem:[%s3541_s8 + $0xc8] sm:$0xff]  ;;  %v316_v34 = vld [vmem:[%s3541_s8 + $0x50] sm:$0xff]  ;;  %p3367_p12 = pnand %p3366_p11, %p3510_p5 }
  0x22   : > { %v317_v35 = vld [vmem:[%s3541_s8 + $0x58] sm:$0xff]  ;;  %v350_v36 = vpack.c.bf16 %v331_v33, %v330_v32  ;;  %v332_v38 = vld [vmem:[%s3541_s8 + $0xd0] sm:$0xff]  ;;  %v318_v40 = vld [vmem:[%s3541_s8 + $0x60] sm:$0xff] }
  0x23   : > { %v343_v37 = vpack.c.bf16 %v317_v35, %v316_v34  ;;  %v333_v39 = vld [vmem:[%s3541_s8 + $0xd8] sm:$0xff]  ;;  %v319_v41 = vld [vmem:[%s3541_s8 + $0x68] sm:$0xff]  ;;  %v334_v44 = vld [vmem:[%s3541_s8 + $0xe0] sm:$0xff]  ;;  %p3368_p13 = pneg %p3367_p12 }
  0x24   : > { %v351_v42 = vpack.c.bf16 %v333_v39, %v332_v38  ;;  %v344_v43 = vpack.c.bf16 %v319_v41, %v318_v40  ;;  %v335_v45 = vld [vmem:[%s3541_s8 + $0xe8] sm:$0xff]  ;;  %v320_v46 = vld [vmem:[%s3541_s8 + $0x70] sm:$0xff]  ;;  %v321_v47 = vld [vmem:[%s3541_s8 + $0x78] sm:$0xff] }
  0x25   : > { %v352_v48 = vpack.c.bf16 %v335_v45, %v334_v44  ;;  %v345_v49 = vpack.c.bf16 %v321_v47, %v320_v46  ;;  %v336_v50 = vld [vmem:[%s3541_s8 + $0xf0] sm:$0xff]  ;;  %v337_v51 = vld [vmem:[%s3541_s8 + $0xf8] sm:$0xff] }
  0x26   : > { %v353_v52 = vpack.c.bf16 %v337_v51, %v336_v50 }
  0x27   : > { %2783 = vmatmul.mubr.msk.bf16.gmra.mrb[4].mxu0 %vm379_vm0, %v339_v13  ;;  %2791 = vmatmul.mubr.msk.bf16.gmra.mrb[4].mxu1 %vm379_vm0, %v347_v18 }
  0x28   : > { %480 = vmatprep.mubr.bf16.mxu0 %v3429_v2  ;;  %560 = vmatprep.mubr.bf16.mxu1 %v3429_v2 }
  0x2f   : > { %2784 = vmatmul.mubr.msk.bf16.gmra.mrb[8].mxu0 %vm379_vm0, %v340_v19  ;;  %2792 = vmatmul.mubr.msk.bf16.gmra.mrb[8].mxu1 %vm379_vm0, %v348_v24 }
  0x30   : > { %490 = vmatprep.mubr.bf16.mxu0 %v3429_v2  ;;  %570 = vmatprep.mubr.bf16.mxu1 %v3429_v2 }
  0x37   : > { %2785 = vmatmul.mubr.msk.bf16.gmra.mrb[12].mxu0 %vm379_vm0, %v341_v25  ;;  %2793 = vmatmul.mubr.msk.bf16.gmra.mrb[12].mxu1 %vm379_vm0, %v349_v30 }
  0x38   : > { %500 = vmatprep.mubr.bf16.mxu0 %v3429_v2  ;;  %580 = vmatprep.mubr.bf16.mxu1 %v3429_v2 }
  0x3f   : > { %2786 = vmatmul.mubr.msk.bf16.gmra.mrb[16].mxu0 %vm379_vm0, %v342_v31  ;;  %2794 = vmatmul.mubr.msk.bf16.gmra.mrb[16].mxu1 %vm379_vm0, %v350_v36 }
  0x40   : > { %510 = vmatprep.mubr.bf16.mxu0 %v3429_v2  ;;  %590 = vmatprep.mubr.bf16.mxu1 %v3429_v2 }
  0x47   : > { %2787 = vmatmul.mubr.msk.bf16.gmra.mrb[20].mxu0 %vm379_vm0, %v343_v37  ;;  %2795 = vmatmul.mubr.msk.bf16.gmra.mrb[20].mxu1 %vm379_vm0, %v351_v42 }
  0x48   : > { %520 = vmatprep.mubr.bf16.mxu0 %v3429_v2  ;;  %600 = vmatprep.mubr.bf16.mxu1 %v3429_v2 }
  0x4f   : > { %2788 = vmatmul.mubr.msk.bf16.gmra.mrb[24].mxu0 %vm379_vm0, %v344_v43  ;;  %2796 = vmatmul.mubr.msk.bf16.gmra.mrb[24].mxu1 %vm379_vm0, %v352_v48 }
  0x50   : > { %530 = vmatprep.mubr.bf16.mxu0 %v3429_v2  ;;  %610 = vmatprep.mubr.bf16.mxu1 %v3429_v2 }
  0x57   : > { %2789 = vmatmul.mubr.msk.bf16.gmra.mrb[28].mxu0 %vm379_vm0, %v345_v49  ;;  %2797 = vmatmul.mubr.msk.bf16.gmra.mrb[28].mxu1 %vm379_vm0, %v353_v52 }
  0xf2   : > { %v462_v60 = vpop.f32.mrb[0].mxu0  ;;  %v3631_v5 = vpop.f32.mrb[0].mxu1 }
  0xf3   : > { %v3618_v61 = vsub.f32 %v3613_v58, %v462_v60  ;;  %v464_v62 = vpop.f32.mrb[1].mxu0  ;;  %v3633_v6 = vpop.f32.mrb[1].mxu1 }
  0xf4   : > { %v3621_v63 = vsub.f32 %v3615_v59, %v464_v62  ;;  %v466_v0 = vpop.f32.mrb[2].mxu0  ;;  %v3635_v7 = vpop.f32.mrb[2].mxu1 }
  0xf5   : > { %v468_v1 = vpop.f32.mrb[3].mxu0  ;;  %v3624_v2 = vsub.f32 %v3613_v58, %v466_v0  ;;  %v3639_v10 = vpop.f32.mrb[3].mxu1 }
  0xf6   : > { %v3627_v3 = vsub.f32 %v3615_v59, %v468_v1  ;;  %v699_v4 = vmin.f32 %v3618_v61, %v3621_v63 }
  0xf8   : > { %700 = vmin.xlane.f32.xlu0 %v699_v4  ;;  %v702_v9 = vmin.f32 %v3624_v2, %v3627_v3 }
  0xfa   : > { %v472_v8 = vpop.f32.mrb[4].mxu0  ;;  %v552_v19 = vpop.f32.mrb[4].mxu1 }
  0xfb   : > { %v3642_v11 = vsub.f32 %v3613_v58, %v472_v8  ;;  %v474_v12 = vpop.f32.mrb[5].mxu0  ;;  %v3656_v20 = vsub.f32 %v3613_v58, %v552_v19  ;;  %v554_v21 = vpop.f32.mrb[5].mxu1 }
  0xfc   : > { %v3645_v13 = vsub.f32 %v3615_v59, %v474_v12  ;;  %703 = vmin.xlane.f32.xlu0 %v702_v9  ;;  %v476_v14 = vpop.f32.mrb[6].mxu0  ;;  %v3659_v22 = vsub.f32 %v3615_v59, %v554_v21  ;;  %v556_v23 = vpop.f32.mrb[6].mxu1 }
  0xfd   : > { %v478_v15 = vpop.f32.mrb[7].mxu0  ;;  %v3648_v16 = vsub.f32 %v3613_v58, %v476_v14  ;;  %v3664_v26 = vsub.f32 %v3613_v58, %v556_v23  ;;  %v558_v27 = vpop.f32.mrb[7].mxu1 }
  0xfe   : > { %v3651_v17 = vsub.f32 %v3615_v59, %v478_v15  ;;  %v705_v18 = vmin.f32 %v3642_v11, %v3645_v13  ;;  %v3670_v30 = vsub.f32 %v3615_v59, %v558_v27 }
 0x100   : > { %706 = vmin.xlane.f32.xlu1 %v705_v18  ;;  %v708_v25 = vmin.f32 %v3648_v16, %v3651_v17 }
 0x102   : > { %v482_v24 = vpop.f32.mrb[8].mxu0  ;;  %v562_v37 = vpop.f32.mrb[8].mxu1 }
 0x103   : > { %v3667_v28 = vsub.f32 %v3613_v58, %v482_v24  ;;  %v484_v29 = vpop.f32.mrb[9].mxu0  ;;  %v3686_v39 = vsub.f32 %v3613_v58, %v562_v37  ;;  %v564_v40 = vpop.f32.mrb[9].mxu1 }
 0x104   : > { %v3673_v31 = vsub.f32 %v3615_v59, %v484_v29  ;;  %709 = vmin.xlane.f32.xlu1 %v708_v25  ;;  %v486_v32 = vpop.f32.mrb[10].mxu0  ;;  %v3689_v41 = vsub.f32 %v3615_v59, %v564_v40  ;;  %v566_v42 = vpop.f32.mrb[10].mxu1 }
 0x105   : > { %v3676_v33 = vsub.f32 %v3613_v58, %v486_v32  ;;  %v488_v34 = vpop.f32.mrb[11].mxu0  ;;  %v3692_v44 = vsub.f32 %v3613_v58, %v566_v42  ;;  %v568_v45 = vpop.f32.mrb[11].mxu1 }
 0x106   : > { %v3679_v35 = vsub.f32 %v3615_v59, %v488_v34  ;;  %v711_v36 = vmin.f32 %v3667_v28, %v3673_v31  ;;  %v3698_v48 = vsub.f32 %v3615_v59, %v568_v45 }
 0x108   : > { %712 = vmin.xlane.f32.xlu0 %v711_v36  ;;  %v714_v38 = vmin.f32 %v3676_v33, %v3679_v35  ;;  %4989 = vst [vmem:[#allocation6_spill] sm:$0xff] %v3698_v48 }
 0x10a   : > { %715 = vmin.xlane.f32.xlu1 %v714_v38  ;;  %v492_v43 = vpop.f32.mrb[12].mxu0  ;;  %v572_v57 = vpop.f32.mrb[12].mxu1 }
 0x10b   : > { %v3695_v46 = vsub.f32 %v3613_v58, %v492_v43  ;;  %v494_v47 = vpop.f32.mrb[13].mxu0  ;;  %v3714_v62 = vsub.f32 %v3613_v58, %v572_v57  ;;  %v574_v0 = vpop.f32.mrb[13].mxu1 }
 0x10c   : > { %v3701_v49 = vsub.f32 %v3615_v59, %v494_v47  ;;  %v496_v50 = vpop.f32.mrb[14].mxu0  ;;  %v3717_v1 = vsub.f32 %v3615_v59, %v574_v0  ;;  %v576_v4 = vpop.f32.mrb[14].mxu1 }
 0x10d   : > { %v3704_v51 = vsub.f32 %v3613_v58, %v496_v50  ;;  %v498_v52 = vpop.f32.mrb[15].mxu0  ;;  %v3720_v9 = vsub.f32 %v3613_v58, %v576_v4  ;;  %v578_v12 = vpop.f32.mrb[15].mxu1 }
 0x10e   : > { %v3707_v55 = vsub.f32 %v3615_v59, %v498_v52  ;;  %v717_v56 = vmin.f32 %v3695_v46, %v3701_v49  ;;  %v3726_v18 = vsub.f32 %v3615_v59, %v578_v12 }
 0x110   : > { %718 = vmin.xlane.f32.xlu0 %v717_v56  ;;  %v720_v60 = vmin.f32 %v3704_v51, %v3707_v55 }
 0x112   : > { %721 = vmin.xlane.f32.xlu1 %v720_v60  ;;  %v502_v8 = vpop.f32.mrb[16].mxu0  ;;  %v582_v29 = vpop.f32.mrb[16].mxu1 }
 0x113   : > { %v3723_v14 = vsub.f32 %v3613_v58, %v502_v8  ;;  %v504_v15 = vpop.f32.mrb[17].mxu0  ;;  %v3742_v34 = vsub.f32 %v3613_v58, %v582_v29  ;;  %v584_v36 = vpop.f32.mrb[17].mxu1 }
 0x114   : > { %v3729_v19 = vsub.f32 %v3615_v59, %v504_v15  ;;  %v506_v21 = vpop.f32.mrb[18].mxu0  ;;  %v3745_v37 = vsub.f32 %v3615_v59, %v584_v36  ;;  %v586_v38 = vpop.f32.mrb[18].mxu1 }
 0x115   : > { %v3732_v23 = vsub.f32 %v3613_v58, %v506_v21  ;;  %v508_v24 = vpop.f32.mrb[19].mxu0  ;;  %v3748_v42 = vsub.f32 %v3613_v58, %v586_v38  ;;  %v588_v43 = vpop.f32.mrb[19].mxu1 }
 0x116   : > { %v3735_v25 = vsub.f32 %v3615_v59, %v508_v24  ;;  %v723_v27 = vmin.f32 %v3723_v14, %v3729_v19  ;;  %4990 = vst [vmem:[#allocation7_spill] sm:$0xff] %v3745_v37  ;;  %v3754_v50 = vsub.f32 %v3615_v59, %v588_v43 }
 0x118   : > { %724 = vmin.xlane.f32.xlu0 %v723_v27  ;;  %v726_v32 = vmin.f32 %v3732_v23, %v3735_v25 }
 0x11a   : > { %727 = vmin.xlane.f32.xlu1 %v726_v32  ;;  %v512_v40 = vpop.f32.mrb[20].mxu0  ;;  %v592_v8 = vpop.f32.mrb[20].mxu1 }
 0x11b   : > { %v3751_v45 = vsub.f32 %v3613_v58, %v512_v40  ;;  %v514_v47 = vpop.f32.mrb[21].mxu0  ;;  %v3770_v15 = vsub.f32 %v3613_v58, %v592_v8  ;;  %v594_v21 = vpop.f32.mrb[21].mxu1 }
 0x11c   : > { %v3757_v52 = vsub.f32 %v3615_v59, %v514_v47  ;;  %v516_v56 = vpop.f32.mrb[22].mxu0  ;;  %v3773_v24 = vsub.f32 %v3615_v59, %v594_v21  ;;  %v596_v27 = vpop.f32.mrb[22].mxu1 }
 0x11d   : > { %v3760_v57 = vsub.f32 %v3613_v58, %v516_v56  ;;  %v518_v60 = vpop.f32.mrb[23].mxu0  ;;  %v3776_v32 = vsub.f32 %v3613_v58, %v596_v27  ;;  %v598_v36 = vpop.f32.mrb[23].mxu1 }
 0x11e   : > { %v3763_v0 = vsub.f32 %v3615_v59, %v518_v60  ;;  %v729_v4 = vmin.f32 %v3751_v45, %v3757_v52  ;;  %v3782_v43 = vsub.f32 %v3615_v59, %v598_v36 }
 0x11f   : > { %4991 = vst [vmem:[#allocation8_spill] sm:$0xff] %v3760_v57 }
 0x120   : > { %4992 = vst [vmem:[#allocation9_spill] sm:$0xff] %v3763_v0  ;;  %730 = vmin.xlane.f32.xlu0 %v729_v4  ;;  %v732_v12 = vmin.f32 %v3760_v57, %v3763_v0 }
 0x122   : > { %733 = vmin.xlane.f32.xlu1 %v732_v12  ;;  %v522_v29 = vpop.f32.mrb[24].mxu0  ;;  %v602_v21 = vpop.f32.mrb[24].mxu1 }
 0x123   : > { %v3779_v38 = vsub.f32 %v3613_v58, %v522_v29  ;;  %v524_v40 = vpop.f32.mrb[25].mxu0  ;;  %v3798_v29 = vsub.f32 %v3613_v58, %v602_v21  ;;  %v604_v36 = vpop.f32.mrb[25].mxu1 }
 0x124   : > { %v3785_v47 = vsub.f32 %v3615_v59, %v524_v40  ;;  %v526_v56 = vpop.f32.mrb[26].mxu0  ;;  %v3801_v40 = vsub.f32 %v3615_v59, %v604_v36  ;;  %v3817_v36 = vsub.f32 %v3613_v58, %v3631_v5  ;;  %v3837_v5 = vsub.f32 %v3615_v59, %v3639_v10 }
 0x125   : > { %4993 = vst [vmem:[#allocation10_spill] sm:$0xff] %v3779_v38  ;;  %v3788_v60 = vsub.f32 %v3613_v58, %v526_v56  ;;  %v528_v4 = vpop.f32.mrb[27].mxu0  ;;  %v606_v56 = vpop.f32.mrb[26].mxu1 }
 0x126   : > { %4994 = vst [vmem:[#allocation11_spill] sm:$0xff] %v3785_v47  ;;  %v3791_v8 = vsub.f32 %v3615_v59, %v528_v4  ;;  %v735_v12 = vmin.f32 %v3779_v38, %v3785_v47  ;;  %v3804_v4 = vsub.f32 %v3613_v58, %v606_v56  ;;  %v608_v54 = vpop.f32.mrb[27].mxu1 }
 0x127   : > { %4995 = vst [vmem:[#allocation12_spill] sm:$0xff] %v3788_v60 }
 0x128   : > { %4996 = vst [vmem:[#allocation13_spill] sm:$0xff] %v3791_v8  ;;  %736 = vmin.xlane.f32.xlu0 %v735_v12  ;;  %v738_v27 = vmin.f32 %v3788_v60, %v3791_v8  ;;  %v3810_v8 = vsub.f32 %v3615_v59, %v608_v54  ;;  %v3831_v54 = vsub.f32 %v3613_v58, %v3635_v7 }
 0x12a   : > { %739 = vmin.xlane.f32.xlu1 %v738_v27  ;;  %v532_v53 = vpop.f32.mrb[28].mxu0  ;;  %v3821_v27 = vsub.f32 %v3615_v59, %v3633_v6  ;;  %v612_v6 = vpop.f32.mrb[28].mxu1  ;;  %v750_v10 = vmin.f32 %v3831_v54, %v3837_v5 }
 0x12b   : > { %v3807_v47 = vsub.f32 %v3613_v58, %v532_v53  ;;  %v534_v12 = vpop.f32.mrb[29].mxu0  ;;  %v3844_v0 = vsub.f32 %v3613_v58, %v612_v6  ;;  %v614_v7 = vpop.f32.mrb[29].mxu1  ;;  %v753_v6 = vmin.f32 %v3656_v20, %v3659_v22 }
 0x12c   : > { %v3813_v21 = vsub.f32 %v3615_v59, %v534_v12  ;;  %v536_v60 = vpop.f32.mrb[30].mxu0  ;;  %v3847_v57 = vsub.f32 %v3615_v59, %v614_v7  ;;  %v756_v7 = vmin.f32 %v3664_v26, %v3670_v30 }
 0x12d   : > { %4997 = vst [vmem:[#allocation14_spill] sm:$0xff] %v3807_v47  ;;  %v3824_v56 = vsub.f32 %v3613_v58, %v536_v60  ;;  %v538_v53 = vpop.f32.mrb[31].mxu0  ;;  %5000 = vst [vmem:[#allocation17_spill] sm:$0xff] %v3844_v0 }
 0x12e   : > { %4998 = vst [vmem:[#allocation15_spill] sm:$0xff] %v3813_v21  ;;  %v3827_v38 = vsub.f32 %v3615_v59, %v538_v53  ;;  %v741_v12 = vmin.f32 %v3807_v47, %v3813_v21  ;;  %v747_v53 = vmin.f32 %v3817_v36, %v3821_v27  ;;  %5001 = vst [vmem:[#allocation18_spill] sm:$0xff] %v3847_v57  ;;  %v616_v21 = vpop.f32.mrb[30].mxu1 }
 0x12f   : > { %v618_v47 = vpop.f32.mrb[31].mxu1 }
 0x130   : > { %4999 = vst [vmem:[#allocation16_spill] sm:$0xff] %v3827_v38  ;;  %742 = vmin.xlane.f32.xlu0 %v741_v12  ;;  %v744_v60 = vmin.f32 %v3824_v56, %v3827_v38  ;;  %v3852_v12 = vsub.f32 %v3613_v58, %v616_v21  ;;  %v3855_v38 = vsub.f32 %v3615_v59, %v618_v47  ;;  %v5004_v59 = vlaneseq }
 0x131   : > { %v762_v58 = vmin.f32 %v3692_v44, %v3698_v48 }
 0x132   : > { %745 = vmin.xlane.f32.xlu1 %v744_v60  ;;  %5002 = vst [vmem:[#allocation19_spill] sm:$0xff] %v3852_v12  ;;  %5003 = vst [vmem:[#allocation20_spill] sm:$0xff] %v3855_v38  ;;  %v759_v60 = vmin.f32 %v3686_v39, %v3689_v41  ;;  %v3866_v47 = vand.u32 127, %v5004_v59 }
 0x134   : > { %748 = vmin.xlane.f32.xlu0 %v747_v53  ;;  %v3869_v21 = vadd.s32 128, %v3866_v47 }
 0x136   : > { %751 = vmin.xlane.f32.xlu1 %v750_v10 }
 0x138   : > { %754 = vmin.xlane.f32.xlu0 %v753_v6 }
 0x13a   : > { %757 = vmin.xlane.f32.xlu1 %v756_v7 }
 0x13c   : > { %760 = vmin.xlane.f32.xlu0 %v759_v60 }
 0x13e   : > { %763 = vmin.xlane.f32.xlu1 %v762_v58 }
 0x185   : > { %v701_v53 = vpop.xlane.xlu0 %700 }
 0x186   : > { %vm795_vm1 = vcmp.eq.f32.partialorder %v3618_v61, %v701_v53  ;;  %vm796_vm2 = vcmp.eq.f32.partialorder %v3621_v63, %v701_v53 }
 0x187   : > { %v859_v10 = vsel %vm795_vm1, %v3866_v47, 256  ;;  %v860_v6 = vsel %vm796_vm2, %v3869_v21, 256 }
 0x188   : > { %vm923_vm3 = vcmp.lt.s32.totalorder %v859_v10, %v860_v6 }
 0x189   : > { %v704_v7 = vpop.xlane.xlu0 %703  ;;  %v3875_v48 = vsel %vm923_vm3, %v859_v10, %v860_v6 }
 0x18a   : > { %vm797_vm4 = vcmp.eq.f32.partialorder %v3624_v2, %v704_v7  ;;  %vm798_vm5 = vcmp.eq.f32.partialorder %v3627_v3, %v704_v7  ;;  %v926_v60 = vshra.s32 %v3875_v48, 16  ;;  %v765_v2 = vmin.f32 %v3714_v62, %v3717_v1 }
 0x18b   : > { %v861_v58 = vsel %vm797_vm4, %v3866_v47, 256  ;;  %v862_v61 = vsel %vm798_vm5, %v3869_v21, 256 }
 0x18c   : > { %vm939_vm6 = vcmp.lt.s32.totalorder %v861_v58, %v862_v61  ;;  %v3882_v63 = vcvt.s32.f32 %v926_v60 }
 0x18d   : > { %v707_v59 = vpop.xlane.xlu1 %706  ;;  %v3884_v53 = vsel %vm939_vm6, %v861_v58, %v862_v61 }
 0x18e   : > { %vm799_vm7 = vcmp.eq.f32.partialorder %v3642_v11, %v707_v59  ;;  %vm800_vm8 = vcmp.eq.f32.partialorder %v3645_v13, %v707_v59  ;;  %929 = vmin.xlane.f32.xlu0 %v3882_v63  ;;  %v942_v3 = vshra.s32 %v3884_v53, 16 }
 0x18f   : > { %v863_v10 = vsel %vm799_vm7, %v3866_v47, 256  ;;  %v864_v6 = vsel %vm800_vm8, %v3869_v21, 256 }
 0x190   : > { %vm955_vm9 = vcmp.lt.s32.totalorder %v863_v10, %v864_v6  ;;  %v3894_v7 = vcvt.s32.f32 %v942_v3  ;;  %v768_v3 = vmin.f32 %v3720_v9, %v3726_v18 }
 0x191   : > { %v710_v60 = vpop.xlane.xlu1 %709  ;;  %v3896_v58 = vsel %vm955_vm9, %v863_v10, %v864_v6 }
 0x192   : > { %vm801_vm10 = vcmp.eq.f32.partialorder %v3648_v16, %v710_v60  ;;  %vm802_vm11 = vcmp.eq.f32.partialorder %v3651_v17, %v710_v60  ;;  %766 = vmin.xlane.f32.xlu0 %v765_v2  ;;  %945 = vmin.xlane.f32.xlu1 %v3894_v7  ;;  %v958_v11 = vshra.s32 %v3896_v58, 16  ;;  %v771_v16 = vmin.f32 %v3742_v34, %v3745_v37 }
 0x193   : > { %v865_v13 = vsel %vm801_vm10, %v3866_v47, 256  ;;  %v866_v61 = vsel %vm802_vm11, %v3869_v21, 256 }
 0x194   : > { %vm971_vm12 = vcmp.lt.s32.totalorder %v865_v13, %v866_v61  ;;  %v3904_v59 = vcvt.s32.f32 %v958_v11 }
 0x195   : > { %v713_v10 = vpop.xlane.xlu0 %712  ;;  %v3908_v6 = vsel %vm971_vm12, %v865_v13, %v866_v61 }
 0x196   : > { %vm803_vm13 = vcmp.eq.f32.partialorder %v3667_v28, %v713_v10  ;;  %vm804_vm14 = vcmp.eq.f32.partialorder %v3673_v31, %v713_v10  ;;  %961 = vmin.xlane.f32.xlu0 %v3904_v59  ;;  %769 = vmin.xlane.f32.xlu1 %v768_v3  ;;  %v974_v17 = vshra.s32 %v3908_v6, 16 }
 0x197   : > { %v867_v2 = vsel %vm803_vm13, %v3866_v47, 256  ;;  %v868_v60 = vsel %vm804_vm14, %v3869_v21, 256  ;;  %v716_v11 = vpop.xlane.xlu1 %715 }
 0x198   : > { %vm987_vm15 = vcmp.lt.s32.totalorder %v867_v2, %v868_v60  ;;  %vm805_vm1 = vcmp.eq.f32.partialorder %v3676_v33, %v716_v11  ;;  %vm806_vm2 = vcmp.eq.f32.partialorder %v3679_v35, %v716_v11  ;;  %v3920_v28 = vcvt.s32.f32 %v974_v17 }
 0x199   : > { %v869_v31 = vsel %vm805_vm1, %v3866_v47, 256  ;;  %v870_v13 = vsel %vm806_vm2, %v3869_v21, 256  ;;  %v3924_v61 = vsel %vm987_vm15, %v867_v2, %v868_v60  ;;  %v774_v33 = vmin.f32 %v3748_v42, %v3754_v50 }
 0x19a   : > { %vm1003_vm3 = vcmp.lt.s32.totalorder %v869_v31, %v870_v13  ;;  %772 = vmin.xlane.f32.xlu0 %v771_v16  ;;  %977 = vmin.xlane.f32.xlu1 %v3920_v28  ;;  %v990_v3 = vshra.s32 %v3924_v61, 16  ;;  %v777_v16 = vmin.f32 %v3770_v15, %v3773_v24 }
 0x19b   : > { %v3928_v10 = vsel %vm1003_vm3, %v869_v31, %v870_v13 }
 0x19c   : > { %v3930_v37 = vcvt.s32.f32 %v990_v3  ;;  %v1006_v35 = vshra.s32 %v3928_v10, 16 }
 0x19d   : > { %v719_v17 = vpop.xlane.xlu0 %718 }
 0x19e   : > { %vm807_vm4 = vcmp.eq.f32.partialorder %v3695_v46, %v719_v17  ;;  %vm808_vm5 = vcmp.eq.f32.partialorder %v3701_v49, %v719_v17  ;;  %993 = vmin.xlane.f32.xlu0 %v3930_v37  ;;  %775 = vmin.xlane.f32.xlu1 %v774_v33  ;;  %v3944_v31 = vcvt.s32.f32 %v1006_v35 }
 0x19f   : > { %v871_v2 = vsel %vm807_vm4, %v3866_v47, 256  ;;  %v872_v60 = vsel %vm808_vm5, %v3869_v21, 256  ;;  %v722_v11 = vpop.xlane.xlu1 %721 }
 0x1a0   : > { %vm1019_vm6 = vcmp.lt.s32.totalorder %v871_v2, %v872_v60  ;;  %vm809_vm7 = vcmp.eq.f32.partialorder %v3704_v51, %v722_v11  ;;  %vm810_vm8 = vcmp.eq.f32.partialorder %v3707_v55, %v722_v11  ;;  %v780_v51 = vmin.f32 %v3776_v32, %v3782_v43 }
 0x1a1   : > { %v873_v46 = vsel %vm809_vm7, %v3866_v47, 256  ;;  %v874_v49 = vsel %vm810_vm8, %v3869_v21, 256  ;;  %v3948_v13 = vsel %vm1019_vm6, %v871_v2, %v872_v60 }
 0x1a2   : > { %vm1035_vm9 = vcmp.lt.s32.totalorder %v873_v46, %v874_v49  ;;  %778 = vmin.xlane.f32.xlu0 %v777_v16  ;;  %1009 = vmin.xlane.f32.xlu1 %v3944_v31  ;;  %v1022_v3 = vshra.s32 %v3948_v13, 16  ;;  %v783_v16 = vmin.f32 %v3798_v29, %v3801_v40 }
 0x1a3   : > { %v3952_v33 = vsel %vm1035_vm9, %v873_v46, %v874_v49 }
 0x1a4   : > { %v3954_v17 = vcvt.s32.f32 %v1022_v3  ;;  %v1038_v55 = vshra.s32 %v3952_v33, 16 }
 0x1a5   : > { %v725_v35 = vpop.xlane.xlu0 %724 }
 0x1a6   : > { %vm811_vm10 = vcmp.eq.f32.partialorder %v3723_v14, %v725_v35  ;;  %vm812_vm11 = vcmp.eq.f32.partialorder %v3729_v19, %v725_v35  ;;  %1025 = vmin.xlane.f32.xlu0 %v3954_v17  ;;  %781 = vmin.xlane.f32.xlu1 %v780_v51  ;;  %v3968_v46 = vcvt.s32.f32 %v1038_v55 }
 0x1a7   : > { %v875_v2 = vsel %vm811_vm10, %v3866_v47, 256  ;;  %v876_v60 = vsel %vm812_vm11, %v3869_v21, 256  ;;  %v728_v11 = vpop.xlane.xlu1 %727 }
 0x1a8   : > { %vm1051_vm12 = vcmp.lt.s32.totalorder %v875_v2, %v876_v60  ;;  %vm813_vm13 = vcmp.eq.f32.partialorder %v3732_v23, %v728_v11  ;;  %vm814_vm14 = vcmp.eq.f32.partialorder %v3735_v25, %v728_v11  ;;  %v786_v23 = vmin.f32 %v3804_v4, %v3810_v8 }
 0x1a9   : > { %v877_v14 = vsel %vm813_vm13, %v3866_v47, 256  ;;  %v878_v19 = vsel %vm814_vm14, %v3869_v21, 256  ;;  %v3972_v49 = vsel %vm1051_vm12, %v875_v2, %v876_v60 }
 0x1aa   : > { %vm1067_vm15 = vcmp.lt.s32.totalorder %v877_v14, %v878_v19  ;;  %784 = vmin.xlane.f32.xlu0 %v783_v16  ;;  %1041 = vmin.xlane.f32.xlu1 %v3968_v46  ;;  %v1054_v3 = vshra.s32 %v3972_v49, 16  ;;  %v789_v16 = vmin.f32 %v3844_v0, %v3847_v57 }
 0x1ab   : > { %v3976_v51 = vsel %vm1067_vm15, %v877_v14, %v878_v19  ;;  %v5005_v14 = vld [vmem:[#allocation8_spill] sm:$0xff]  ;;  %v5006_v19 = vld [vmem:[#allocation9_spill] sm:$0xff] }
 0x1ac   : > { %v3978_v35 = vcvt.s32.f32 %v1054_v3  ;;  %v1070_v25 = vshra.s32 %v3976_v51, 16 }
 0x1ad   : > { %v731_v55 = vpop.xlane.xlu0 %730 }
 0x1ae   : > { %vm815_vm1 = vcmp.eq.f32.partialorder %v3751_v45, %v731_v55  ;;  %vm816_vm2 = vcmp.eq.f32.partialorder %v3757_v52, %v731_v55  ;;  %1057 = vmin.xlane.f32.xlu0 %v3978_v35  ;;  %787 = vmin.xlane.f32.xlu1 %v786_v23  ;;  %v3992_v3 = vcvt.s32.f32 %v1070_v25  ;;  %v792_v25 = vmin.f32 %v3852_v12, %v3855_v38 }
 0x1af   : > { %v879_v2 = vsel %vm815_vm1, %v3866_v47, 256  ;;  %v880_v60 = vsel %vm816_vm2, %v3869_v21, 256  ;;  %v734_v11 = vpop.xlane.xlu1 %733 }
 0x1b0   : > { %vm1083_vm3 = vcmp.lt.s32.totalorder %v879_v2, %v880_v60  ;;  %vm817_vm4 = vcmp.eq.f32.partialorder %v5005_v14, %v734_v11  ;;  %vm818_vm5 = vcmp.eq.f32.partialorder %v5006_v19, %v734_v11  ;;  %v5008_v19 = vld [vmem:[#allocation10_spill] sm:$0xff] }
 0x1b1   : > { %v881_v45 = vsel %vm817_vm4, %v3866_v47, 256  ;;  %v882_v52 = vsel %vm818_vm5, %v3869_v21, 256  ;;  %v3996_v23 = vsel %vm1083_vm3, %v879_v2, %v880_v60  ;;  %v5009_v2 = vld [vmem:[#allocation11_spill] sm:$0xff] }
 0x1b2   : > { %vm1099_vm6 = vcmp.lt.s32.totalorder %v881_v45, %v882_v52  ;;  %790 = vmin.xlane.f32.xlu0 %v789_v16  ;;  %1073 = vmin.xlane.f32.xlu1 %v3992_v3  ;;  %v1086_v55 = vshra.s32 %v3996_v23, 16 }
 0x1b3   : > { %v4000_v57 = vsel %vm1099_vm6, %v881_v45, %v882_v52  ;;  %v5010_v52 = vld [vmem:[#allocation12_spill] sm:$0xff] }
 0x1b4   : > { %v4002_v0 = vcvt.s32.f32 %v1086_v55  ;;  %v1102_v11 = vshra.s32 %v4000_v57, 16  ;;  %v5011_v55 = vld [vmem:[#allocation13_spill] sm:$0xff] }
 0x1b5   : > { %v737_v14 = vpop.xlane.xlu0 %736 }
 0x1b6   : > { %5007 = vst [vmem:[#allocation8_spill] sm:$0xff] %v4002_v0  ;;  %vm819_vm7 = vcmp.eq.f32.partialorder %v5008_v19, %v737_v14  ;;  %vm820_vm8 = vcmp.eq.f32.partialorder %v5009_v2, %v737_v14  ;;  %1089 = vmin.xlane.f32.xlu0 %v4002_v0  ;;  %793 = vmin.xlane.f32.xlu1 %v792_v25  ;;  %v4014_v38 = vcvt.s32.f32 %v1102_v11  ;;  %v5014_v11 = vld [vmem:[#allocation14_spill] sm:$0xff] }
 0x1b7   : > { %v883_v16 = vsel %vm819_vm7, %v3866_v47, 256  ;;  %v884_v60 = vsel %vm820_vm8, %v3869_v21, 256  ;;  %v740_v45 = vpop.xlane.xlu1 %739 }
 0x1b8   : > { %vm1115_vm9 = vcmp.lt.s32.totalorder %v883_v16, %v884_v60  ;;  %vm821_vm10 = vcmp.eq.f32.partialorder %v5010_v52, %v740_v45  ;;  %vm822_vm11 = vcmp.eq.f32.partialorder %v5011_v55, %v740_v45  ;;  %5012 = vst [vmem:[#allocation9_spill] sm:$0xff] %v4014_v38  ;;  %v5015_v55 = vld [vmem:[#allocation15_spill] sm:$0xff] }
 0x1b9   : > { %v885_v12 = vsel %vm821_vm10, %v3866_v47, 256  ;;  %v886_v19 = vsel %vm822_vm11, %v3869_v21, 256  ;;  %v4018_v14 = vsel %vm1115_vm9, %v883_v16, %v884_v60 }
 0x1ba   : > { %5013 = vst [vmem:[#allocation10_spill] sm:$0xff] %v4018_v14  ;;  %vm1131_vm12 = vcmp.lt.s32.totalorder %v885_v12, %v886_v19  ;;  %1105 = vmin.xlane.f32.xlu1 %v4014_v38  ;;  %v1118_v25 = vshra.s32 %v4018_v14, 16 }
 0x1bb   : > { %v4022_v2 = vsel %vm1131_vm12, %v885_v12, %v886_v19  ;;  %v5016_v12 = vld [vmem:[#allocation16_spill] sm:$0xff] }
 0x1bc   : > { %v4024_v0 = vcvt.s32.f32 %v1118_v25  ;;  %v1134_v52 = vshra.s32 %v4022_v2, 16 }
 0x1bd   : > { %v743_v45 = vpop.xlane.xlu0 %742 }
 0x1be   : > { %vm823_vm13 = vcmp.eq.f32.partialorder %v5014_v11, %v743_v45  ;;  %vm824_vm14 = vcmp.eq.f32.partialorder %v5015_v55, %v743_v45  ;;  %1121 = vmin.xlane.f32.xlu0 %v4024_v0  ;;  %v4030_v16 = vcvt.s32.f32 %v1134_v52 }
 0x1bf   : > { %v887_v60 = vsel %vm823_vm13, %v3866_v47, 256  ;;  %v888_v38 = vsel %vm824_vm14, %v3869_v21, 256  ;;  %v746_v14 = vpop.xlane.xlu1 %745 }
 0x1c0   : > { %vm1147_vm15 = vcmp.lt.s32.totalorder %v887_v60, %v888_v38  ;;  %vm825_vm1 = vcmp.eq.f32.partialorder %v3824_v56, %v746_v14  ;;  %vm826_vm2 = vcmp.eq.f32.partialorder %v5016_v12, %v746_v14  ;;  %1137 = vmin.xlane.f32.xlu1 %v4030_v16 }
 0x1c1   : > { %v889_v19 = vsel %vm825_vm1, %v3866_v47, 256  ;;  %v890_v25 = vsel %vm826_vm2, %v3869_v21, 256  ;;  %v749_v45 = vpop.xlane.xlu0 %748  ;;  %v4039_v11 = vsel %vm1147_vm15, %v887_v60, %v888_v38 }
 0x1c2   : > { %5017 = vst [vmem:[#allocation11_spill] sm:$0xff] %v4039_v11  ;;  %vm1163_vm3 = vcmp.lt.s32.totalorder %v889_v19, %v890_v25  ;;  %vm827_vm4 = vcmp.eq.f32.partialorder %v3817_v36, %v749_v45  ;;  %vm828_vm5 = vcmp.eq.f32.partialorder %v3821_v27, %v749_v45  ;;  %v1150_v52 = vshra.s32 %v4039_v11, 16 }
 0x1c3   : > { %v891_v56 = vsel %vm827_vm4, %v3866_v47, 256  ;;  %v892_v14 = vsel %vm828_vm5, %v3869_v21, 256  ;;  %v752_v55 = vpop.xlane.xlu1 %751  ;;  %v4046_v12 = vsel %vm1163_vm3, %v889_v19, %v890_v25 }
 0x1c4   : > { %vm1179_vm6 = vcmp.lt.s32.totalorder %v891_v56, %v892_v14  ;;  %vm829_vm7 = vcmp.eq.f32.partialorder %v3831_v54, %v752_v55  ;;  %vm830_vm8 = vcmp.eq.f32.partialorder %v3837_v5, %v752_v55  ;;  %v4050_v38 = vcvt.s32.f32 %v1150_v52 }
 0x1c5   : > { %v893_v36 = vsel %vm829_vm7, %v3866_v47, 256  ;;  %v894_v27 = vsel %vm830_vm8, %v3869_v21, 256  ;;  %v755_v60 = vpop.xlane.xlu0 %754  ;;  %v1166_v45 = vshra.s32 %v4046_v12, 16  ;;  %v4055_v11 = vsel %vm1179_vm6, %v891_v56, %v892_v14 }
 0x1c6   : > { %vm1195_vm9 = vcmp.lt.s32.totalorder %v893_v36, %v894_v27  ;;  %vm831_vm10 = vcmp.eq.f32.partialorder %v3656_v20, %v755_v60  ;;  %vm832_vm11 = vcmp.eq.f32.partialorder %v3659_v22, %v755_v60  ;;  %1153 = vmin.xlane.f32.xlu0 %v4050_v38  ;;  %v1182_v54 = vshra.s32 %v4055_v11, 16 }
 0x1c7   : > { %v895_v5 = vsel %vm831_vm10, %v3866_v47, 256  ;;  %v896_v19 = vsel %vm832_vm11, %v3869_v21, 256  ;;  %v758_v25 = vpop.xlane.xlu1 %757  ;;  %v4063_v52 = vcvt.s32.f32 %v1166_v45  ;;  %v4065_v55 = vsel %vm1195_vm9, %v893_v36, %v894_v27 }
 0x1c8   : > { %vm1211_vm12 = vcmp.lt.s32.totalorder %v895_v5, %v896_v19  ;;  %vm833_vm13 = vcmp.eq.f32.partialorder %v3664_v26, %v758_v25  ;;  %vm834_vm14 = vcmp.eq.f32.partialorder %v3670_v30, %v758_v25  ;;  %v4069_v20 = vcvt.s32.f32 %v1182_v54  ;;  %v3303_v25 = vld [vmem:[%s4957_s4] sm:$0xff]  }
 0x1c9   : > { %v897_v22 = vsel %vm833_vm13, %v3866_v47, 256  ;;  %v898_v56 = vsel %vm834_vm14, %v3869_v21, 256  ;;  %1169 = vmin.xlane.f32.xlu1 %v4063_v52  ;;  %v1198_v14 = vshra.s32 %v4065_v55, 16  ;;  %v4075_v60 = vsel %vm1211_vm12, %v895_v5, %v896_v19  ;;  %v3301_v5 = vld [vmem:[%s4957_s4 + $0x40] sm:$0xff]  }
 0x1ca   : > { %vm1227_vm15 = vcmp.lt.s32.totalorder %v897_v22, %v898_v56  ;;  %1185 = vmin.xlane.f32.xlu0 %v4069_v20  ;;  %v1214_v36 = vshra.s32 %v4075_v60, 16  ;;  %v3302_v19 = vld [vmem:[%s4956_s3 + $0x40] sm:$0xff]   ;;  %3026 = vmatprep.subr.bf16.mxu1 %v3301_v5  ;;  %v3310_v5 = vld [vmem:[%s4956_s3 + $0x50] sm:$0xff]  }
 0x1cb   : > { %v4079_v26 = vcvt.s32.f32 %v1198_v14  ;;  %v4081_v30 = vsel %vm1227_vm15, %v897_v22, %v898_v56  ;;  %v3304_v22 = vld [vmem:[%s4956_s3] sm:$0xff]   ;;  %v3305_v56 = vld [vmem:[%s4957_s4 + $0x48] sm:$0xff]   ;;  %3138 = vmatprep.subr.bf16.mxu0 %v3302_v19  ;;  %3027 = vmatpush3.bf16.msra.mxu1 %v3303_v25  ;;  %v3311_v19 = vld [vmem:[%s4957_s4 + $0x10] sm:$0xff]  }
 0x1cc   : > { %v4083_v27 = vcvt.s32.f32 %v1214_v36  ;;  %v1230_v45 = vshra.s32 %v4081_v30, 16  ;;  %v3306_v14 = vld [vmem:[%s4956_s3 + $0x48] sm:$0xff]   ;;  %3139 = vmatpush3.bf16.msra.mxu0 %v3304_v22  ;;  %3028 = vmatprep.subr.bf16.mxu1 %v3305_v56  ;;  %v3312_v25 = vld [vmem:[%s4956_s3 + $0x10] sm:$0xff]   ;;  %v3313_v22 = vld [vmem:[%s4957_s4 + $0x58] sm:$0xff]  }
 0x1cd   : > { %5018 = vst [vmem:[#allocation12_spill] sm:$0xff] %v4079_v26  ;;  %1201 = vmin.xlane.f32.xlu1 %v4079_v26  ;;  %v3307_v36 = vld [vmem:[%s4957_s4 + $0x8] sm:$0xff]   ;;  %3140 = vmatprep.subr.bf16.mxu0 %v3306_v14  ;;  %v3314_v56 = vld [vmem:[%s4956_s3 + $0x58] sm:$0xff]  }
 0x1ce   : > { %5019 = vst [vmem:[#allocation13_spill] sm:$0xff] %v4083_v27  ;;  %1217 = vmin.xlane.f32.xlu0 %v4083_v27  ;;  %v4088_v54 = vcvt.s32.f32 %v1230_v45  ;;  %v3308_v45 = vld [vmem:[%s4956_s3 + $0x8] sm:$0xff]   ;;  %v3315_v14 = vld [vmem:[%s4957_s4 + $0x18] sm:$0xff]   ;;  %v941_v27 = vand.u32 65535, %v3884_v53 }
 0x1cf   : > { %3029 = vmatpush3.bf16.msra.mxu1 %v3307_v36  ;;  %v3316_v36 = vld [vmem:[%s4956_s3 + $0x18] sm:$0xff]  }
 0x1d0   : > { %5020 = vst [vmem:[#allocation14_spill] sm:$0xff] %v4088_v54  ;;  %3141 = vmatpush3.bf16.msra.mxu0 %v3308_v45  ;;  %v3318_v45 = vld [vmem:[%s4956_s3 + $0x60] sm:$0xff]  }
 0x1d1   : > { %1233 = vmin.xlane.f32.xlu1 %v4088_v54  ;;  %v3309_v54 = vld [vmem:[%s4957_s4 + $0x50] sm:$0xff]   ;;  %3142 = vmatprep.subr.bf16.mxu0 %v3310_v5  ;;  %v3319_v5 = vld [vmem:[%s4957_s4 + $0x20] sm:$0xff]  }
 0x1d2   : > { %3030 = vmatprep.subr.bf16.mxu1 %v3309_v54  ;;  %v3317_v54 = vld [vmem:[%s4957_s4 + $0x60] sm:$0xff]  }
 0x1d3   : > { %3031 = vmatpush3.bf16.msra.mxu1 %v3311_v19  ;;  %v3320_v19 = vld [vmem:[%s4956_s3 + $0x20] sm:$0xff]  }
 0x1d4   : > { %3143 = vmatpush3.bf16.msra.mxu0 %v3312_v25  ;;  %3032 = vmatprep.subr.bf16.mxu1 %v3313_v22  ;;  %v3321_v25 = vld [vmem:[%s4957_s4 + $0x68] sm:$0xff]  }
 0x1d5   : > { %3144 = vmatprep.subr.bf16.mxu0 %v3314_v56  ;;  %v3322_v22 = vld [vmem:[%s4956_s3 + $0x68] sm:$0xff]   ;;  %v761_v56 = vpop.xlane.xlu0 %760 }
 0x1d6   : > { %vm835_vm1 = vcmp.eq.f32.partialorder %v3686_v39, %v761_v56  ;;  %vm836_vm2 = vcmp.eq.f32.partialorder %v3689_v41, %v761_v56 }
 0x1d7   : > { %3033 = vmatpush3.bf16.msra.mxu1 %v3315_v14  ;;  %v764_v14 = vpop.xlane.xlu1 %763 }
 0x1d8   : > { %3145 = vmatpush3.bf16.msra.mxu0 %v3316_v36  ;;  %3034 = vmatprep.subr.bf16.mxu1 %v3317_v54  ;;  %v899_v36 = vsel %vm835_vm1, %v3866_v47, 256  ;;  %v900_v54 = vsel %vm836_vm2, %v3869_v21, 256  ;;  %vm837_vm3 = vcmp.eq.f32.partialorder %v3692_v44, %v764_v14 }
 0x1d9   : > { %3146 = vmatprep.subr.bf16.mxu0 %v3318_v45  ;;  %v5021_v45 = vld [vmem:[#allocation6_spill] sm:$0xff]  ;;  %vm1243_vm5 = vcmp.lt.s32.totalorder %v899_v36, %v900_v54 }
 0x1da   : > { %vm838_vm4 = vcmp.eq.f32.partialorder %v5021_v45, %v764_v14 }
 0x1db   : > { %3035 = vmatpush3.bf16.msra.mxu1 %v3319_v5  ;;  %v901_v5 = vsel %vm837_vm3, %v3866_v47, 256 }
 0x1dc   : > { %3147 = vmatpush3.bf16.msra.mxu0 %v3320_v19  ;;  %3036 = vmatprep.subr.bf16.mxu1 %v3321_v25  ;;  %v902_v19 = vsel %vm838_vm4, %v3869_v21, 256  ;;  %v925_v25 = vand.u32 65535, %v3875_v48 }
 0x1dd   : > { %3148 = vmatprep.subr.bf16.mxu0 %v3322_v22  ;;  %v4166_v22 = vsel %vm1243_vm5, %v899_v36, %v900_v54  ;;  %vm1259_vm6 = vcmp.lt.s32.totalorder %v901_v5, %v902_v19  ;;  %v943_v36 = vcvt.s32.f32 %v941_v27  ;;  %v957_v54 = vand.u32 65535, %v3896_v58 }
 0x1de   : > { %v927_v41 = vcvt.s32.f32 %v925_v25  ;;  %v1246_v56 = vshra.s32 %v4166_v22, 16  ;;  %v4174_v14 = vsel %vm1259_vm6, %v901_v5, %v902_v19 }
 0x1e0   : > { %v4178_v48 = vcvt.s32.f32 %v1246_v56 }
 0x21b   : > { %v4168_v39 = vpop.xlane.xlu0 %929 }
 0x21c   : > { %vm931_vm7 = vcmp.eq.f32.partialorder %v3882_v63, %v4168_v39  ;;  %v1262_v63 = vshra.s32 %v4174_v14, 16 }
 0x21d   : > { %v932_v44 = vsel %vm931_vm7, %v927_v41, inf }
 0x21e   : > { %933 = vmin.xlane.f32.xlu0 %v932_v44 }
 0x21f   : > { %v767_v45 = vpop.xlane.xlu0 %766  ;;  %v4176_v26 = vpop.xlane.xlu1 %945 }
 0x220   : > { %vm839_vm8 = vcmp.eq.f32.partialorder %v3714_v62, %v767_v45  ;;  %vm840_vm9 = vcmp.eq.f32.partialorder %v3717_v1, %v767_v45  ;;  %vm947_vm10 = vcmp.eq.f32.partialorder %v3894_v7, %v4176_v26  ;;  %v959_v62 = vcvt.s32.f32 %v957_v54  ;;  %v5022_v54 = vld [vmem:[#allocation7_spill] sm:$0xff] }
 0x221   : > { %v903_v53 = vsel %vm839_vm8, %v3866_v47, 256  ;;  %v904_v5 = vsel %vm840_vm9, %v3869_v21, 256  ;;  %v948_v19 = vsel %vm947_vm10, %v943_v36, inf  ;;  %v973_v1 = vand.u32 65535, %v3908_v6 }
 0x222   : > { %vm1275_vm11 = vcmp.lt.s32.totalorder %v903_v53, %v904_v5  ;;  %1249 = vmin.xlane.f32.xlu0 %v4178_v48  ;;  %949 = vmin.xlane.f32.xlu1 %v948_v19  ;;  %v4198_v7 = vcvt.s32.f32 %v1262_v63  ;;  %v989_v36 = vand.u32 65535, %v3924_v61 }
 0x223   : > { %v4189_v27 = vpop.xlane.xlu0 %961  ;;  %v770_v58 = vpop.xlane.xlu1 %769  ;;  %v4191_v25 = vsel %vm1275_vm11, %v903_v53, %v904_v5 }
 0x224   : > { %vm841_vm12 = vcmp.eq.f32.partialorder %v3720_v9, %v770_v58  ;;  %vm842_vm13 = vcmp.eq.f32.partialorder %v3726_v18, %v770_v58  ;;  %vm963_vm14 = vcmp.eq.f32.partialorder %v3904_v59, %v4189_v27  ;;  %v1278_v45 = vshra.s32 %v4191_v25, 16 }
 0x225   : > { %v905_v41 = vsel %vm841_vm12, %v3866_v47, 256  ;;  %v906_v56 = vsel %vm842_vm13, %v3869_v21, 256  ;;  %v964_v44 = vsel %vm963_vm14, %v959_v62, inf  ;;  %v975_v18 = vcvt.s32.f32 %v973_v1 }
 0x226   : > { %vm1291_vm15 = vcmp.lt.s32.totalorder %v905_v41, %v906_v56  ;;  %965 = vmin.xlane.f32.xlu0 %v964_v44  ;;  %1265 = vmin.xlane.f32.xlu1 %v4198_v7  ;;  %v4211_v63 = vcvt.s32.f32 %v1278_v45  ;;  %v991_v62 = vcvt.s32.f32 %v989_v36 }
 0x227   : > { %v773_v6 = vpop.xlane.xlu0 %772  ;;  %v4204_v9 = vpop.xlane.xlu1 %977  ;;  %v4207_v59 = vsel %vm1291_vm15, %v905_v41, %v906_v56  ;;  %v1005_v41 = vand.u32 65535, %v3928_v10 }
 0x228   : > { %vm843_vm1 = vcmp.eq.f32.partialorder %v3742_v34, %v773_v6  ;;  %vm844_vm2 = vcmp.eq.f32.partialorder %v5022_v54, %v773_v6  ;;  %vm979_vm3 = vcmp.eq.f32.partialorder %v3920_v28, %v4204_v9  ;;  %v1294_v58 = vshra.s32 %v4207_v59, 16  ;;  %v3323_v54 = vld [vmem:[%s4957_s4 + $0x28] sm:$0xff]  }
 0x229   : > { %v907_v53 = vsel %vm843_vm1, %v3866_v47, 256  ;;  %v908_v5 = vsel %vm844_vm2, %v3869_v21, 256  ;;  %v980_v19 = vsel %vm979_vm3, %v975_v18, inf  ;;  %v1021_v18 = vand.u32 65535, %v3948_v13  ;;  %v3325_v13 = vld [vmem:[%s4957_s4 + $0x70] sm:$0xff]   ;;  %3037 = vmatpush3.bf16.msra.mxu1 %v3323_v54 }
 0x22a   : > { %vm1307_vm4 = vcmp.lt.s32.totalorder %v907_v53, %v908_v5  ;;  %1281 = vmin.xlane.f32.xlu0 %v4211_v63  ;;  %981 = vmin.xlane.f32.xlu1 %v980_v19  ;;  %v4228_v28 = vcvt.s32.f32 %v1294_v58 }
 0x22b   : > { %v4219_v61 = vpop.xlane.xlu0 %993  ;;  %v776_v34 = vpop.xlane.xlu1 %775  ;;  %v4221_v1 = vsel %vm1307_vm4, %v907_v53, %v908_v5  ;;  %v3324_v53 = vld [vmem:[%s4956_s3 + $0x28] sm:$0xff]   ;;  %3038 = vmatprep.subr.bf16.mxu1 %v3325_v13  ;;  %v1053_v13 = vand.u32 65535, %v3972_v49  ;;  %v3332_v49 = vld [vmem:[%s4956_s3 + $0x38] sm:$0xff]  }
 0x22c   : > { %vm845_vm5 = vcmp.eq.f32.partialorder %v3748_v42, %v776_v34  ;;  %vm846_vm6 = vcmp.eq.f32.partialorder %v3754_v50, %v776_v34  ;;  %vm995_vm7 = vcmp.eq.f32.partialorder %v3930_v37, %v4219_v61  ;;  %v1310_v6 = vshra.s32 %v4221_v1, 16  ;;  %3149 = vmatpush3.bf16.msra.mxu0 %v3324_v53 }
 0x22d   : > { %v909_v56 = vsel %vm845_vm5, %v3866_v47, 256  ;;  %v910_v44 = vsel %vm846_vm6, %v3869_v21, 256  ;;  %v996_v45 = vsel %vm995_vm7, %v991_v62, inf  ;;  %v1007_v50 = vcvt.s32.f32 %v1005_v41 }
 0x22e   : > { %vm1323_vm8 = vcmp.lt.s32.totalorder %v909_v56, %v910_v44  ;;  %997 = vmin.xlane.f32.xlu0 %v996_v45  ;;  %1297 = vmin.xlane.f32.xlu1 %v4228_v28  ;;  %v4241_v36 = vcvt.s32.f32 %v1310_v6  ;;  %v1023_v62 = vcvt.s32.f32 %v1021_v18 }
 0x22f   : > { %v779_v10 = vpop.xlane.xlu0 %778  ;;  %v4234_v42 = vpop.xlane.xlu1 %1009  ;;  %v4237_v37 = vsel %vm1323_vm8, %v909_v56, %v910_v44  ;;  %v1037_v56 = vand.u32 65535, %v3952_v33 }
 0x230   : > { %vm847_vm9 = vcmp.eq.f32.partialorder %v3770_v15, %v779_v10  ;;  %vm848_vm10 = vcmp.eq.f32.partialorder %v3773_v24, %v779_v10  ;;  %vm1011_vm11 = vcmp.eq.f32.partialorder %v3944_v31, %v4234_v42  ;;  %v1326_v19 = vshra.s32 %v4237_v37, 16  ;;  %v3326_v31 = vld [vmem:[%s4956_s3 + $0x70] sm:$0xff]  }
 0x231   : > { %v911_v15 = vsel %vm847_vm9, %v3866_v47, 256  ;;  %v912_v24 = vsel %vm848_vm10, %v3869_v21, 256  ;;  %v1012_v5 = vsel %vm1011_vm11, %v1007_v50, inf  ;;  %3150 = vmatprep.subr.bf16.mxu0 %v3326_v31  ;;  %v3330_v50 = vld [vmem:[%s4956_s3 + $0x78] sm:$0xff]   ;;  %v1039_v53 = vcvt.s32.f32 %v1037_v56 }
 0x232   : > { %vm1339_vm12 = vcmp.lt.s32.totalorder %v911_v15, %v912_v24  ;;  %1313 = vmin.xlane.f32.xlu0 %v4241_v36  ;;  %1013 = vmin.xlane.f32.xlu1 %v1012_v5  ;;  %v4270_v44 = vcvt.s32.f32 %v1326_v19  ;;  %v3331_v5 = vld [vmem:[%s4957_s4 + $0x38] sm:$0xff]  }
 0x233   : > { %v4261_v58 = vpop.xlane.xlu0 %1025  ;;  %v782_v34 = vpop.xlane.xlu1 %781  ;;  %v4263_v41 = vsel %vm1339_vm12, %v911_v15, %v912_v24 }
 0x234   : > { %vm849_vm13 = vcmp.eq.f32.partialorder %v3776_v32, %v782_v34  ;;  %vm850_vm14 = vcmp.eq.f32.partialorder %v3782_v43, %v782_v34  ;;  %vm1027_vm15 = vcmp.eq.f32.partialorder %v3954_v17, %v4261_v58  ;;  %v1342_v33 = vshra.s32 %v4263_v41, 16  ;;  %v3327_v32 = vld [vmem:[%s4957_s4 + $0x30] sm:$0xff]   ;;  %v3329_v17 = vld [vmem:[%s4957_s4 + $0x78] sm:$0xff]  }
 0x235   : > { %v913_v45 = vsel %vm849_vm13, %v3866_v47, 256  ;;  %v914_v6 = vsel %vm850_vm14, %v3869_v21, 256  ;;  %v1028_v10 = vsel %vm1027_vm15, %v1023_v62, inf  ;;  %v3328_v43 = vld [vmem:[%s4956_s3 + $0x30] sm:$0xff]   ;;  %3039 = vmatpush3.bf16.msra.mxu1 %v3327_v32  ;;  %v1055_v62 = vcvt.s32.f32 %v1053_v13 }
 0x236   : > { %vm1355_vm1 = vcmp.lt.s32.totalorder %v913_v45, %v914_v6  ;;  %1029 = vmin.xlane.f32.xlu0 %v1028_v10  ;;  %1329 = vmin.xlane.f32.xlu1 %v4270_v44  ;;  %v4295_v24 = vcvt.s32.f32 %v1342_v33 }
 0x237   : > { %v785_v18 = vpop.xlane.xlu0 %784  ;;  %v4288_v54 = vpop.xlane.xlu1 %1041  ;;  %v4291_v15 = vsel %vm1355_vm1, %v913_v45, %v914_v6  ;;  %3151 = vmatpush3.bf16.msra.mxu0 %v3328_v43  ;;  %3040 = vmatprep.subr.bf16.mxu1 %v3329_v17  ;;  %v1069_v45 = vand.u32 65535, %v3976_v51  ;;  %v1085_v17 = vand.u32 65535, %v3996_v23 }
 0x238   : > { %vm851_vm2 = vcmp.eq.f32.partialorder %v3798_v29, %v785_v18  ;;  %vm852_vm3 = vcmp.eq.f32.partialorder %v3801_v40, %v785_v18  ;;  %vm1043_vm4 = vcmp.eq.f32.partialorder %v3968_v46, %v4288_v54  ;;  %3152 = vmatprep.subr.bf16.mxu0 %v3330_v50  ;;  %v1358_v31 = vshra.s32 %v4291_v15, 16  ;;  %v5023_v50 = vld [vmem:[#allocation17_spill] sm:$0xff]  ;;  %v5024_v18 = vld [vmem:[#allocation18_spill] sm:$0xff] }
 0x239   : > { %v915_v19 = vsel %vm851_vm2, %v3866_v47, 256  ;;  %v916_v29 = vsel %vm852_vm3, %v3869_v21, 256  ;;  %v1044_v40 = vsel %vm1043_vm4, %v1039_v53, inf  ;;  %3041 = vmatpush3.bf16.msra.mxu1 %v3331_v5 }
 0x23a   : > { %vm1371_vm5 = vcmp.lt.s32.totalorder %v915_v19, %v916_v29  ;;  %1345 = vmin.xlane.f32.xlu0 %v4295_v24  ;;  %1045 = vmin.xlane.f32.xlu1 %v1044_v40  ;;  %v4318_v6 = vcvt.s32.f32 %v1358_v31  ;;  %v1087_v40 = vcvt.s32.f32 %v1085_v17  ;;  %v5028_v17 = vld [vmem:[#allocation10_spill] sm:$0xff] }
 0x23b   : > { %v4309_v46 = vpop.xlane.xlu0 %1057  ;;  %v788_v34 = vpop.xlane.xlu1 %787  ;;  %v4311_v56 = vsel %vm1371_vm5, %v915_v19, %v916_v29  ;;  %3153 = vmatpush3.bf16.msra.mxu0 %v3332_v49 }
 0x23c   : > { %vm853_vm6 = vcmp.eq.f32.partialorder %v3804_v4, %v788_v34  ;;  %vm854_vm7 = vcmp.eq.f32.partialorder %v3810_v8, %v788_v34  ;;  %vm1059_vm8 = vcmp.eq.f32.partialorder %v3978_v35, %v4309_v46  ;;  %v1374_v43 = vshra.s32 %v4311_v56, 16 }
 0x23d   : > { %v917_v10 = vsel %vm853_vm6, %v3866_v47, 256  ;;  %v918_v33 = vsel %vm854_vm7, %v3869_v21, 256  ;;  %v1060_v32 = vsel %vm1059_vm8, %v1055_v62, inf  ;;  %v1071_v8 = vcvt.s32.f32 %v1069_v45  ;;  %v5026_v62 = vld [vmem:[#allocation20_spill] sm:$0xff] }
 0x23e   : > { %vm1387_vm9 = vcmp.lt.s32.totalorder %v917_v10, %v918_v33  ;;  %1061 = vmin.xlane.f32.xlu0 %v1060_v32  ;;  %1361 = vmin.xlane.f32.xlu1 %v4318_v6  ;;  %v4331_v53 = vcvt.s32.f32 %v1374_v43  ;;  %v1101_v34 = vand.u32 65535, %v4000_v57  ;;  %v5027_v45 = vld [vmem:[#allocation8_spill] sm:$0xff] }
 0x23f   : > { %v791_v51 = vpop.xlane.xlu0 %790  ;;  %v4324_v4 = vpop.xlane.xlu1 %1073  ;;  %v4327_v35 = vsel %vm1387_vm9, %v917_v10, %v918_v33 }
 0x240   : > { %vm855_vm10 = vcmp.eq.f32.partialorder %v5023_v50, %v791_v51  ;;  %vm856_vm11 = vcmp.eq.f32.partialorder %v5024_v18, %v791_v51  ;;  %vm1075_vm12 = vcmp.eq.f32.partialorder %v3992_v3, %v4324_v4  ;;  %v1390_v19 = vshra.s32 %v4327_v35, 16  ;;  %v5025_v3 = vld [vmem:[#allocation19_spill] sm:$0xff] }
 0x241   : > { %v919_v13 = vsel %vm855_vm10, %v3866_v47, 256  ;;  %v920_v5 = vsel %vm856_vm11, %v3869_v21, 256  ;;  %v1076_v49 = vsel %vm1075_vm12, %v1071_v8, inf  ;;  %v1103_v8 = vcvt.s32.f32 %v1101_v34 }
 0x242   : > { %vm1403_vm13 = vcmp.lt.s32.totalorder %v919_v13, %v920_v5  ;;  %1377 = vmin.xlane.f32.xlu0 %v4331_v53  ;;  %1077 = vmin.xlane.f32.xlu1 %v1076_v49  ;;  %v4348_v10 = vcvt.s32.f32 %v1390_v19  ;;  %v1117_v50 = vand.u32 65535, %v5028_v17  ;;  %v1133_v34 = vand.u32 65535, %v4022_v2 }
 0x243   : > { %v4339_v23 = vpop.xlane.xlu0 %1089  ;;  %v794_v29 = vpop.xlane.xlu1 %793  ;;  %v4341_v31 = vsel %vm1403_vm13, %v919_v13, %v920_v5  ;;  %v5029_v5 = vld [vmem:[#allocation9_spill] sm:$0xff]  ;;  %v1165_v2 = vand.u32 65535, %v4046_v12  ;;  %v1181_v17 = vand.u32 65535, %v4055_v11  ;;  %vm1435_vm12 = vcmask 7168  }
 0x244   : > { %vm857_vm14 = vcmp.eq.f32.partialorder %v5025_v3, %v794_v29  ;;  %vm858_vm15 = vcmp.eq.f32.partialorder %v5026_v62, %v794_v29  ;;  %vm1091_vm1 = vcmp.eq.f32.partialorder %v5027_v45, %v4339_v23  ;;  %v1406_v51 = vshra.s32 %v4341_v31, 16 }
 0x245   : > { %v921_v33 = vsel %vm857_vm14, %v3866_v47, 256  ;;  %v922_v32 = vsel %vm858_vm15, %v3869_v21, 256  ;;  %v1092_v43 = vsel %vm1091_vm1, %v1087_v40, inf  ;;  %v1119_v40 = vcvt.s32.f32 %v1117_v50 }
 0x246   : > { %vm1419_vm2 = vcmp.lt.s32.totalorder %v921_v33, %v922_v32  ;;  %1093 = vmin.xlane.f32.xlu0 %v1092_v43  ;;  %1393 = vmin.xlane.f32.xlu1 %v4348_v10  ;;  %v4359_v13 = vcvt.s32.f32 %v1406_v51  ;;  %v1183_v12 = vcvt.s32.f32 %v1181_v17  ;;  %v936_v17 = vcvt.f32.s32 %v4168_v39 }
 0x247   : > { %v4354_v57 = vpop.xlane.xlu1 %1105  ;;  %v4357_v18 = vsel %vm1419_vm2, %v921_v33, %v922_v32  ;;  %v1135_v33 = vcvt.s32.f32 %v1133_v34  ;;  %v5030_v32 = vld [vmem:[#allocation11_spill] sm:$0xff] }
 0x248   : > { %vm1107_vm3 = vcmp.eq.f32.partialorder %v5029_v5, %v4354_v57  ;;  %v1422_v49 = vshra.s32 %v4357_v18, 16  ;;  %v1149_v43 = vand.u32 65535, %v5030_v32  ;;  %v5031_v32 = vld [vmem:[#allocation12_spill] sm:$0xff] }
 0x249   : > { %v1108_v19 = vsel %vm1107_vm3, %v1103_v8, inf }
 0x24a   : > { %1409 = vmin.xlane.f32.xlu0 %v4359_v13  ;;  %1109 = vmin.xlane.f32.xlu1 %v1108_v19  ;;  %v4370_v3 = vcvt.s32.f32 %v1422_v49  ;;  %v1197_v49 = vand.u32 65535, %v4065_v55  ;;  %v1229_v55 = vand.u32 65535, %v4081_v30 }
 0x24b   : > { %v4365_v29 = vpop.xlane.xlu0 %1121 }
 0x24c   : > { %vm1123_vm4 = vcmp.eq.f32.partialorder %v4024_v0, %v4365_v29  ;;  %v1151_v0 = vcvt.s32.f32 %v1149_v43 }
 0x24d   : > { %v4372_v62 = vpop.xlane.xlu1 %1137  ;;  %v1124_v45 = vsel %vm1123_vm4, %v1119_v40, inf  ;;  %v1213_v40 = vand.u32 65535, %v4075_v60  ;;  %v5032_v60 = vld [vmem:[#allocation13_spill] sm:$0xff] }
 0x24e   : > { %1125 = vmin.xlane.f32.xlu0 %v1124_v45  ;;  %1425 = vmin.xlane.f32.xlu1 %v4370_v3  ;;  %vm1139_vm5 = vcmp.eq.f32.partialorder %v4030_v16, %v4372_v62  ;;  %v1167_v16 = vcvt.s32.f32 %v1165_v2  ;;  %v1199_v45 = vcvt.s32.f32 %v1197_v49  ;;  %v1231_v2 = vcvt.s32.f32 %v1229_v55 }
 0x24f   : > { %v1140_v51 = vsel %vm1139_vm5, %v1135_v33, inf  ;;  %v937_v49 = vshll.u32 %v936_v17, 16  ;;  %v1000_v17 = vcvt.f32.s32 %v4219_v61 }
 0x252   : > { %1141 = vmin.xlane.f32.xlu1 %v1140_v51 }
 0x253   : > { %v4379_v8 = vpop.xlane.xlu0 %1153 }
 0x254   : > { %vm1155_vm6 = vcmp.eq.f32.partialorder %v4050_v38, %v4379_v8 }
 0x255   : > { %v1156_v50 = vsel %vm1155_vm6, %v1151_v0, inf  ;;  %v5033_v0 = vld [vmem:[#allocation14_spill] sm:$0xff] }
 0x256   : > { %v4384_v5 = vpop.xlane.xlu1 %1169  ;;  %1157 = vmin.xlane.f32.xlu0 %v1156_v50 }
 0x257   : > { %v4387_v19 = vpop.xlane.xlu0 %1185  ;;  %vm1171_vm7 = vcmp.eq.f32.partialorder %v4063_v52, %v4384_v5  ;;  %v1215_v52 = vcvt.s32.f32 %v1213_v40 }
 0x258   : > { %v1172_v34 = vsel %vm1171_vm7, %v1167_v16, inf  ;;  %vm1187_vm8 = vcmp.eq.f32.partialorder %v4069_v20, %v4387_v19  ;;  %v1245_v16 = vand.u32 65535, %v4166_v22 }
 0x259   : > { %1173 = vmin.xlane.f32.xlu1 %v1172_v34  ;;  %v1188_v11 = vsel %vm1187_vm8, %v1183_v12, inf  ;;  %v952_v12 = vcvt.f32.s32 %v4176_v26 }
 0x25a   : > { %v4394_v38 = vpop.xlane.xlu1 %1201  ;;  %1189 = vmin.xlane.f32.xlu0 %v1188_v11  ;;  %v1261_v11 = vand.u32 65535, %v4174_v14  ;;  %v1247_v22 = vcvt.s32.f32 %v1245_v16  ;;  %v984_v14 = vcvt.f32.s32 %v4204_v9 }
 0x25b   : > { %v4397_v33 = vpop.xlane.xlu0 %1217  ;;  %vm1203_vm9 = vcmp.eq.f32.partialorder %v5031_v32, %v4394_v38  ;;  %v953_v32 = vshll.u32 %v952_v12, 16 }
 0x25c   : > { %v1204_v43 = vsel %vm1203_vm9, %v1199_v45, inf  ;;  %vm1219_vm10 = vcmp.eq.f32.partialorder %v5032_v60, %v4397_v33  ;;  %v968_v45 = vcvt.f32.s32 %v4189_v27  ;;  %v1263_v60 = vcvt.s32.f32 %v1261_v11 }
 0x25d   : > { %1205 = vmin.xlane.f32.xlu1 %v1204_v43  ;;  %v1220_v20 = vsel %vm1219_vm10, %v1215_v52, inf }
 0x25e   : > { %v4403_v51 = vpop.xlane.xlu1 %1233  ;;  %1221 = vmin.xlane.f32.xlu0 %v1220_v20  ;;  %v969_v20 = vshll.u32 %v968_v45, 16  ;;  %v1016_v45 = vcvt.f32.s32 %v4234_v42 }
 0x25f   : > { %vm1235_vm11 = vcmp.eq.f32.partialorder %v5033_v0, %v4403_v51  ;;  %v1277_v0 = vand.u32 65535, %v4191_v25 }
 0x260   : > { %v1236_v30 = vsel %vm1235_vm11, %v1231_v2, inf }
 0x261   : > { %1237 = vmin.xlane.f32.xlu1 %v1236_v30  ;;  %v1279_v12 = vcvt.s32.f32 %v1277_v0 }
 0x2ab   : > { %v934_v50 = vpop.xlane.xlu0 %933 }
 0x2ac   : > { %v935_v40 = vcvt.f32.s32 %v934_v50  ;;  %v3430_v50 = vmov 1.0|1.0  }
 0x2ae   : > { %v938_v34 = vadd.s32 %v937_v49, %v935_v40  ;;  %v1293_v40 = vand.u32 65535, %v4207_v59  ;;  %v1001_v59 = vshll.u32 %v1000_v17, 16  ;;  %v1341_v17 = vand.u32 65535, %v4263_v41 }
 0x2af   : > { %v4418_v39 = vpop.xlane.xlu0 %1249  ;;  %v950_v55 = vpop.xlane.xlu1 %949  ;;  %v1064_v41 = vcvt.f32.s32 %v4309_v46 }
 0x2b0   : > { %1436 = vst.msk [vmem:[%s4414_s20] sm:$0xff] %vm1435_vm12, %v938_v34  ;;  %v951_v26 = vcvt.f32.s32 %v950_v55  ;;  %vm1251_vm13 = vcmp.eq.f32.partialorder %v4178_v48, %v4418_v39  ;;  %vm1468_vm14 = vcmp.eq.s32.totalorder %v3866_v47, %v938_v34  ;;  %vm1469_vm3 = vcmp.eq.s32.totalorder %v3869_v21, %v938_v34 }
 0x2b1   : > { %v1252_v52 = vsel %vm1251_vm13, %v1247_v22, inf  ;;  %v985_v34 = vshll.u32 %v984_v14, 16  ;;  %v1017_v14 = vshll.u32 %v1016_v45, 16  ;;  %v1048_v48 = vcvt.f32.s32 %v4288_v54 }
 0x2b2   : > { %v954_v43 = vadd.s32 %v953_v32, %v951_v26  ;;  %1253 = vmin.xlane.f32.xlu0 %v1252_v52  ;;  %v1295_v32 = vcvt.s32.f32 %v1293_v40  ;;  %v1309_v26 = vand.u32 65535, %v4221_v1  ;;  %v1032_v1 = vcvt.f32.s32 %v4261_v58 }
 0x2b3   : > { %v966_v27 = vpop.xlane.xlu0 %965  ;;  %v4425_v2 = vpop.xlane.xlu1 %1265  ;;  %v1080_v45 = vcvt.f32.s32 %v4324_v4 }
 0x2b4   : > { %1437 = vst.msk [vmem:[%s4414_s20 + $0x8] sm:$0xff] %vm1435_vm12, %v954_v43  ;;  %vm1470_vm15 = vcmp.eq.s32.totalorder %v3866_v47, %v954_v43  ;;  %v967_v30 = vcvt.f32.s32 %v966_v27  ;;  %vm1471_vm1 = vcmp.eq.s32.totalorder %v3869_v21, %v954_v43  ;;  %vm1267_vm4 = vcmp.eq.f32.partialorder %v4198_v7, %v4425_v2 }
 0x2b5   : > { %vm4433_vm2 = vmpackc.low %vm1470_vm15, %vm1468_vm14  ;;  %v1268_v9 = vsel %vm1267_vm4, %v1263_v60, inf }
 0x2b6   : > { %v970_v25 = vadd.s32 %v969_v20, %v967_v30  ;;  %vm2878_vm5 = vmpackc.low %vm1471_vm1, %vm1469_vm3  ;;  %1269 = vmin.xlane.f32.xlu1 %v1268_v9  ;;  %v1325_v20 = vand.u32 65535, %v4237_v37  ;;  %v1033_v30 = vshll.u32 %v1032_v1, 16  ;;  %v1389_v1 = vand.u32 65535, %v4327_v35 }
 0x2b7   : > { %2879 = vmatprep.mubr.msk.bf16.mxu1 %vm2878_vm5, %v3430_v50  ;;  %2959 = vmatprep.mubr.msk.bf16.mxu0 %vm2878_vm5, %v3430_v50  ;;  %v4443_v16 = vpop.xlane.xlu0 %1281  ;;  %v982_v49 = vpop.xlane.xlu1 %981 }
 0x2b8   : > { %1438 = vst.msk [vmem:[%s4414_s20 + $0x10] sm:$0xff] %vm1435_vm12, %v970_v25  ;;  %2881 = vmatmul.mubr.msk.bf16.vlgmr.msra.gmra.mrb[32].mxu1 %vm4433_vm2, %v3430_v50  ;;  %v983_v7 = vcvt.f32.s32 %v982_v49  ;;  %vm1283_vm6 = vcmp.eq.f32.partialorder %v4211_v63, %v4443_v16  ;;  %2961 = vmatmul.mubr.msk.bf16.vlgmr.msra.gmra.mrb[32].mxu0 %vm4433_vm2, %v3430_v50  ;;  %vm1473_vm7 = vcmp.eq.s32.totalorder %v3869_v21, %v970_v25  ;;  %v1327_v9 = vcvt.s32.f32 %v1325_v20 }
 0x2b9   : > { %v1284_v61 = vsel %vm1283_vm6, %v1279_v12, inf  ;;  %vm1472_vm11 = vcmp.eq.s32.totalorder %v3866_v47, %v970_v25 }
 0x2ba   : > { %v986_v11 = vadd.s32 %v985_v34, %v983_v7  ;;  %1285 = vmin.xlane.f32.xlu0 %v1284_v61  ;;  %v1357_v34 = vand.u32 65535, %v4291_v15  ;;  %v1049_v7 = vshll.u32 %v1048_v48, 16 }
 0x2bb   : > { %v998_v55 = vpop.xlane.xlu0 %997  ;;  %v4457_v22 = vpop.xlane.xlu1 %1297 }
 0x2bc   : > { %1439 = vst.msk [vmem:[%s4414_s20 + $0x18] sm:$0xff] %vm1435_vm12, %v986_v11  ;;  %v999_v52 = vcvt.f32.s32 %v998_v55  ;;  %vm1475_vm8 = vcmp.eq.s32.totalorder %v3869_v21, %v986_v11  ;;  %vm1299_vm9 = vcmp.eq.f32.partialorder %v4228_v28, %v4457_v22  ;;  %vm1474_vm13 = vcmp.eq.s32.totalorder %v3866_v47, %v986_v11 }
 0x2bd   : > { %vm2882_vm10 = vmpackc.low %vm1475_vm8, %vm1473_vm7  ;;  %v1300_v63 = vsel %vm1299_vm9, %v1295_v32, inf  ;;  %v1311_v28 = vcvt.s32.f32 %v1309_v26  ;;  %v1359_v32 = vcvt.s32.f32 %v1357_v34  ;;  %v1373_v26 = vand.u32 65535, %v4311_v56 }
 0x2be   : > { %v1002_v42 = vadd.s32 %v1001_v59, %v999_v52  ;;  %2883 = vmatprep.mubr.msk.bf16.mxu1 %vm2882_vm10, %v3430_v50  ;;  %2963 = vmatprep.mubr.msk.bf16.mxu0 %vm2882_vm10, %v3430_v50  ;;  %vm2884_vm14 = vmpackc.low %vm1474_vm13, %vm1472_vm11  ;;  %v1065_v59 = vshll.u32 %v1064_v41, 16  ;;  %v1096_v56 = vcvt.f32.s32 %v4339_v23 }
 0x2bf   : > { %1301 = vmin.xlane.f32.xlu1 %v1300_v63  ;;  %v4471_v43 = vpop.xlane.xlu0 %1313  ;;  %v1014_v60 = vpop.xlane.xlu1 %1013 }
 0x2c0   : > { %1440 = vst.msk [vmem:[%s4414_s20 + $0x20] sm:$0xff] %vm1435_vm12, %v1002_v42  ;;  %2885 = vmatmul.mubr.msk.bf16.gmra.mrb[36].mxu1 %vm2884_vm14, %v3430_v50  ;;  %v1015_v27 = vcvt.f32.s32 %v1014_v60  ;;  %vm1315_vm15 = vcmp.eq.f32.partialorder %v4241_v36, %v4471_v43  ;;  %2965 = vmatmul.mubr.msk.bf16.gmra.mrb[36].mxu0 %vm2884_vm14, %v3430_v50  ;;  %vm1477_vm1 = vcmp.eq.s32.totalorder %v3869_v21, %v1002_v42  ;;  %v1081_v60 = vshll.u32 %v1080_v45, 16 }
 0x2c1   : > { %v1316_v58 = vsel %vm1315_vm15, %v1311_v28, inf  ;;  %vm1476_vm5 = vcmp.eq.s32.totalorder %v3866_v47, %v1002_v42 }
 0x2c2   : > { %v1018_v0 = vadd.s32 %v1017_v14, %v1015_v27  ;;  %1317 = vmin.xlane.f32.xlu0 %v1316_v58  ;;  %v1097_v14 = vshll.u32 %v1096_v56, 16  ;;  %v1112_v27 = vcvt.f32.s32 %v4354_v57 }
 0x2c3   : > { %v1030_v25 = vpop.xlane.xlu0 %1029  ;;  %v4481_v37 = vpop.xlane.xlu1 %1329 }
 0x2c4   : > { %1441 = vst.msk [vmem:[%s4414_s20 + $0x28] sm:$0xff] %vm1435_vm12, %v1018_v0  ;;  %v1031_v49 = vcvt.f32.s32 %v1030_v25  ;;  %vm1479_vm2 = vcmp.eq.s32.totalorder %v3869_v21, %v1018_v0  ;;  %vm1331_vm3 = vcmp.eq.f32.partialorder %v4270_v44, %v4481_v37  ;;  %vm1478_vm6 = vcmp.eq.s32.totalorder %v3866_v47, %v1018_v0 }
 0x2c5   : > { %vm2886_vm4 = vmpackc.low %vm1479_vm2, %vm1477_vm1  ;;  %v1332_v36 = vsel %vm1331_vm3, %v1327_v9, inf  ;;  %v1343_v44 = vcvt.s32.f32 %v1341_v17  ;;  %v1391_v0 = vcvt.s32.f32 %v1389_v1  ;;  %v1421_v17 = vand.u32 65535, %v4357_v18 }
 0x2c6   : > { %v1034_v54 = vadd.s32 %v1033_v30, %v1031_v49  ;;  %2887 = vmatprep.mubr.msk.bf16.mxu1 %vm2886_vm4, %v3430_v50  ;;  %2967 = vmatprep.mubr.msk.bf16.mxu0 %vm2886_vm4, %v3430_v50  ;;  %vm2888_vm7 = vmpackc.low %vm1478_vm6, %vm1476_vm5  ;;  %v1405_v30 = vand.u32 65535, %v4341_v31  ;;  %v1128_v31 = vcvt.f32.s32 %v4365_v29  ;;  %v1113_v49 = vshll.u32 %v1112_v27, 16 }
 0x2c7   : > { %1333 = vmin.xlane.f32.xlu1 %v1332_v36  ;;  %v4495_v12 = vpop.xlane.xlu0 %1345  ;;  %v1046_v40 = vpop.xlane.xlu1 %1045  ;;  %v1423_v18 = vcvt.s32.f32 %v1421_v17 }
 0x2c8   : > { %1442 = vst.msk [vmem:[%s4414_s20 + $0x30] sm:$0xff] %vm1435_vm12, %v1034_v54  ;;  %2889 = vmatmul.mubr.msk.bf16.gmra.mrb[40].mxu1 %vm2888_vm7, %v3430_v50  ;;  %v1047_v61 = vcvt.f32.s32 %v1046_v40  ;;  %vm1347_vm8 = vcmp.eq.f32.partialorder %v4295_v24, %v4495_v12  ;;  %2969 = vmatmul.mubr.msk.bf16.gmra.mrb[40].mxu0 %vm2888_vm7, %v3430_v50  ;;  %vm1481_vm9 = vcmp.eq.s32.totalorder %v3869_v21, %v1034_v54  ;;  %v1129_v41 = vshll.u32 %v1128_v31, 16 }
 0x2c9   : > { %v1348_v46 = vsel %vm1347_vm8, %v1343_v44, inf  ;;  %vm1480_vm14 = vcmp.eq.s32.totalorder %v3866_v47, %v1034_v54  ;;  %v1144_v40 = vcvt.f32.s32 %v4372_v62  ;;  %v1256_v31 = vcvt.f32.s32 %v4418_v39 }
 0x2ca   : > { %v1050_v11 = vadd.s32 %v1049_v7, %v1047_v61  ;;  %1349 = vmin.xlane.f32.xlu0 %v1348_v46  ;;  %v1160_v61 = vcvt.f32.s32 %v4379_v8  ;;  %v1304_v39 = vcvt.f32.s32 %v4457_v22 }
 0x2cb   : > { %v1062_v55 = vpop.xlane.xlu0 %1061  ;;  %v4505_v15 = vpop.xlane.xlu1 %1361 }
 0x2cc   : > { %1443 = vst.msk [vmem:[%s4414_s20 + $0x38] sm:$0xff] %vm1435_vm12, %v1050_v11  ;;  %v1063_v52 = vcvt.f32.s32 %v1062_v55  ;;  %vm1483_vm10 = vcmp.eq.s32.totalorder %v3869_v21, %v1050_v11  ;;  %vm1363_vm11 = vcmp.eq.f32.partialorder %v4318_v6, %v4505_v15  ;;  %vm1482_vm15 = vcmp.eq.s32.totalorder %v3866_v47, %v1050_v11 }
 0x2cd   : > { %vm2890_vm13 = vmpackc.low %vm1483_vm10, %vm1481_vm9  ;;  %v1364_v24 = vsel %vm1363_vm11, %v1359_v32, inf  ;;  %v1375_v6 = vcvt.s32.f32 %v1373_v26  ;;  %v1145_v11 = vshll.u32 %v1144_v40, 16  ;;  %v1161_v45 = vshll.u32 %v1160_v61, 16 }
 0x2ce   : > { %v1066_v4 = vadd.s32 %v1065_v59, %v1063_v52  ;;  %2891 = vmatprep.mubr.msk.bf16.mxu1 %vm2890_vm13, %v3430_v50  ;;  %2971 = vmatprep.mubr.msk.bf16.mxu0 %vm2890_vm13, %v3430_v50  ;;  %vm2892_vm1 = vmpackc.low %vm1482_vm15, %vm1480_vm14  ;;  %v1176_v55 = vcvt.f32.s32 %v4384_v5  ;;  %v1192_v32 = vcvt.f32.s32 %v4387_v19  ;;  %v1208_v52 = vcvt.f32.s32 %v4394_v38 }
 0x2cf   : > { %1365 = vmin.xlane.f32.xlu1 %v1364_v24  ;;  %v4519_v63 = vpop.xlane.xlu0 %1377  ;;  %v1078_v42 = vpop.xlane.xlu1 %1077  ;;  %v1305_v22 = vshll.u32 %v1304_v39, 16 }
 0x2d0   : > { %1444 = vst.msk [vmem:[%s4414_s20 + $0x40] sm:$0xff] %vm1435_vm12, %v1066_v4  ;;  %2893 = vmatmul.mubr.msk.bf16.gmra.mrb[44].mxu1 %vm2892_vm1, %v3430_v50  ;;  %v1079_v28 = vcvt.f32.s32 %v1078_v42  ;;  %vm1379_vm2 = vcmp.eq.f32.partialorder %v4331_v53, %v4519_v63  ;;  %2973 = vmatmul.mubr.msk.bf16.gmra.mrb[44].mxu0 %vm2892_vm1, %v3430_v50  ;;  %vm1485_vm3 = vcmp.eq.s32.totalorder %v3869_v21, %v1066_v4  ;;  %v1177_v19 = vshll.u32 %v1176_v55, 16 }
 0x2d1   : > { %v1380_v23 = vsel %vm1379_vm2, %v1375_v6, inf  ;;  %vm1484_vm7 = vcmp.eq.s32.totalorder %v3866_v47, %v1066_v4  ;;  %v1193_v42 = vshll.u32 %v1192_v32, 16  ;;  %v1224_v6 = vcvt.f32.s32 %v4397_v33 }
 0x2d2   : > { %v1082_v20 = vadd.s32 %v1081_v60, %v1079_v28  ;;  %1381 = vmin.xlane.f32.xlu0 %v1380_v23  ;;  %v1209_v60 = vshll.u32 %v1208_v52, 16  ;;  %v1240_v28 = vcvt.f32.s32 %v4403_v51 }
 0x2d3   : > { %v1094_v58 = vpop.xlane.xlu0 %1093  ;;  %v4529_v35 = vpop.xlane.xlu1 %1393  ;;  %v1225_v33 = vshll.u32 %v1224_v6, 16 }
 0x2d4   : > { %1445 = vst.msk [vmem:[%s4414_s20 + $0x48] sm:$0xff] %vm1435_vm12, %v1082_v20  ;;  %v1095_v48 = vcvt.f32.s32 %v1094_v58  ;;  %vm1487_vm4 = vcmp.eq.s32.totalorder %v3869_v21, %v1082_v20  ;;  %vm1395_vm5 = vcmp.eq.f32.partialorder %v4348_v10, %v4529_v35  ;;  %vm1486_vm8 = vcmp.eq.s32.totalorder %v3866_v47, %v1082_v20 }
 0x2d5   : > { %vm2894_vm6 = vmpackc.low %vm1487_vm4, %vm1485_vm3  ;;  %v1396_v53 = vsel %vm1395_vm5, %v1391_v0, inf  ;;  %v1407_v10 = vcvt.s32.f32 %v1405_v30  ;;  %v1241_v0 = vshll.u32 %v1240_v28, 16  ;;  %v1400_v28 = vcvt.f32.s32 %v4529_v35 }
 0x2d6   : > { %v1098_v57 = vadd.s32 %v1097_v14, %v1095_v48  ;;  %2895 = vmatprep.mubr.msk.bf16.mxu1 %vm2894_vm6, %v3430_v50  ;;  %2975 = vmatprep.mubr.msk.bf16.mxu0 %vm2894_vm6, %v3430_v50  ;;  %vm2896_vm9 = vmpackc.low %vm1486_vm8, %vm1484_vm7 }
 0x2d7   : > { %1397 = vmin.xlane.f32.xlu1 %v1396_v53  ;;  %v4543_v25 = vpop.xlane.xlu0 %1409  ;;  %v1110_v9 = vpop.xlane.xlu1 %1109 }
 0x2d8   : > { %1446 = vst.msk [vmem:[%s4414_s20 + $0x50] sm:$0xff] %vm1435_vm12, %v1098_v57  ;;  %2897 = vmatmul.mubr.msk.bf16.gmra.mrb[48].mxu1 %vm2896_vm9, %v3430_v50  ;;  %v1111_v36 = vcvt.f32.s32 %v1110_v9  ;;  %vm1411_vm10 = vcmp.eq.f32.partialorder %v4359_v13, %v4543_v25  ;;  %2977 = vmatmul.mubr.msk.bf16.gmra.mrb[48].mxu0 %vm2896_vm9, %v3430_v50  ;;  %vm1489_vm11 = vcmp.eq.s32.totalorder %v3869_v21, %v1098_v57  ;;  %v1416_v35 = vcvt.f32.s32 %v4543_v25 }
 0x2d9   : > { %v1412_v29 = vsel %vm1411_vm10, %v1407_v10, inf  ;;  %vm1488_vm1 = vcmp.eq.s32.totalorder %v3866_v47, %v1098_v57  ;;  %v1257_v10 = vshll.u32 %v1256_v31, 16 }
 0x2da   : > { %v1114_v54 = vadd.s32 %v1113_v49, %v1111_v36  ;;  %1413 = vmin.xlane.f32.xlu0 %v1412_v29  ;;  %v1272_v49 = vcvt.f32.s32 %v4425_v2  ;;  %v1288_v29 = vcvt.f32.s32 %v4443_v16  ;;  %v1320_v2 = vcvt.f32.s32 %v4471_v43 }
 0x2db   : > { %v1126_v44 = vpop.xlane.xlu0 %1125  ;;  %v4553_v34 = vpop.xlane.xlu1 %1425  ;;  %v1336_v43 = vcvt.f32.s32 %v4481_v37  ;;  %v1352_v37 = vcvt.f32.s32 %v4495_v12 }
 0x2dc   : > { %1447 = vst.msk [vmem:[%s4414_s20 + $0x58] sm:$0xff] %vm1435_vm12, %v1114_v54  ;;  %v1127_v7 = vcvt.f32.s32 %v1126_v44  ;;  %vm1491_vm13 = vcmp.eq.s32.totalorder %v3869_v21, %v1114_v54  ;;  %vm1427_vm14 = vcmp.eq.f32.partialorder %v4370_v3, %v4553_v34  ;;  %vm1490_vm2 = vcmp.eq.s32.totalorder %v3866_v47, %v1114_v54 }
 0x2dd   : > { %vm2898_vm15 = vmpackc.low %vm1491_vm13, %vm1489_vm11  ;;  %v1428_v13 = vsel %vm1427_vm14, %v1423_v18, inf  ;;  %v1289_v18 = vshll.u32 %v1288_v29, 16  ;;  %v1337_v32 = vshll.u32 %v1336_v43, 16 }
 0x2de   : > { %v1130_v62 = vadd.s32 %v1129_v41, %v1127_v7  ;;  %2899 = vmatprep.mubr.msk.bf16.mxu1 %vm2898_vm15, %v3430_v50  ;;  %2979 = vmatprep.mubr.msk.bf16.mxu0 %vm2898_vm15, %v3430_v50  ;;  %vm2900_vm3 = vmpackc.low %vm1490_vm2, %vm1488_vm1  ;;  %v1273_v41 = vshll.u32 %v1272_v49, 16 }
 0x2df   : > { %1429 = vmin.xlane.f32.xlu1 %v1428_v13  ;;  %v1142_v46 = vpop.xlane.xlu1 %1141 }
 0x2e0   : > { %1448 = vst.msk [vmem:[%s4414_s20 + $0x60] sm:$0xff] %vm1435_vm12, %v1130_v62  ;;  %2901 = vmatmul.mubr.msk.bf16.gmra.mrb[52].mxu1 %vm2900_vm3, %v3430_v50  ;;  %v1143_v3 = vcvt.f32.s32 %v1142_v46  ;;  %2981 = vmatmul.mubr.msk.bf16.gmra.mrb[52].mxu0 %vm2900_vm3, %v3430_v50  ;;  %vm1493_vm4 = vcmp.eq.s32.totalorder %v3869_v21, %v1130_v62  ;;  %vm1492_vm8 = vcmp.eq.s32.totalorder %v3866_v47, %v1130_v62 }
 0x2e2   : > { %v1146_v59 = vadd.s32 %v1145_v11, %v1143_v3  ;;  %v1321_v3 = vshll.u32 %v1320_v2, 16 }
 0x2e3   : > { %v1158_v26 = vpop.xlane.xlu0 %1157 }
 0x2e4   : > { %1449 = vst.msk [vmem:[%s4414_s20 + $0x68] sm:$0xff] %vm1435_vm12, %v1146_v59  ;;  %v1159_v8 = vcvt.f32.s32 %v1158_v26  ;;  %vm1495_vm5 = vcmp.eq.s32.totalorder %v3869_v21, %v1146_v59  ;;  %vm1494_vm6 = vcmp.eq.s32.totalorder %v3866_v47, %v1146_v59 }
 0x2e5   : > { %vm2902_vm7 = vmpackc.low %vm1495_vm5, %vm1493_vm4 }
 0x2e6   : > { %v1162_v24 = vadd.s32 %v1161_v45, %v1159_v8  ;;  %v1174_v5 = vpop.xlane.xlu1 %1173  ;;  %2903 = vmatprep.mubr.msk.bf16.mxu1 %vm2902_vm7, %v3430_v50  ;;  %2983 = vmatprep.mubr.msk.bf16.mxu0 %vm2902_vm7, %v3430_v50  ;;  %vm2904_vm9 = vmpackc.low %vm1494_vm6, %vm1492_vm8 }
 0x2e7   : > { %v1175_v4 = vcvt.f32.s32 %v1174_v5  ;;  %v1190_v56 = vpop.xlane.xlu0 %1189 }
 0x2e8   : > { %1450 = vst.msk [vmem:[%s4414_s20 + $0x70] sm:$0xff] %vm1435_vm12, %v1162_v24  ;;  %v1191_v1 = vcvt.f32.s32 %v1190_v56  ;;  %2905 = vmatmul.mubr.msk.bf16.gmra.mrb[56].mxu1 %vm2904_vm9, %v3430_v50  ;;  %2985 = vmatmul.mubr.msk.bf16.gmra.mrb[56].mxu0 %vm2904_vm9, %v3430_v50  ;;  %vm1497_vm10 = vcmp.eq.s32.totalorder %v3869_v21, %v1162_v24  ;;  %vm1496_vm15 = vcmp.eq.s32.totalorder %v3866_v47, %v1162_v24  ;;  %v1353_v24 = vshll.u32 %v1352_v37, 16 }
 0x2e9   : > { %v1178_v38 = vadd.s32 %v1177_v19, %v1175_v4  ;;  %v1368_v19 = vcvt.f32.s32 %v4505_v15  ;;  %v1384_v15 = vcvt.f32.s32 %v4519_v63 }
 0x2ea   : > { %v1194_v23 = vadd.s32 %v1193_v42, %v1191_v1  ;;  %v1206_v20 = vpop.xlane.xlu1 %1205 }
 0x2eb   : > { %1451 = vst.msk [vmem:[%s4414_s20 + $0x78] sm:$0xff] %vm1435_vm12, %v1178_v38  ;;  %v1207_v14 = vcvt.f32.s32 %v1206_v20  ;;  %v1222_v27 = vpop.xlane.xlu0 %1221  ;;  %vm1499_vm11 = vcmp.eq.s32.totalorder %v3869_v21, %v1178_v38  ;;  %vm1498_vm13 = vcmp.eq.s32.totalorder %v3866_v47, %v1178_v38  ;;  %v1369_v56 = vshll.u32 %v1368_v19, 16 }
 0x2ec   : > { %1452 = vst.msk [vmem:[%s4414_s20 + $0x80] sm:$0xff] %vm1435_vm12, %v1194_v23  ;;  %v1223_v58 = vcvt.f32.s32 %v1222_v27  ;;  %vm2906_vm14 = vmpackc.low %vm1499_vm11, %vm1497_vm10  ;;  %vm1501_vm2 = vcmp.eq.s32.totalorder %v3869_v21, %v1194_v23  ;;  %vm1500_vm6 = vcmp.eq.s32.totalorder %v3866_v47, %v1194_v23  ;;  %v1385_v38 = vshll.u32 %v1384_v15, 16 }
 0x2ed   : > { %v1210_v51 = vadd.s32 %v1209_v60, %v1207_v14  ;;  %2907 = vmatprep.mubr.msk.bf16.mxu1 %vm2906_vm14, %v3430_v50  ;;  %2987 = vmatprep.mubr.msk.bf16.mxu0 %vm2906_vm14, %v3430_v50  ;;  %vm2908_vm1 = vmpackc.low %vm1498_vm13, %vm1496_vm15  ;;  %v1401_v20 = vshll.u32 %v1400_v28, 16  ;;  %v3335_v28 = vld [vmem:[%s3541_s8 + $0x10] sm:$0xff] }
 0x2ee   : > { %v1226_v30 = vadd.s32 %v1225_v33, %v1223_v58  ;;  %v1238_v48 = vpop.xlane.xlu1 %1237  ;;  %v1417_v58 = vshll.u32 %v1416_v35, 16 }
 0x2ef   : > { %1453 = vst.msk [vmem:[%s4414_s20 + $0x88] sm:$0xff] %vm1435_vm12, %v1210_v51  ;;  %v1239_v53 = vcvt.f32.s32 %v1238_v48  ;;  %vm1503_vm3 = vcmp.eq.s32.totalorder %v3869_v21, %v1210_v51  ;;  %vm1502_vm4 = vcmp.eq.s32.totalorder %v3866_v47, %v1210_v51 }
 0x2f0   : > { %1454 = vst.msk [vmem:[%s4414_s20 + $0x90] sm:$0xff] %vm1435_vm12, %v1226_v30  ;;  %2909 = vmatmul.mubr.msk.bf16.gmra.mrb[60].mxu1 %vm2908_vm1, %v3430_v50  ;;  %vm2910_vm5 = vmpackc.low %vm1503_vm3, %vm1501_vm2  ;;  %2989 = vmatmul.mubr.msk.bf16.gmra.mrb[60].mxu0 %vm2908_vm1, %v3430_v50  ;;  %vm1505_vm9 = vcmp.eq.s32.totalorder %v3869_v21, %v1226_v30  ;;  %vm1504_vm13 = vcmp.eq.s32.totalorder %v3866_v47, %v1226_v30 }
 0x2f1   : > { %v1242_v57 = vadd.s32 %v1241_v0, %v1239_v53  ;;  %2911 = vmatprep.mubr.msk.bf16.mxu1 %vm2910_vm5, %v3430_v50  ;;  %vm2912_vm7 = vmpackc.low %vm1502_vm4, %vm1500_vm6  ;;  %2991 = vmatprep.mubr.msk.bf16.mxu0 %vm2910_vm5, %v3430_v50  ;;  %v1432_v0 = vcvt.f32.s32 %v4553_v34 }
 0x2f3   : > { %1455 = vst.msk [vmem:[%s4414_s20 + $0x98] sm:$0xff] %vm1435_vm12, %v1242_v57  ;;  %vm1507_vm8 = vcmp.eq.s32.totalorder %v3869_v21, %v1242_v57  ;;  %vm1506_vm11 = vcmp.eq.s32.totalorder %v3866_v47, %v1242_v57  ;;  %v1433_v30 = vshll.u32 %v1432_v0, 16  ;;  %v4706_v57 = vstv %s3022_s21 }
 0x2f4   : > { %vm2914_vm10 = vmpackc.low %vm1507_vm8, %vm1505_vm9 }
 0x2f5   : > { %vm2916_vm14 = vmpackc.low %vm1506_vm11, %vm1504_vm13 }
 0x2f8   : > { %2913 = vmatmul.mubr.msk.bf16.gmra.mrb[64].mxu1 %vm2912_vm7, %v3430_v50  ;;  %2993 = vmatmul.mubr.msk.bf16.gmra.mrb[64].mxu0 %vm2912_vm7, %v3430_v50 }
 0x2f9   : > { %2915 = vmatprep.mubr.msk.bf16.mxu1 %vm2914_vm10, %v3430_v50  ;;  %2995 = vmatprep.mubr.msk.bf16.mxu0 %vm2914_vm10, %v3430_v50 }
 0x300   : > { %2917 = vmatmul.mubr.msk.bf16.gmra.mrb[68].mxu1 %vm2916_vm14, %v3430_v50  ;;  %2997 = vmatmul.mubr.msk.bf16.gmra.mrb[68].mxu0 %vm2916_vm14, %v3430_v50 }
 0x33f   : > { %v1254_v9 = vpop.xlane.xlu0 %1253 }
 0x340   : > { %v1255_v17 = vcvt.f32.s32 %v1254_v9 }
 0x342   : > { %v1258_v36 = vadd.s32 %v1257_v10, %v1255_v17 }
 0x343   : > { %v1270_v54 = vpop.xlane.xlu1 %1269 }
 0x344   : > { %1456 = vst.msk [vmem:[%s4414_s20 + $0xa0] sm:$0xff] %vm1435_vm12, %v1258_v36  ;;  %v1271_v40 = vcvt.f32.s32 %v1270_v54  ;;  %vm1509_vm15 = vcmp.eq.s32.totalorder %v3869_v21, %v1258_v36  ;;  %vm1508_vm4 = vcmp.eq.s32.totalorder %v3866_v47, %v1258_v36 }
 0x346   : > { %v1274_v7 = vadd.s32 %v1273_v41, %v1271_v40 }
 0x347   : > { %v1286_v44 = vpop.xlane.xlu0 %1285 }
 0x348   : > { %v1287_v13 = vcvt.f32.s32 %v1286_v44  ;;  %1457 = vst.msk [vmem:[%s4414_s20 + $0xa8] sm:$0xff] %vm1435_vm12, %v1274_v7  ;;  %vm1511_vm1 = vcmp.eq.s32.totalorder %v3869_v21, %v1274_v7  ;;  %vm1510_vm2 = vcmp.eq.s32.totalorder %v3866_v47, %v1274_v7 }
 0x349   : > { %vm2918_vm3 = vmpackc.low %vm1511_vm1, %vm1509_vm15 }
 0x34a   : > { %v1290_v62 = vadd.s32 %v1289_v18, %v1287_v13  ;;  %2919 = vmatprep.mubr.msk.bf16.mxu1 %vm2918_vm3, %v3430_v50  ;;  %2999 = vmatprep.mubr.msk.bf16.mxu0 %vm2918_vm3, %v3430_v50  ;;  %vm2920_vm5 = vmpackc.low %vm1510_vm2, %vm1508_vm4 }
 0x34b   : > { %2921 = vmatmul.mubr.msk.bf16.gmra.mrb[72].mxu1 %vm2920_vm5, %v3430_v50  ;;  %3001 = vmatmul.mubr.msk.bf16.gmra.mrb[72].mxu0 %vm2920_vm5, %v3430_v50 }
 0x34c   : > { %1458 = vst.msk [vmem:[%s4414_s20 + $0xb0] sm:$0xff] %vm1435_vm12, %v1290_v62  ;;  %v1302_v16 = vpop.xlane.xlu1 %1301  ;;  %vm1513_vm6 = vcmp.eq.s32.totalorder %v3869_v21, %v1290_v62  ;;  %vm1512_vm10 = vcmp.eq.s32.totalorder %v3866_v47, %v1290_v62  ;;  %v3333_v62 = vld [vmem:[%s3541_s8] sm:$0xff] }
 0x34d   : > { %v1303_v61 = vcvt.f32.s32 %v1302_v16 }
 0x34f   : > { %v1306_v46 = vadd.s32 %v1305_v22, %v1303_v61  ;;  %v1318_v11 = vpop.xlane.xlu0 %1317 }
 0x350   : > { %v1319_v59 = vcvt.f32.s32 %v1318_v11  ;;  %v3334_v11 = vld [vmem:[%s3541_s8 + $0x8] sm:$0xff] }
 0x351   : > { %1459 = vst.msk [vmem:[%s4414_s20 + $0xb8] sm:$0xff] %vm1435_vm12, %v1306_v46  ;;  %vm1515_vm7 = vcmp.eq.s32.totalorder %v3869_v21, %v1306_v46  ;;  %vm1514_vm8 = vcmp.eq.s32.totalorder %v3866_v47, %v1306_v46 }
 0x352   : > { %v1322_v45 = vadd.s32 %v1321_v3, %v1319_v59  ;;  %vm2922_vm9 = vmpackc.low %vm1515_vm7, %vm1513_vm6 }
 0x353   : > { %2923 = vmatprep.mubr.msk.bf16.mxu1 %vm2922_vm9, %v3430_v50  ;;  %3003 = vmatprep.mubr.msk.bf16.mxu0 %vm2922_vm9, %v3430_v50  ;;  %vm2924_vm11 = vmpackc.low %vm1514_vm8, %vm1512_vm10 }
 0x354   : > { %1460 = vst.msk [vmem:[%s4414_s20 + $0xc0] sm:$0xff] %vm1435_vm12, %v1322_v45  ;;  %v1334_v55 = vpop.xlane.xlu1 %1333  ;;  %2925 = vmatmul.mubr.msk.bf16.gmra.mrb[76].mxu1 %vm2924_vm11, %v3430_v50  ;;  %3005 = vmatmul.mubr.msk.bf16.gmra.mrb[76].mxu0 %vm2924_vm11, %v3430_v50  ;;  %vm1517_vm13 = vcmp.eq.s32.totalorder %v3869_v21, %v1322_v45  ;;  %vm1516_vm2 = vcmp.eq.s32.totalorder %v3866_v47, %v1322_v45 }
 0x355   : > { %v1335_v26 = vcvt.f32.s32 %v1334_v55 }
 0x357   : > { %v1338_v8 = vadd.s32 %v1337_v32, %v1335_v26  ;;  %v1350_v52 = vpop.xlane.xlu0 %1349 }
 0x358   : > { %v1351_v5 = vcvt.f32.s32 %v1350_v52 }
 0x359   : > { %1461 = vst.msk [vmem:[%s4414_s20 + $0xc8] sm:$0xff] %vm1435_vm12, %v1338_v8  ;;  %vm1519_vm14 = vcmp.eq.s32.totalorder %v3869_v21, %v1338_v8  ;;  %vm1518_vm15 = vcmp.eq.s32.totalorder %v3866_v47, %v1338_v8 }
 0x35a   : > { %v1354_v12 = vadd.s32 %v1353_v24, %v1351_v5  ;;  %vm2926_vm1 = vmpackc.low %vm1519_vm14, %vm1517_vm13 }
 0x35b   : > { %2927 = vmatprep.mubr.msk.bf16.mxu1 %vm2926_vm1, %v3430_v50  ;;  %3007 = vmatprep.mubr.msk.bf16.mxu0 %vm2926_vm1, %v3430_v50  ;;  %vm2928_vm3 = vmpackc.low %vm1518_vm15, %vm1516_vm2 }
 0x35c   : > { %1462 = vst.msk [vmem:[%s4414_s20 + $0xd0] sm:$0xff] %vm1435_vm12, %v1354_v12  ;;  %v1366_v4 = vpop.xlane.xlu1 %1365  ;;  %2929 = vmatmul.mubr.msk.bf16.gmra.mrb[80].mxu1 %vm2928_vm3, %v3430_v50  ;;  %3009 = vmatmul.mubr.msk.bf16.gmra.mrb[80].mxu0 %vm2928_vm3, %v3430_v50  ;;  %vm1521_vm4 = vcmp.eq.s32.totalorder %v3869_v21, %v1354_v12  ;;  %vm1520_vm8 = vcmp.eq.s32.totalorder %v3866_v47, %v1354_v12 }
 0x35d   : > { %v1367_v42 = vcvt.f32.s32 %v1366_v4 }
 0x35f   : > { %v1370_v6 = vadd.s32 %v1369_v56, %v1367_v42  ;;  %v1382_v1 = vpop.xlane.xlu0 %1381 }
 0x360   : > { %v1383_v60 = vcvt.f32.s32 %v1382_v1 }
 0x361   : > { %1463 = vst.msk [vmem:[%s4414_s20 + $0xd8] sm:$0xff] %vm1435_vm12, %v1370_v6  ;;  %vm1523_vm5 = vcmp.eq.s32.totalorder %v3869_v21, %v1370_v6  ;;  %vm1522_vm6 = vcmp.eq.s32.totalorder %v3866_v47, %v1370_v6 }
 0x362   : > { %v1386_v63 = vadd.s32 %v1385_v38, %v1383_v60  ;;  %vm2930_vm7 = vmpackc.low %vm1523_vm5, %vm1521_vm4 }
 0x363   : > { %2931 = vmatprep.mubr.msk.bf16.mxu1 %vm2930_vm7, %v3430_v50  ;;  %3011 = vmatprep.mubr.msk.bf16.mxu0 %vm2930_vm7, %v3430_v50  ;;  %vm2932_vm9 = vmpackc.low %vm1522_vm6, %vm1520_vm8 }
 0x364   : > { %1464 = vst.msk [vmem:[%s4414_s20 + $0xe0] sm:$0xff] %vm1435_vm12, %v1386_v63  ;;  %v1398_v23 = vpop.xlane.xlu1 %1397  ;;  %2933 = vmatmul.mubr.msk.bf16.gmra.mrb[84].mxu1 %vm2932_vm9, %v3430_v50  ;;  %3013 = vmatmul.mubr.msk.bf16.gmra.mrb[84].mxu0 %vm2932_vm9, %v3430_v50  ;;  %vm1525_vm10 = vcmp.eq.s32.totalorder %v3869_v21, %v1386_v63  ;;  %vm1524_vm15 = vcmp.eq.s32.totalorder %v3866_v47, %v1386_v63 }
 0x365   : > { %v1399_v14 = vcvt.f32.s32 %v1398_v23 }
 0x367   : > { %v1402_v27 = vadd.s32 %v1401_v20, %v1399_v14  ;;  %v1414_v33 = vpop.xlane.xlu0 %1413 }
 0x368   : > { %v1415_v51 = vcvt.f32.s32 %v1414_v33 }
 0x369   : > { %1465 = vst.msk [vmem:[%s4414_s20 + $0xe8] sm:$0xff] %vm1435_vm12, %v1402_v27  ;;  %vm1527_vm11 = vcmp.eq.s32.totalorder %v3869_v21, %v1402_v27  ;;  %vm1526_vm13 = vcmp.eq.s32.totalorder %v3866_v47, %v1402_v27  ;;  %v3336_v27 = vld [vmem:[%s3541_s8 + $0x18] sm:$0xff] }
 0x36a   : > { %v1418_v25 = vadd.s32 %v1417_v58, %v1415_v51  ;;  %vm2934_vm14 = vmpackc.low %vm1527_vm11, %vm1525_vm10 }
 0x36b   : > { %2935 = vmatprep.mubr.msk.bf16.mxu1 %vm2934_vm14, %v3430_v50  ;;  %3015 = vmatprep.mubr.msk.bf16.mxu0 %vm2934_vm14, %v3430_v50  ;;  %vm2936_vm1 = vmpackc.low %vm1526_vm13, %vm1524_vm15 }
 0x36c   : > { %1466 = vst.msk [vmem:[%s4414_s20 + $0xf0] sm:$0xff] %vm1435_vm12, %v1418_v25  ;;  %v1430_v34 = vpop.xlane.xlu1 %1429  ;;  %2937 = vmatmul.mubr.msk.bf16.gmra.mrb[88].mxu1 %vm2936_vm1, %v3430_v50  ;;  %3017 = vmatmul.mubr.msk.bf16.gmra.mrb[88].mxu0 %vm2936_vm1, %v3430_v50  ;;  %vm1529_vm2 = vcmp.eq.s32.totalorder %v3869_v21, %v1418_v25  ;;  %vm1528_vm6 = vcmp.eq.s32.totalorder %v3866_v47, %v1418_v25 }
 0x36d   : > { %v1431_v48 = vcvt.f32.s32 %v1430_v34 }
 0x36f   : > { %v1434_v53 = vadd.s32 %v1433_v30, %v1431_v48 }
 0x371   : > { %1467 = vst.msk [vmem:[%s4414_s20 + $0xf8] sm:$0xff] %vm1435_vm12, %v1434_v53  ;;  %vm1531_vm3 = vcmp.eq.s32.totalorder %v3869_v21, %v1434_v53  ;;  %vm1530_vm4 = vcmp.eq.s32.totalorder %v3866_v47, %v1434_v53  ;;  %v5036_v21 = vld [vmem:[#allocation5_spill] sm:$0xff]  ;;  %s3369_s20 = sshll.u32 %s3431_s28, 4  ;;  %s3370_s20 = int_to_ptr.vmem [resolvable:$false] %s3369_s20 }
 0x372   : > { %vm2938_vm5 = vmpackc.low %vm1531_vm3, %vm1529_vm2  ;;  %v2336_v9 = vadd.s32 8, %v5036_v21  ;;  %v2369_v36 = vadd.s32 %v4706_v57, %v5036_v21  ;;  %v2337_v39 = vadd.s32 16, %v5036_v21  ;;  %v2338_v61 = vadd.s32 24, %v5036_v21  ;;  %s3371_s21 = scalar_lea.vmem %s3370_s20, 32  ;;  %p3372_p0 = scmp.lt.s32.totalorder %s4913_s15, %s3370_s20 }
 0x373   : > { %2939 = vmatprep.mubr.msk.bf16.mxu1 %vm2938_vm5, %v3430_v50  ;;  %3019 = vmatprep.mubr.msk.bf16.mxu0 %vm2938_vm5, %v3430_v50  ;;  %vm2940_vm7 = vmpackc.low %vm1530_vm4, %vm1528_vm6  ;;  %v2339_v38 = vadd.s32 32, %v5036_v21  ;;  %v2340_v20 = vadd.s32 40, %v5036_v21  ;;  %p3373_p1 = scmp.lt.s32.totalorder %s3371_s21, %s3365_s19 }
 0x374   : > { %2941 = vmatmul.mubr.msk.bf16.gmra.mrb[92].mxu1 %vm2940_vm7, %v3430_v50  ;;  %3021 = vmatmul.mubr.msk.bf16.gmra.mrb[92].mxu0 %vm2940_vm7, %v3430_v50  ;;  %v2370_v18 = vadd.s32 %v4706_v57, %v2336_v9  ;;  %vm2401_vm12 = vcmp.lt.s32.totalorder %v2369_v36, 480  ;;  %v2371_v32 = vadd.s32 %v4706_v57, %v2337_v39  ;;  %v2372_v4 = vadd.s32 %v4706_v57, %v2338_v61 }
 0x375   : > { %v2373_v30 = vadd.s32 %v4706_v57, %v2339_v38  ;;  %v3339_v38 = vld [vmem:[%s3541_s8 + $0x30] sm:$0xff]  ;;  %p3374_p2 = por %p3373_p1, %p3372_p0 }
 0x376   : > { %vm2402_vm8 = vcmp.lt.s32.totalorder %v2370_v18, 480  ;;  %vm2403_vm9 = vcmp.lt.s32.totalorder %v2371_v32, 480  ;;  %vm2404_vm10 = vcmp.lt.s32.totalorder %v2372_v4, 480 }
 0x377   : > { %vm2405_vm11 = vcmp.lt.s32.totalorder %v2373_v30, 480  ;;  %p3375_p3 = pnand %p3374_p2, %p3368_p13 }
 0x38b   : > { %v3042_v31 = vpop.f32.mrb[32].mxu1  ;;  %v3154_v10 = vpop.f32.mrb[32].mxu0 }
 0x38c   : > { %v3043_v17 = vpop.f32.mrb[33].mxu1  ;;  %v3155_v47 = vpop.f32.mrb[33].mxu0 }
 0x38d   : > { %v3044_v49 = vadd.f32 %v3043_v17, %v3042_v31  ;;  %v3045_v29 = vpop.f32.mrb[34].mxu1  ;;  %v3156_v54 = vadd.f32 %v3155_v47, %v3154_v10  ;;  %v3157_v41 = vpop.f32.mrb[34].mxu0 }
 0x38e   : > { %v3046_v40 = vpop.f32.mrb[35].mxu1  ;;  %v3158_v44 = vpop.f32.mrb[35].mxu0 }
 0x38f   : > { %v3047_v50 = vadd.f32 %v3046_v40, %v3045_v29  ;;  %v2144_v7 = vadd.f32 %v3156_v54, %v3044_v49  ;;  %v3159_v13 = vadd.f32 %v3158_v44, %v3157_v41  ;;  %v2374_v29 = vadd.s32 %v4706_v57, %v2340_v20  ;;  %v3340_v20 = vld [vmem:[%s3541_s8 + $0x38] sm:$0xff] }
 0x390   : > { %v2341_v44 = vadd.s32 48, %v5036_v21 }
 0x391   : > { %2270 = vst.msk [vmem:[%s4715_s9] sm:$0xff] %vm379_vm0, %v2144_v7  ;;  %v2302_v2 = vsub.f32 %v2144_v7, %v3333_v62  ;;  %v2147_v16 = vadd.f32 %v3159_v13, %v3047_v50  ;;  %v3337_v7 = vld [vmem:[%s3541_s8 + $0x20] sm:$0xff]  ;;  %vm2406_vm13 = vcmp.lt.s32.totalorder %v2374_v29, 480 }
 0x393   : > { %v3048_v22 = vpop.f32.mrb[36].mxu1  ;;  %v2497_v46 = vsel %vm2401_vm12, %v2302_v2, 0.0  ;;  %2271 = vst.msk [vmem:[%s4715_s9 + $0x8] sm:$0xff] %vm379_vm0, %v2147_v16  ;;  %v2303_v3 = vsub.f32 %v2147_v16, %v3334_v11  ;;  %v3160_v59 = vpop.f32.mrb[36].mxu0  ;;  %v2342_v2 = vadd.s32 56, %v5036_v21 }
 0x394   : > { %v3049_v43 = vpop.f32.mrb[37].mxu1  ;;  %v2529_v45 = vmul.f32 %v2497_v46, %v2497_v46  ;;  %v3161_v55 = vpop.f32.mrb[37].mxu0 }
 0x395   : > { %v3050_v37 = vadd.f32 %v3049_v43, %v3048_v22  ;;  %v3051_v26 = vpop.f32.mrb[38].mxu1  ;;  %v2498_v8 = vsel %vm2402_vm8, %v2303_v3, 0.0  ;;  %v3162_v52 = vadd.f32 %v3161_v55, %v3160_v59  ;;  %v3163_v24 = vpop.f32.mrb[38].mxu0  ;;  %v3338_v22 = vld [vmem:[%s3541_s8 + $0x28] sm:$0xff] }
 0x396   : > { %v3052_v5 = vpop.f32.mrb[39].mxu1  ;;  %v2530_v19 = vmul.f32 %v2498_v8, %v2498_v8  ;;  %v3164_v15 = vpop.f32.mrb[39].mxu0  ;;  %v2561_v6 = vsel %vm379_vm0, %v2529_v45, 0.0  ;;  %v2375_v45 = vadd.s32 %v4706_v57, %v2341_v44  ;;  %v3341_v44 = vld [vmem:[%s3541_s8 + $0x40] sm:$0xff] }
 0x397   : > { %v3053_v12 = vadd.f32 %v3052_v5, %v3051_v26  ;;  %v2152_v56 = vadd.f32 %v3162_v52, %v3050_v37  ;;  %v3165_v42 = vadd.f32 %v3164_v15, %v3163_v24 }
 0x398   : > { %v2562_v1 = vsel %vm379_vm0, %v2530_v19, 0.0  ;;  %vm2407_vm14 = vcmp.lt.s32.totalorder %v2375_v45, 480 }
 0x399   : > { %v2563_v60 = vadd.f32 %v2562_v1, %v2561_v6  ;;  %2272 = vst.msk [vmem:[%s4715_s9 + $0x10] sm:$0xff] %vm379_vm0, %v2152_v56  ;;  %v2304_v63 = vsub.f32 %v2152_v56, %v3335_v28  ;;  %v2155_v35 = vadd.f32 %v3165_v42, %v3053_v12  ;;  %v2376_v12 = vadd.s32 %v4706_v57, %v2342_v2  ;;  %v3342_v2 = vld [vmem:[%s3541_s8 + $0x48] sm:$0xff] }
 0x39a   : > { %v2343_v6 = vadd.s32 64, %v5036_v21 }
 0x39b   : > { %v3054_v23 = vpop.f32.mrb[40].mxu1  ;;  %v2499_v14 = vsel %vm2403_vm9, %v2304_v63, 0.0  ;;  %2273 = vst.msk [vmem:[%s4715_s9 + $0x18] sm:$0xff] %vm379_vm0, %v2155_v35  ;;  %v2305_v33 = vsub.f32 %v2155_v35, %v3336_v27  ;;  %v3166_v58 = vpop.f32.mrb[40].mxu0  ;;  %vm2408_vm15 = vcmp.lt.s32.totalorder %v2376_v12, 480  ;;  %v2344_v35 = vadd.s32 72, %v5036_v21 }
 0x39c   : > { %v3055_v51 = vpop.f32.mrb[41].mxu1  ;;  %v2531_v0 = vmul.f32 %v2499_v14, %v2499_v14  ;;  %v3167_v34 = vpop.f32.mrb[41].mxu0 }
 0x39d   : > { %v3056_v25 = vadd.f32 %v3055_v51, %v3054_v23  ;;  %v3057_v48 = vpop.f32.mrb[42].mxu1  ;;  %v2500_v53 = vsel %vm2404_vm10, %v2305_v33, 0.0  ;;  %v3168_v31 = vadd.f32 %v3167_v34, %v3166_v58  ;;  %v3169_v9 = vpop.f32.mrb[42].mxu0 }
 0x39e   : > { %v3058_v10 = vpop.f32.mrb[43].mxu1  ;;  %v2564_v17 = vsel %vm379_vm0, %v2531_v0, 0.0  ;;  %v2532_v49 = vmul.f32 %v2500_v53, %v2500_v53  ;;  %v3170_v36 = vpop.f32.mrb[43].mxu0 }
 0x39f   : > { %v3059_v47 = vadd.f32 %v3058_v10, %v3057_v48  ;;  %v2565_v54 = vadd.f32 %v2564_v17, %v2563_v60  ;;  %v2160_v41 = vadd.f32 %v3168_v31, %v3056_v25  ;;  %v3171_v40 = vadd.f32 %v3170_v36, %v3169_v9 }
 0x3a0   : > { %v2566_v50 = vsel %vm379_vm0, %v2532_v49, 0.0  ;;  %v2377_v25 = vadd.s32 %v4706_v57, %v2343_v6  ;;  %v3343_v6 = vld [vmem:[%s3541_s8 + $0x50] sm:$0xff] }
 0x3a1   : > { %v2567_v18 = vadd.f32 %v2566_v50, %v2565_v54  ;;  %2274 = vst.msk [vmem:[%s4715_s9 + $0x20] sm:$0xff] %vm379_vm0, %v2160_v41  ;;  %v2306_v13 = vsub.f32 %v2160_v41, %v3337_v7  ;;  %v2163_v39 = vadd.f32 %v3171_v40, %v3059_v47  ;;  %v2378_v47 = vadd.s32 %v4706_v57, %v2344_v35  ;;  %v3344_v35 = vld [vmem:[%s3541_s8 + $0x58] sm:$0xff] }
 0x3a2   : > { %vm2409_vm1 = vcmp.lt.s32.totalorder %v2377_v25, 480  ;;  %v2345_v40 = vadd.s32 80, %v5036_v21 }
 0x3a3   : > { %v3060_v62 = vpop.f32.mrb[44].mxu1  ;;  %v2501_v16 = vsel %vm2405_vm11, %v2306_v13, 0.0  ;;  %2275 = vst.msk [vmem:[%s4715_s9 + $0x28] sm:$0xff] %vm379_vm0, %v2163_v39  ;;  %v2307_v61 = vsub.f32 %v2163_v39, %v3338_v22  ;;  %v3172_v46 = vpop.f32.mrb[44].mxu0  ;;  %vm2410_vm2 = vcmp.lt.s32.totalorder %v2378_v47, 480  ;;  %v2346_v39 = vadd.s32 88, %v5036_v21 }
 0x3a4   : > { %v3061_v11 = vpop.f32.mrb[45].mxu1  ;;  %v2533_v3 = vmul.f32 %v2501_v16, %v2501_v16  ;;  %v3173_v43 = vpop.f32.mrb[45].mxu0 }
 0x3a5   : > { %v3062_v59 = vadd.f32 %v3061_v11, %v3060_v62  ;;  %v3063_v37 = vpop.f32.mrb[46].mxu1  ;;  %v2502_v55 = vsel %vm2406_vm13, %v2307_v61, 0.0  ;;  %v3174_v32 = vadd.f32 %v3173_v43, %v3172_v46  ;;  %v3175_v26 = vpop.f32.mrb[46].mxu0 }
 0x3a6   : > { %v3064_v8 = vpop.f32.mrb[47].mxu1  ;;  %v2568_v52 = vsel %vm379_vm0, %v2533_v3, 0.0  ;;  %v2534_v24 = vmul.f32 %v2502_v55, %v2502_v55  ;;  %v3176_v19 = vpop.f32.mrb[47].mxu0 }
 0x3a7   : > { %v3065_v5 = vadd.f32 %v3064_v8, %v3063_v37  ;;  %v2569_v15 = vadd.f32 %v2568_v52, %v2567_v18  ;;  %v2168_v4 = vadd.f32 %v3174_v32, %v3062_v59  ;;  %v3177_v56 = vadd.f32 %v3176_v19, %v3175_v26 }
 0x3a8   : > { %v2570_v42 = vsel %vm379_vm0, %v2534_v24, 0.0  ;;  %v2379_v59 = vadd.s32 %v4706_v57, %v2345_v40  ;;  %v3345_v40 = vld [vmem:[%s3541_s8 + $0x60] sm:$0xff] }
 0x3a9   : > { %v2571_v1 = vadd.f32 %v2570_v42, %v2569_v15  ;;  %2276 = vst.msk [vmem:[%s4715_s9 + $0x30] sm:$0xff] %vm379_vm0, %v2168_v4  ;;  %v2308_v60 = vsub.f32 %v2168_v4, %v3339_v38  ;;  %v2171_v28 = vadd.f32 %v3177_v56, %v3065_v5  ;;  %v2380_v5 = vadd.s32 %v4706_v57, %v2346_v39  ;;  %v3346_v39 = vld [vmem:[%s3541_s8 + $0x68] sm:$0xff] }
 0x3aa   : > { %vm2411_vm3 = vcmp.lt.s32.totalorder %v2379_v59, 480  ;;  %v2347_v56 = vadd.s32 96, %v5036_v21 }
 0x3ab   : > { %v3066_v63 = vpop.f32.mrb[48].mxu1  ;;  %v2503_v23 = vsel %vm2407_vm14, %v2308_v60, 0.0  ;;  %2277 = vst.msk [vmem:[%s4715_s9 + $0x38] sm:$0xff] %vm379_vm0, %v2171_v28  ;;  %v2309_v14 = vsub.f32 %v2171_v28, %v3340_v20  ;;  %v3178_v27 = vpop.f32.mrb[48].mxu0  ;;  %vm2412_vm4 = vcmp.lt.s32.totalorder %v2380_v5, 480  ;;  %v2348_v28 = vadd.s32 104, %v5036_v21 }
 0x3ac   : > { %v3067_v33 = vpop.f32.mrb[49].mxu1  ;;  %v2535_v58 = vmul.f32 %v2503_v23, %v2503_v23  ;;  %v3179_v0 = vpop.f32.mrb[49].mxu0 }
 0x3ad   : > { %v3068_v51 = vadd.f32 %v3067_v33, %v3066_v63  ;;  %v3069_v34 = vpop.f32.mrb[50].mxu1  ;;  %v2504_v30 = vsel %vm2408_vm15, %v2309_v14, 0.0  ;;  %v3180_v48 = vadd.f32 %v3179_v0, %v3178_v27  ;;  %v3181_v53 = vpop.f32.mrb[50].mxu0 }
 0x3ae   : > { %v3070_v31 = vpop.f32.mrb[51].mxu1  ;;  %v2572_v9 = vsel %vm379_vm0, %v2535_v58, 0.0  ;;  %v2536_v10 = vmul.f32 %v2504_v30, %v2504_v30  ;;  %v3182_v49 = vpop.f32.mrb[51].mxu0 }
 0x3af   : > { %v3071_v17 = vadd.f32 %v3070_v31, %v3069_v34  ;;  %v2573_v36 = vadd.f32 %v2572_v9, %v2571_v1  ;;  %v2176_v29 = vadd.f32 %v3180_v48, %v3068_v51  ;;  %v3183_v54 = vadd.f32 %v3182_v49, %v3181_v53 }
 0x3b0   : > { %v2574_v41 = vsel %vm379_vm0, %v2536_v10, 0.0  ;;  %v2381_v51 = vadd.s32 %v4706_v57, %v2347_v56  ;;  %v3347_v56 = vld [vmem:[%s3541_s8 + $0x70] sm:$0xff] }
 0x3b1   : > { %v2575_v50 = vadd.f32 %v2574_v41, %v2573_v36  ;;  %2278 = vst.msk [vmem:[%s4715_s9 + $0x40] sm:$0xff] %vm379_vm0, %v2176_v29  ;;  %v2310_v18 = vsub.f32 %v2176_v29, %v3341_v44  ;;  %v2179_v7 = vadd.f32 %v3183_v54, %v3071_v17  ;;  %v2382_v17 = vadd.s32 %v4706_v57, %v2348_v28  ;;  %v3348_v28 = vld [vmem:[%s3541_s8 + $0x78] sm:$0xff] }
 0x3b2   : > { %vm2413_vm5 = vcmp.lt.s32.totalorder %v2381_v51, 480  ;;  %v2349_v54 = vadd.s32 112, %v5036_v21 }
 0x3b3   : > { %v3072_v13 = vpop.f32.mrb[52].mxu1  ;;  %v2505_v62 = vsel %vm2409_vm1, %v2310_v18, 0.0  ;;  %2279 = vst.msk [vmem:[%s4715_s9 + $0x48] sm:$0xff] %vm379_vm0, %v2179_v7  ;;  %v2311_v16 = vsub.f32 %v2179_v7, %v3342_v2  ;;  %v3184_v22 = vpop.f32.mrb[52].mxu0  ;;  %vm2414_vm6 = vcmp.lt.s32.totalorder %v2382_v17, 480  ;;  %v2350_v7 = vadd.s32 120, %v5036_v21 }
 0x3b4   : > { %v3073_v61 = vpop.f32.mrb[53].mxu1  ;;  %v2537_v46 = vmul.f32 %v2505_v62, %v2505_v62  ;;  %v3185_v3 = vpop.f32.mrb[53].mxu0 }
 0x3b5   : > { %v3074_v11 = vadd.f32 %v3073_v61, %v3072_v13  ;;  %v3075_v43 = vpop.f32.mrb[54].mxu1  ;;  %v2506_v45 = vsel %vm2410_vm2, %v2311_v16, 0.0  ;;  %v3186_v37 = vadd.f32 %v3185_v3, %v3184_v22  ;;  %v3187_v55 = vpop.f32.mrb[54].mxu0 }
 0x3b6   : > { %v3076_v32 = vpop.f32.mrb[55].mxu1  ;;  %v2576_v26 = vsel %vm379_vm0, %v2537_v46, 0.0  ;;  %v2538_v8 = vmul.f32 %v2506_v45, %v2506_v45  ;;  %v3188_v24 = vpop.f32.mrb[55].mxu0 }
 0x3b7   : > { %v3077_v52 = vadd.f32 %v3076_v32, %v3075_v43  ;;  %v2577_v19 = vadd.f32 %v2576_v26, %v2575_v50  ;;  %v2184_v12 = vadd.f32 %v3186_v37, %v3074_v11  ;;  %v3189_v15 = vadd.f32 %v3188_v24, %v3187_v55 }
 0x3b8   : > { %v2578_v4 = vsel %vm379_vm0, %v2538_v8, 0.0  ;;  %v2383_v11 = vadd.s32 %v4706_v57, %v2349_v54  ;;  %v3349_v54 = vld [vmem:[%s3541_s8 + $0x80] sm:$0xff] }
 0x3b9   : > { %v2579_v42 = vadd.f32 %v2578_v4, %v2577_v19  ;;  %2280 = vst.msk [vmem:[%s4715_s9 + $0x50] sm:$0xff] %vm379_vm0, %v2184_v12  ;;  %v2312_v1 = vsub.f32 %v2184_v12, %v3343_v6  ;;  %v2187_v38 = vadd.f32 %v3189_v15, %v3077_v52  ;;  %v2384_v52 = vadd.s32 %v4706_v57, %v2350_v7  ;;  %v3350_v7 = vld [vmem:[%s3541_s8 + $0x88] sm:$0xff] }
 0x3ba   : > { %vm2415_vm7 = vcmp.lt.s32.totalorder %v2383_v11, 480  ;;  %v2351_v15 = vadd.s32 128, %v5036_v21 }
 0x3bb   : > { %v3078_v60 = vpop.f32.mrb[56].mxu1  ;;  %v2507_v63 = vsel %vm2411_vm3, %v2312_v1, 0.0  ;;  %2281 = vst.msk [vmem:[%s4715_s9 + $0x58] sm:$0xff] %vm379_vm0, %v2187_v38  ;;  %v2313_v23 = vsub.f32 %v2187_v38, %v3344_v35  ;;  %v3190_v20 = vpop.f32.mrb[56].mxu0  ;;  %vm2416_vm12 = vcmp.lt.s32.totalorder %v2384_v52, 480  ;;  %v2352_v38 = vadd.s32 136, %v5036_v21 }
 0x3bc   : > { %v3079_v14 = vpop.f32.mrb[57].mxu1  ;;  %v2539_v27 = vmul.f32 %v2507_v63, %v2507_v63  ;;  %v3191_v58 = vpop.f32.mrb[57].mxu0 }
 0x3bd   : > { %v3080_v33 = vadd.f32 %v3079_v14, %v3078_v60  ;;  %v3081_v0 = vpop.f32.mrb[58].mxu1  ;;  %v2508_v25 = vsel %vm2412_vm4, %v2313_v23, 0.0  ;;  %v3192_v34 = vadd.f32 %v3191_v58, %v3190_v20  ;;  %v3193_v30 = vpop.f32.mrb[58].mxu0 }
 0x3be   : > { %v3082_v48 = vpop.f32.mrb[59].mxu1  ;;  %v2580_v53 = vsel %vm379_vm0, %v2539_v27, 0.0  ;;  %v2540_v31 = vmul.f32 %v2508_v25, %v2508_v25  ;;  %v3194_v10 = vpop.f32.mrb[59].mxu0 }
 0x3bf   : > { %v3083_v9 = vadd.f32 %v3082_v48, %v3081_v0  ;;  %v2581_v49 = vadd.f32 %v2580_v53, %v2579_v42  ;;  %v2192_v47 = vadd.f32 %v3192_v34, %v3080_v33  ;;  %v3195_v36 = vadd.f32 %v3194_v10, %v3193_v30 }
 0x3c0   : > { %v2582_v29 = vsel %vm379_vm0, %v2540_v31, 0.0  ;;  %v2385_v33 = vadd.s32 %v4706_v57, %v2351_v15 }
 0x3c1   : > { %v2583_v41 = vadd.f32 %v2582_v29, %v2581_v49  ;;  %2282 = vst.msk [vmem:[%s4715_s9 + $0x60] sm:$0xff] %vm379_vm0, %v2192_v47  ;;  %v2314_v50 = vsub.f32 %v2192_v47, %v3345_v40  ;;  %v2195_v44 = vadd.f32 %v3195_v36, %v3083_v9  ;;  %v2386_v9 = vadd.s32 %v4706_v57, %v2352_v38 }
 0x3c2   : > { %vm2417_vm8 = vcmp.lt.s32.totalorder %v2385_v33, 480  ;;  %v2353_v36 = vadd.s32 144, %v5036_v21 }
 0x3c3   : > { %v3084_v18 = vpop.f32.mrb[60].mxu1  ;;  %v2509_v13 = vsel %vm2413_vm5, %v2314_v50, 0.0  ;;  %2283 = vst.msk [vmem:[%s4715_s9 + $0x68] sm:$0xff] %vm379_vm0, %v2195_v44  ;;  %v2315_v62 = vsub.f32 %v2195_v44, %v3346_v39  ;;  %v3196_v2 = vpop.f32.mrb[60].mxu0  ;;  %vm2418_vm9 = vcmp.lt.s32.totalorder %v2386_v9, 480  ;;  %v2354_v44 = vadd.s32 152, %v5036_v21 }
 0x3c4   : > { %v3085_v16 = vpop.f32.mrb[61].mxu1  ;;  %v2541_v22 = vmul.f32 %v2509_v13, %v2509_v13  ;;  %v3197_v46 = vpop.f32.mrb[61].mxu0 }
 0x3c5   : > { %v3086_v61 = vadd.f32 %v3085_v16, %v3084_v18  ;;  %v3087_v3 = vpop.f32.mrb[62].mxu1  ;;  %v2510_v59 = vsel %vm2414_vm6, %v2315_v62, 0.0  ;;  %v3198_v43 = vadd.f32 %v3197_v46, %v3196_v2  ;;  %v3199_v45 = vpop.f32.mrb[62].mxu0 }
 0x3c6   : > { %v3088_v37 = vpop.f32.mrb[63].mxu1  ;;  %v2584_v55 = vsel %vm379_vm0, %v2541_v22, 0.0  ;;  %v2542_v32 = vmul.f32 %v2510_v59, %v2510_v59  ;;  %v3200_v8 = vpop.f32.mrb[63].mxu0 }
 0x3c7   : > { %v3089_v26 = vadd.f32 %v3088_v37, %v3087_v3  ;;  %v2585_v24 = vadd.f32 %v2584_v55, %v2583_v41  ;;  %v2200_v5 = vadd.f32 %v3198_v43, %v3086_v61  ;;  %v3201_v19 = vadd.f32 %v3200_v8, %v3199_v45 }
 0x3c8   : > { %v2586_v12 = vsel %vm379_vm0, %v2542_v32, 0.0  ;;  %v2387_v61 = vadd.s32 %v4706_v57, %v2353_v36  ;;  %v3353_v36 = vld [vmem:[%s3541_s8 + $0xa0] sm:$0xff] }
 0x3c9   : > { %v2587_v4 = vadd.f32 %v2586_v12, %v2585_v24  ;;  %2284 = vst.msk [vmem:[%s4715_s9 + $0x70] sm:$0xff] %vm379_vm0, %v2200_v5  ;;  %v2316_v42 = vsub.f32 %v2200_v5, %v3347_v56  ;;  %v2203_v6 = vadd.f32 %v3201_v19, %v3089_v26  ;;  %v2388_v26 = vadd.s32 %v4706_v57, %v2354_v44  ;;  %v3351_v12 = vld [vmem:[%s3541_s8 + $0x90] sm:$0xff] }
 0x3ca   : > { %vm2419_vm10 = vcmp.lt.s32.totalorder %v2387_v61, 480 }
 0x3cb   : > { %v3090_v1 = vpop.f32.mrb[64].mxu1  ;;  %v2511_v60 = vsel %vm2415_vm7, %v2316_v42, 0.0  ;;  %2285 = vst.msk [vmem:[%s4715_s9 + $0x78] sm:$0xff] %vm379_vm0, %v2203_v6  ;;  %v2317_v63 = vsub.f32 %v2203_v6, %v3348_v28  ;;  %v3202_v35 = vpop.f32.mrb[64].mxu0  ;;  %vm2420_vm11 = vcmp.lt.s32.totalorder %v2388_v26, 480  ;;  %v3352_v42 = vld [vmem:[%s3541_s8 + $0x98] sm:$0xff] }
 0x3cc   : > { %v3091_v23 = vpop.f32.mrb[65].mxu1  ;;  %v2543_v20 = vmul.f32 %v2511_v60, %v2511_v60  ;;  %v3203_v27 = vpop.f32.mrb[65].mxu0 }
 0x3cd   : > { %v3092_v14 = vadd.f32 %v3091_v23, %v3090_v1  ;;  %v3093_v58 = vpop.f32.mrb[66].mxu1  ;;  %v2512_v51 = vsel %vm2416_vm12, %v2317_v63, 0.0  ;;  %v3204_v0 = vadd.f32 %v3203_v27, %v3202_v35  ;;  %v3205_v25 = vpop.f32.mrb[66].mxu0 }
 0x3ce   : > { %v3094_v34 = vpop.f32.mrb[67].mxu1  ;;  %v2588_v30 = vsel %vm379_vm0, %v2543_v20, 0.0  ;;  %v2544_v48 = vmul.f32 %v2512_v51, %v2512_v51  ;;  %v3206_v31 = vpop.f32.mrb[67].mxu0  ;;  %v2355_v20 = vadd.s32 160, %v5036_v21 }
 0x3cf   : > { %v3095_v53 = vadd.f32 %v3094_v34, %v3093_v58  ;;  %v2589_v10 = vadd.f32 %v2588_v30, %v2587_v4  ;;  %v2208_v17 = vadd.f32 %v3204_v0, %v3092_v14  ;;  %v3207_v49 = vadd.f32 %v3206_v31, %v3205_v25 }
 0x3d0   : > { %v2590_v47 = vsel %vm379_vm0, %v2544_v48, 0.0  ;;  %v2356_v14 = vadd.s32 168, %v5036_v21  ;;  %v2389_v0 = vadd.s32 %v4706_v57, %v2355_v20 }
 0x3d1   : > { %v2591_v29 = vadd.f32 %v2590_v47, %v2589_v10  ;;  %2286 = vst.msk [vmem:[%s4715_s9 + $0x80] sm:$0xff] %vm379_vm0, %v2208_v17  ;;  %v2318_v41 = vsub.f32 %v2208_v17, %v3349_v54  ;;  %v2211_v40 = vadd.f32 %v3207_v49, %v3095_v53  ;;  %v2357_v47 = vadd.s32 176, %v5036_v21 }
 0x3d2   : > { %v2390_v9 = vadd.s32 %v4706_v57, %v2356_v14  ;;  %vm2421_vm13 = vcmp.lt.s32.totalorder %v2389_v0, 480 }
 0x3d3   : > { %v3096_v50 = vpop.f32.mrb[68].mxu1  ;;  %v2513_v18 = vsel %vm2417_vm8, %v2318_v41, 0.0  ;;  %2287 = vst.msk [vmem:[%s4715_s9 + $0x88] sm:$0xff] %vm379_vm0, %v2211_v40  ;;  %v2319_v13 = vsub.f32 %v2211_v40, %v3350_v7  ;;  %v3208_v39 = vpop.f32.mrb[68].mxu0  ;;  %v2358_v41 = vadd.s32 184, %v5036_v21 }
 0x3d4   : > { %v3097_v62 = vpop.f32.mrb[69].mxu1  ;;  %v2545_v2 = vmul.f32 %v2513_v18, %v2513_v18  ;;  %v3209_v22 = vpop.f32.mrb[69].mxu0  ;;  %vm2422_vm14 = vcmp.lt.s32.totalorder %v2390_v9, 480 }
 0x3d5   : > { %v3098_v16 = vadd.f32 %v3097_v62, %v3096_v50  ;;  %v3099_v46 = vpop.f32.mrb[70].mxu1  ;;  %v2514_v11 = vsel %vm2418_vm9, %v2319_v13, 0.0  ;;  %v3210_v3 = vadd.f32 %v3209_v22, %v3208_v39  ;;  %v3211_v59 = vpop.f32.mrb[70].mxu0  ;;  %v3354_v50 = vld [vmem:[%s3541_s8 + $0xa8] sm:$0xff]  ;;  %vm2630_vm9 = vcmask 253952  }
 0x3d6   : > { %v3100_v43 = vpop.f32.mrb[71].mxu1  ;;  %v2592_v45 = vsel %vm379_vm0, %v2545_v2, 0.0  ;;  %v2546_v37 = vmul.f32 %v2514_v11, %v2514_v11  ;;  %v3212_v32 = vpop.f32.mrb[71].mxu0  ;;  %v2391_v2 = vadd.s32 %v4706_v57, %v2357_v47 }
 0x3d7   : > { %v3101_v55 = vadd.f32 %v3100_v43, %v3099_v46  ;;  %v2593_v8 = vadd.f32 %v2592_v45, %v2591_v29  ;;  %v2216_v52 = vadd.f32 %v3210_v3, %v3098_v16  ;;  %v3213_v24 = vadd.f32 %v3212_v32, %v3211_v59 }
 0x3d8   : > { %v2594_v5 = vsel %vm379_vm0, %v2546_v37, 0.0  ;;  %v2392_v37 = vadd.s32 %v4706_v57, %v2358_v41  ;;  %vm2423_vm15 = vcmp.lt.s32.totalorder %v2391_v2, 480  ;;  %v3358_v41 = vld [vmem:[%s3541_s8 + $0xc8] sm:$0xff] }
 0x3d9   : > { %v2595_v19 = vadd.f32 %v2594_v5, %v2593_v8  ;;  %2288 = vst.msk [vmem:[%s4715_s9 + $0x90] sm:$0xff] %vm379_vm0, %v2216_v52  ;;  %v2320_v15 = vsub.f32 %v2216_v52, %v3351_v12  ;;  %v2219_v4 = vadd.f32 %v3213_v24, %v3101_v55  ;;  %v2359_v24 = vadd.s32 192, %v5036_v21 }
 0x3da   : > { %vm2424_vm1 = vcmp.lt.s32.totalorder %v2392_v37, 480 }
 0x3db   : > { %v2515_v56 = vsel %vm2419_vm10, %v2320_v15, 0.0  ;;  %2289 = vst.msk [vmem:[%s4715_s9 + $0x98] sm:$0xff] %vm379_vm0, %v2219_v4  ;;  %v2321_v6 = vsub.f32 %v2219_v4, %v3352_v42  ;;  %v2360_v4 = vadd.s32 200, %v5036_v21  ;;  %v3356_v42 = vld [vmem:[%s3541_s8 + $0xb8] sm:$0xff] }
 0x3dc   : > { %v2547_v1 = vmul.f32 %v2515_v56, %v2515_v56 }
 0x3dd   : > { %v2516_v38 = vsel %vm2420_vm11, %v2321_v6, 0.0 }
 0x3de   : > { %v2596_v60 = vsel %vm379_vm0, %v2547_v1, 0.0  ;;  %v2548_v28 = vmul.f32 %v2516_v38, %v2516_v38 }
 0x3df   : > { %v2597_v63 = vadd.f32 %v2596_v60, %v2595_v19  ;;  %v3355_v19 = vld [vmem:[%s3541_s8 + $0xb0] sm:$0xff] }
 0x3e0   : > { %v2598_v35 = vsel %vm379_vm0, %v2548_v28, 0.0 }
 0x3e1   : > { %v2599_v23 = vadd.f32 %v2598_v35, %v2597_v63  ;;  %v2393_v35 = vadd.s32 %v4706_v57, %v2359_v24  ;;  %v3359_v24 = vld [vmem:[%s3541_s8 + $0xd0] sm:$0xff] }
 0x3e3   : > { %vm2425_vm2 = vcmp.lt.s32.totalorder %v2393_v35, 480 }
 0x41e   : > { %v3102_v27 = vpop.f32.mrb[72].mxu1  ;;  %v3214_v33 = vpop.f32.mrb[72].mxu0 }
 0x41f   : > { %v3103_v58 = vpop.f32.mrb[73].mxu1  ;;  %v3215_v51 = vpop.f32.mrb[73].mxu0 }
 0x420   : > { %v3104_v25 = vadd.f32 %v3103_v58, %v3102_v27  ;;  %v3216_v34 = vadd.f32 %v3215_v51, %v3214_v33  ;;  %v3105_v30 = vpop.f32.mrb[74].mxu1  ;;  %v3217_v48 = vpop.f32.mrb[74].mxu0 }
 0x421   : > { %v3106_v53 = vpop.f32.mrb[75].mxu1  ;;  %v3218_v31 = vpop.f32.mrb[75].mxu0 }
 0x422   : > { %v2224_v10 = vadd.f32 %v3216_v34, %v3104_v25  ;;  %v3107_v17 = vadd.f32 %v3106_v53, %v3105_v30  ;;  %v3219_v49 = vadd.f32 %v3218_v31, %v3217_v48  ;;  %v2394_v34 = vadd.s32 %v4706_v57, %v2360_v4  ;;  %v3360_v4 = vld [vmem:[%s3541_s8 + $0xd8] sm:$0xff] }
 0x424   : > { %2290 = vst.msk [vmem:[%s4715_s9 + $0xa0] sm:$0xff] %vm379_vm0, %v2224_v10  ;;  %v2322_v29 = vsub.f32 %v2224_v10, %v3353_v36  ;;  %v2227_v54 = vadd.f32 %v3219_v49, %v3107_v17  ;;  %v2361_v10 = vadd.s32 208, %v5036_v21  ;;  %v3357_v49 = vld [vmem:[%s3541_s8 + $0xc0] sm:$0xff]  ;;  %vm2426_vm3 = vcmp.lt.s32.totalorder %v2394_v34, 480 }
 0x426   : > { %v2517_v40 = vsel %vm2421_vm13, %v2322_v29, 0.0  ;;  %2291 = vst.msk [vmem:[%s4715_s9 + $0xa8] sm:$0xff] %vm379_vm0, %v2227_v54  ;;  %v2323_v44 = vsub.f32 %v2227_v54, %v3354_v50  ;;  %v2362_v29 = vadd.s32 216, %v5036_v21 }
 0x427   : > { %v3108_v18 = vpop.f32.mrb[76].mxu1  ;;  %v3220_v7 = vpop.f32.mrb[76].mxu0  ;;  %v2549_v13 = vmul.f32 %v2517_v40, %v2517_v40 }
 0x428   : > { %v3109_v39 = vpop.f32.mrb[77].mxu1  ;;  %v3221_v62 = vpop.f32.mrb[77].mxu0  ;;  %v2518_v16 = vsel %vm2422_vm14, %v2323_v44, 0.0 }
 0x429   : > { %v3110_v22 = vadd.f32 %v3109_v39, %v3108_v18  ;;  %v3222_v61 = vadd.f32 %v3221_v62, %v3220_v7  ;;  %v3111_v46 = vpop.f32.mrb[78].mxu1  ;;  %v3223_v11 = vpop.f32.mrb[78].mxu0  ;;  %v2600_v3 = vsel %vm379_vm0, %v2549_v13, 0.0  ;;  %v2550_v59 = vmul.f32 %v2518_v16, %v2518_v16 }
 0x42a   : > { %v3112_v43 = vpop.f32.mrb[79].mxu1  ;;  %v3224_v45 = vpop.f32.mrb[79].mxu0  ;;  %v2601_v55 = vadd.f32 %v2600_v3, %v2599_v23  ;;  %v2395_v39 = vadd.s32 %v4706_v57, %v2361_v10  ;;  %v3361_v10 = vld [vmem:[%s3541_s8 + $0xe0] sm:$0xff] }
 0x42b   : > { %v2232_v32 = vadd.f32 %v3222_v61, %v3110_v22  ;;  %v3113_v26 = vadd.f32 %v3112_v43, %v3111_v46  ;;  %v3225_v8 = vadd.f32 %v3224_v45, %v3223_v11  ;;  %v2602_v52 = vsel %vm379_vm0, %v2550_v59, 0.0 }
 0x42c   : > { %v2603_v5 = vadd.f32 %v2602_v52, %v2601_v55  ;;  %v2396_v43 = vadd.s32 %v4706_v57, %v2362_v29  ;;  %vm2427_vm4 = vcmp.lt.s32.totalorder %v2395_v39, 480  ;;  %v3362_v29 = vld [vmem:[%s3541_s8 + $0xe8] sm:$0xff] }
 0x42d   : > { %2292 = vst.msk [vmem:[%s4715_s9 + $0xb0] sm:$0xff] %vm379_vm0, %v2232_v32  ;;  %v2324_v12 = vsub.f32 %v2232_v32, %v3355_v19  ;;  %v2235_v15 = vadd.f32 %v3225_v8, %v3113_v26  ;;  %v2363_v8 = vadd.s32 224, %v5036_v21 }
 0x42e   : > { %vm2428_vm5 = vcmp.lt.s32.totalorder %v2396_v43, 480 }
 0x42f   : > { %v2519_v56 = vsel %vm2423_vm15, %v2324_v12, 0.0  ;;  %2293 = vst.msk [vmem:[%s4715_s9 + $0xb8] sm:$0xff] %vm379_vm0, %v2235_v15  ;;  %v2325_v6 = vsub.f32 %v2235_v15, %v3356_v42  ;;  %v3114_v1 = vpop.f32.mrb[80].mxu1  ;;  %v3226_v38 = vpop.f32.mrb[80].mxu0  ;;  %v2364_v12 = vadd.s32 232, %v5036_v21 }
 0x430   : > { %v2551_v60 = vmul.f32 %v2519_v56, %v2519_v56  ;;  %v3115_v28 = vpop.f32.mrb[81].mxu1  ;;  %v3227_v63 = vpop.f32.mrb[81].mxu0 }
 0x431   : > { %v2520_v23 = vsel %vm2424_vm1, %v2325_v6, 0.0  ;;  %v3116_v20 = vadd.f32 %v3115_v28, %v3114_v1  ;;  %v3228_v14 = vadd.f32 %v3227_v63, %v3226_v38  ;;  %v3117_v27 = vpop.f32.mrb[82].mxu1  ;;  %v3229_v33 = vpop.f32.mrb[82].mxu0  ;;  %v2397_v28 = vadd.s32 %v4706_v57, %v2363_v8 }
 0x432   : > { %v2604_v58 = vsel %vm379_vm0, %v2551_v60, 0.0  ;;  %v2552_v51 = vmul.f32 %v2520_v23, %v2520_v23  ;;  %v3118_v0 = vpop.f32.mrb[83].mxu1  ;;  %v3230_v25 = vpop.f32.mrb[83].mxu0 }
 0x433   : > { %v2605_v30 = vadd.f32 %v2604_v58, %v2603_v5  ;;  %v2240_v48 = vadd.f32 %v3228_v14, %v3116_v20  ;;  %v3119_v53 = vadd.f32 %v3118_v0, %v3117_v27  ;;  %v3231_v31 = vadd.f32 %v3230_v25, %v3229_v33 }
 0x434   : > { %v2606_v9 = vsel %vm379_vm0, %v2552_v51, 0.0  ;;  %v2398_v0 = vadd.s32 %v4706_v57, %v2364_v12  ;;  %vm2429_vm6 = vcmp.lt.s32.totalorder %v2397_v28, 480 }
 0x435   : > { %v2607_v17 = vadd.f32 %v2606_v9, %v2605_v30  ;;  %2294 = vst.msk [vmem:[%s4715_s9 + $0xc0] sm:$0xff] %vm379_vm0, %v2240_v48  ;;  %v2326_v47 = vsub.f32 %v2240_v48, %v3357_v49  ;;  %v2243_v36 = vadd.f32 %v3231_v31, %v3119_v53  ;;  %v2365_v31 = vadd.s32 240, %v5036_v21 }
 0x436   : > { %vm2430_vm7 = vcmp.lt.s32.totalorder %v2398_v0, 480 }
 0x437   : > { %v2521_v54 = vsel %vm2425_vm2, %v2326_v47, 0.0  ;;  %2295 = vst.msk [vmem:[%s4715_s9 + $0xc8] sm:$0xff] %vm379_vm0, %v2243_v36  ;;  %v2327_v40 = vsub.f32 %v2243_v36, %v3358_v41  ;;  %v3120_v50 = vpop.f32.mrb[84].mxu1  ;;  %v3232_v44 = vpop.f32.mrb[84].mxu0  ;;  %v2366_v47 = vadd.s32 248, %v5036_v21 }
 0x438   : > { %v2553_v18 = vmul.f32 %v2521_v54, %v2521_v54  ;;  %v3121_v7 = vpop.f32.mrb[85].mxu1  ;;  %v3233_v13 = vpop.f32.mrb[85].mxu0 }
 0x439   : > { %v2522_v62 = vsel %vm2426_vm3, %v2327_v40, 0.0  ;;  %v3122_v2 = vadd.f32 %v3121_v7, %v3120_v50  ;;  %v3234_v16 = vadd.f32 %v3233_v13, %v3232_v44  ;;  %v3123_v22 = vpop.f32.mrb[86].mxu1  ;;  %v3235_v61 = vpop.f32.mrb[86].mxu0  ;;  %v2399_v7 = vadd.s32 %v4706_v57, %v2365_v31 }
 0x43a   : > { %v2608_v46 = vsel %vm379_vm0, %v2553_v18, 0.0  ;;  %v2554_v11 = vmul.f32 %v2522_v62, %v2522_v62  ;;  %v3124_v3 = vpop.f32.mrb[87].mxu1  ;;  %v3236_v59 = vpop.f32.mrb[87].mxu0 }
 0x43b   : > { %v2609_v45 = vadd.f32 %v2608_v46, %v2607_v17  ;;  %v2248_v37 = vadd.f32 %v3234_v16, %v3122_v2  ;;  %v3125_v55 = vadd.f32 %v3124_v3, %v3123_v22  ;;  %v3237_v32 = vadd.f32 %v3236_v59, %v3235_v61 }
 0x43c   : > { %v2610_v26 = vsel %vm379_vm0, %v2554_v11, 0.0  ;;  %v2400_v11 = vadd.s32 %v4706_v57, %v2366_v47  ;;  %vm2431_vm12 = vcmp.lt.s32.totalorder %v2399_v7, 480  ;;  %v3364_v57 = vld [vmem:[%s3541_s8 + $0xf8] sm:$0xff] }
 0x43d   : > { %v2611_v52 = vadd.f32 %v2610_v26, %v2609_v45  ;;  %2296 = vst.msk [vmem:[%s4715_s9 + $0xd0] sm:$0xff] %vm379_vm0, %v2248_v37  ;;  %v2328_v5 = vsub.f32 %v2248_v37, %v3359_v24  ;;  %v2251_v19 = vadd.f32 %v3237_v32, %v3125_v55  ;;  %v3363_v32 = vld [vmem:[%s3541_s8 + $0xf0] sm:$0xff] }
 0x43e   : > { %vm2432_vm8 = vcmp.lt.s32.totalorder %v2400_v11, 480 }
 0x43f   : > { %v2523_v15 = vsel %vm2427_vm4, %v2328_v5, 0.0  ;;  %2297 = vst.msk [vmem:[%s4715_s9 + $0xd8] sm:$0xff] %vm379_vm0, %v2251_v19  ;;  %v2329_v56 = vsub.f32 %v2251_v19, %v3360_v4  ;;  %v3126_v42 = vpop.f32.mrb[88].mxu1  ;;  %v3238_v6 = vpop.f32.mrb[88].mxu0 }
 0x440   : > { %v2555_v1 = vmul.f32 %v2523_v15, %v2523_v15  ;;  %v3127_v38 = vpop.f32.mrb[89].mxu1  ;;  %v3239_v60 = vpop.f32.mrb[89].mxu0 }
 0x441   : > { %v2524_v63 = vsel %vm2428_vm5, %v2329_v56, 0.0  ;;  %v3128_v35 = vadd.f32 %v3127_v38, %v3126_v42  ;;  %v3240_v23 = vadd.f32 %v3239_v60, %v3238_v6  ;;  %v3129_v20 = vpop.f32.mrb[90].mxu1  ;;  %v3241_v14 = vpop.f32.mrb[90].mxu0 }
 0x442   : > { %v2612_v27 = vsel %vm379_vm0, %v2555_v1, 0.0  ;;  %v2556_v33 = vmul.f32 %v2524_v63, %v2524_v63  ;;  %v3130_v58 = vpop.f32.mrb[91].mxu1  ;;  %v3242_v51 = vpop.f32.mrb[91].mxu0 }
 0x443   : > { %v2613_v25 = vadd.f32 %v2612_v27, %v2611_v52  ;;  %v2256_v34 = vadd.f32 %v3240_v23, %v3128_v35  ;;  %v3131_v30 = vadd.f32 %v3130_v58, %v3129_v20  ;;  %v3243_v48 = vadd.f32 %v3242_v51, %v3241_v14 }
 0x444   : > { %v2614_v53 = vsel %vm379_vm0, %v2556_v33, 0.0 }
 0x445   : > { %v2615_v9 = vadd.f32 %v2614_v53, %v2613_v25  ;;  %2298 = vst.msk [vmem:[%s4715_s9 + $0xe0] sm:$0xff] %vm379_vm0, %v2256_v34  ;;  %v2330_v17 = vsub.f32 %v2256_v34, %v3361_v10  ;;  %v2259_v49 = vadd.f32 %v3243_v48, %v3131_v30 }
 0x447   : > { %v2525_v36 = vsel %vm2429_vm6, %v2330_v17, 0.0  ;;  %2299 = vst.msk [vmem:[%s4715_s9 + $0xe8] sm:$0xff] %vm379_vm0, %v2259_v49  ;;  %v2331_v54 = vsub.f32 %v2259_v49, %v3362_v29  ;;  %v3132_v41 = vpop.f32.mrb[92].mxu1  ;;  %v3244_v40 = vpop.f32.mrb[92].mxu0 }
 0x448   : > { %v2557_v50 = vmul.f32 %v2525_v36, %v2525_v36  ;;  %v3133_v44 = vpop.f32.mrb[93].mxu1  ;;  %v3245_v18 = vpop.f32.mrb[93].mxu0 }
 0x449   : > { %v2526_v13 = vsel %vm2430_vm7, %v2331_v54, 0.0  ;;  %v3134_v39 = vadd.f32 %v3133_v44, %v3132_v41  ;;  %v3246_v62 = vadd.f32 %v3245_v18, %v3244_v40  ;;  %v3135_v2 = vpop.f32.mrb[94].mxu1  ;;  %v3247_v16 = vpop.f32.mrb[94].mxu0 }
 0x44a   : > { %v2616_v21 = vsel %vm379_vm0, %v2557_v50, 0.0  ;;  %v2558_v22 = vmul.f32 %v2526_v13, %v2526_v13  ;;  %v3136_v61 = vpop.f32.mrb[95].mxu1  ;;  %v3248_v46 = vpop.f32.mrb[95].mxu0 }
 0x44b   : > { %v2617_v3 = vadd.f32 %v2616_v21, %v2615_v9  ;;  %v2264_v59 = vadd.f32 %v3246_v62, %v3134_v39  ;;  %v3137_v43 = vadd.f32 %v3136_v61, %v3135_v2  ;;  %v3249_v45 = vadd.f32 %v3248_v46, %v3247_v16 }
 0x44c   : > { %v2618_v37 = vsel %vm379_vm0, %v2558_v22, 0.0 }
 0x44d   : > { %v2619_v55 = vadd.f32 %v2618_v37, %v2617_v3  ;;  %2300 = vst.msk [vmem:[%s4715_s9 + $0xf0] sm:$0xff] %vm379_vm0, %v2264_v59  ;;  %v2332_v26 = vsub.f32 %v2264_v59, %v3363_v32  ;;  %v2267_v8 = vadd.f32 %v3249_v45, %v3137_v43 }
 0x44f   : > { %v2527_v52 = vsel %vm2431_vm12, %v2332_v26, 0.0  ;;  %2301 = vst.msk [vmem:[%s4715_s9 + $0xf8] sm:$0xff] %vm379_vm0, %v2267_v8  ;;  %v2333_v24 = vsub.f32 %v2267_v8, %v3364_v57 }
 0x450   : > { %v2559_v5 = vmul.f32 %v2527_v52, %v2527_v52 }
 0x451   : > { %v2528_v19 = vsel %vm2432_vm8, %v2333_v24, 0.0 }
 0x452   : > { %v2620_v12 = vsel %vm379_vm0, %v2559_v5, 0.0  ;;  %v2560_v15 = vmul.f32 %v2528_v19, %v2528_v19 }
 0x453   : > { %v2621_v4 = vadd.f32 %v2620_v12, %v2619_v55 }
 0x454   : > { %v2622_v56 = vsel %vm379_vm0, %v2560_v15, 0.0 }
 0x455   : > { %v2623_v42 = vadd.f32 %v2622_v56, %v2621_v4 }
 0x457   : > { %v2624_v6 = vrot.slane %v2623_v42, 4 }
 0x459   : > { %v2625_v1 = vadd.f32 %v2624_v6, %v2623_v42 }
 0x45b   : > { %v2626_v38 = vrot.slane %v2625_v1, 2 }
 0x45d   : > { %v2627_v60 = vadd.f32 %v2626_v38, %v2625_v1 }
 0x45f   : > { %v2628_v28 = vrot.slane %v2627_v60, 1 }
 0x461   : > { %v2629_v63 = vadd.f32 %v2628_v28, %v2627_v60 }
 0x463   : > { %2631 = vst.msk [vmem:[%s286_s14] sm:$0x1] %vm2630_vm9, %v2629_v63 }
 0x464   : > { %3378 = shalt.err (!%p3375_p3)
}
 0x465   : > { %s3379_s23 = scalar_lea.hbm %s4911_s17, 16  ;;  %s3383_s22 = scalar_lea.hbm %s4960_s7, 32 }
 0x466   : > { %p3380_p4 = scmp.ne.s32.totalorder %s4911_s17, %s3379_s23  ;;  %p3384_p9 = scmp.lt.u32.totalorder %s4911_s17, %s4960_s7 }
 0x467   : > { %p3385_p10 = scmp.lt.u32.totalorder %s3383_s22, %s3379_s23  ;;  %p3387_p12 = scmp.lt.u32.totalorder %s3379_s23, %s4911_s17 }
 0x468   : > { %p3381_p7 = pnand %p3380_p4, %p3510_p5 }
 0x469   : > { %p3386_p11 = por %p3385_p10, %p3384_p9 }
 0x46a   : > { %p3382_p8 = pneg %p3381_p7 }
 0x46b   : > { %p3388_p13 = por %p3387_p12, %p3386_p11 }
 0x46d   : > { %p3389_p0 = pnand %p3388_p13, %p3382_p8 }
 0x46f   : > { %3392 = shalt.err (!%p3389_p0)
}
 0x470   : > { %3254 = dma.vmem_to_hbm [thread:$0]  (%p3510_p5), %s4913_s15, 16, %s4911_s17, %s2643_s18  }
 0x471 PF: > { %p3260_p1 = scmp.ge.s32.totalorder %s3427_s27, 2  ;;  %s2691_s8 = sand.u32 1, %s3415_s24  }
 0x472   : > { %s2692_s16 = scalar_lea.sflag [#allocation3], %s2691_s8 }
 0x473   : > { %p3257_p2 = pnand %p3260_p1, %p3514_p6 }
 0x475   : > { %3410 = dma.done.wait (!%p3257_p2), %s2692_s16, 16  }
 0x476   : > { %3412 = vsyncadd (!%p3257_p2), %s2692_s16, 4294967280  ;;  %p18_p3 = scmp.ge.s32.totalorder %s3497_s30, 4   ;;  %s5037_s24 = smov %s3419_s25 }
 0x477   : > { %s5038_s25 = smov %s3423_s26  ;;  %s5039_s26 = smov %s3508_s10 }
 0x478   : > { %s5040_s27 = smov %s3497_s30  ;;  %20 = sbr.rel (!%p18_p3) target bundleno = 3 (0x3), region = 99 }
 0x47f   :  { %2696 = vsyncpa [#allocation3], 1 }
 0x480   :  { %2698 = vsyncpa [#allocation3 + $0x1], 1 }

// kernel: tpu_custom_call.1
= control target key start
LH: loop header
LB: loop body
LE: loop exit
PB: predicated region body
PF: predicated region fallthrough
CT: control target
= control target key end

     0   :  { %13 = vsyncpa [#allocation3], 0  ;;  %s4953_s0 = inlined_call_operand.vmem [shape: f32[512,32], index: 0, kind: input, shape index: {}]   ;;  %s4954_s1 = inlined_call_operand.vmem [shape: bf16[32,256], index: 1, kind: input, shape index: {}]   ;;  %s4955_s2 = inlined_call_operand.vmem [shape: f32[1,256], index: 2, kind: input, shape index: {}]   ;;  %s4956_s3 = inlined_call_operand.vmem [shape: bf16[256,32], index: 3, kind: input, shape index: {}]   ;;  %s4957_s4 = inlined_call_operand.vmem [shape: bf16[256,32], index: 4, kind: input, shape index: {}]   ;;  %s4958_s5 = inlined_call_operand.vmem [shape: f32[512,32], index: 5, kind: output, shape index: {0}]   ;;  %s4959_s6 = inlined_call_operand.vmem [shape: s32[512,1], index: 6, kind: output, shape index: {1}]   ;;  %s4960_s7 = inlined_call_operand.hbm [shape: f32[2,1,32], index: 7, kind: output, shape index: {2}]  }
   0x1   :  { %15 = vsyncpa [#allocation3 + $0x1], 0  ;;  %s3472_s24 = smov 0   ;;  %s3474_s25 = smov 0  }
   0x2   :  { %s3476_s26 = smov 0   ;;  %s3478_s27 = smov 0  }
   0x3 LB: > { %s3493_s28 = sadd.s32 4294967295, %s3427_s27   ;;  %s2768_s29 = sadd.s32 4294967294, %s3427_s27   ;;  %s3427_s27 = sphi %s3478_s27, %s5040_s27   ;;  %s3423_s26 = sphi %s3476_s26, %s5039_s26   ;;  %s3419_s25 = sphi %s3474_s25, %s5038_s25   ;;  %s3415_s24 = sphi %s3472_s24, %s5037_s24  }
   0x4   : > { %s3497_s30 = sadd.s32 1, %s3427_s27   ;;  %s190_s8 = sadd.s32 1, %s3423_s26 }
   0x5   : > { %s187_s9 = ssub.s32 %s3427_s27, %s3497_s30  ;;  %p200_p0 = scmp.ne.s32.totalorder %s3423_s26, %s3419_s25 }
   0x6   : > { %p188_p1 = scmp.eq.s32.totalorder %s187_s9, 0  ;;  %p201_p2 = scmp.eq.s32.totalorder %s3493_s28, 1 }
   0x7   : > { %p206_p3 = scmp.ne.s32.totalorder %s3419_s25, %s3415_s24  ;;  %p207_p4 = scmp.eq.s32.totalorder %s2768_s29, 1 }
   0x8   : > { %s3508_s10 = scalar_select %p188_p1, %s3423_s26, %s190_s8  }
   0x9   : > { %p3510_p5 = por %p201_p2, %p200_p0  ;;  %p3514_p6 = por %p207_p4, %p206_p3 }
   0xa   : > { %p2771_p7 = scmp.ge.s32.totalorder %s3427_s27, 1  ;;  %p246_p8 = scmp.lt.s32.totalorder %s3427_s27, 3 }
   0xc   : > { %p247_p9 = pnand %p2771_p7, %p246_p8 }
   0xe   : > { %250 = sbr.rel (%p247_p9) target bundleno = 1137 (0x471), region = 40 }
  0x15   : > { %v3295_v0 = vld [vmem:[%s4954_s1 + $0x4] ss:$8 sps:$4 sm:$0xff]   ;;  %s2772_s15 = sshll.u32 %s3493_s28, 5  ;;  %v3297_v1 = vld [vmem:[%s4954_s1] ss:$8 sps:$4 sm:$0xff]   ;;  %v3429_v2 = vmov 0   ;;  %v4961_v53 = vlaneseq }
  0x16   : > { %460 = vmatprep.mubr.bf16.mxu0 %v3429_v2  ;;  %p288_p10 = scmp.lt.s32.totalorder %s2772_s15, 63  ;;  %540 = vmatprep.mubr.bf16.mxu1 %v3429_v2  ;;  %v3298_v3 = vld [vmem:[%s4954_s1 + $0x14] ss:$8 sps:$4 sm:$0xff]   ;;  %v3300_v4 = vld [vmem:[%s4954_s1 + $0x10] ss:$8 sps:$4 sm:$0xff]   ;;  %vm379_vm0 = vcmask 261120  }
  0x17   : > { %428 = vmatprep.subr.bf16.mxu0 %v3295_v0  ;;  %3250 = vmatprep.subr.bf16.mxu1 %v3295_v0  ;;  %v3606_v54 = vshrl.u32 %v4961_v53, 7  ;;  %v358_v56 = vld [vmem:[%s4955_s2] sm:$0x3]  ;;  %s3022_s21 = sshll.u32 %s3493_s28, 8  ;;  %s3023_s13 = sshll.u32 %s3493_s28, 4 }
  0x18   : > { %429 = vmatpush1.bf16.msra.mxu0 %v3297_v1  ;;  %s5042_s15 = smov (!%p288_p10, %s2772_s15), 63  ;;  %3252 = vmatpush1.bf16.msra.mxu1 %v3297_v1  ;;  %s4911_s17 = scalar_lea.hbm %s4960_s7, %s3023_s13 }
  0x19   : > { %430 = vmatprep.subr.bf16.mxu0 %v3298_v3  ;;  %3251 = vmatprep.subr.bf16.mxu1 %v3298_v3  ;;  %s3535_s22 = sshll.u32 %s5042_s15, 3  ;;  %4988 = vst [vmem:[#allocation5_spill] sm:$0xff] %v3606_v54  ;;  %v624_v55 = vsub.s32 0, %v3606_v54  ;;  %v628_v57 = vsub.s32 1, %v3606_v54  ;;  %s3431_s28 = smov [#allocation2]  }
  0x1a   : > { %s3541_s8 = scalar_lea.vmem %s4953_s0, %s3535_s22  ;;  %s4414_s20 = scalar_lea.vmem %s4959_s6, %s3535_s22 }
  0x1b   : > { %v306_v5 = vld [vmem:[%s3541_s8] sm:$0xff]  ;;  %v307_v6 = vld [vmem:[%s3541_s8 + $0x8] sm:$0xff]  ;;  %v308_v8 = vld [vmem:[%s3541_s8 + $0x10] sm:$0xff]  ;;  %v3613_v58 = vrot.slane %v358_v56, %v624_v55  ;;  %v3615_v59 = vrot.slane %v358_v56, %v628_v57  ;;  %s4715_s9 = scalar_lea.vmem %s4958_s5, %s3535_s22  ;;  %s285_s22 = sand.u32 1, %s3419_s25  }
  0x1c   : > { %431 = vmatpush1.bf16.msra.mxu0 %v3300_v4  ;;  %3253 = vmatpush1.bf16.msra.mxu1 %v3300_v4  ;;  %v338_v7 = vpack.c.bf16 %v307_v6, %v306_v5  ;;  %v309_v9 = vld [vmem:[%s3541_s8 + $0x18] sm:$0xff]  ;;  %v322_v10 = vld [vmem:[%s3541_s8 + $0x80] sm:$0xff]  ;;  %v323_v11 = vld [vmem:[%s3541_s8 + $0x88] sm:$0xff]  ;;  %s286_s14 = scalar_lea.vmem [#allocation2], %s285_s22  ;;  %s2643_s18 = scalar_lea.sflag [#allocation3], %s285_s22 }
  0x1d   : > { %v346_v12 = vpack.c.bf16 %v323_v11, %v322_v10  ;;  %v339_v13 = vpack.c.bf16 %v309_v9, %v308_v8  ;;  %v324_v14 = vld [vmem:[%s3541_s8 + $0x90] sm:$0xff]  ;;  %v325_v15 = vld [vmem:[%s3541_s8 + $0x98] sm:$0xff]  ;;  %v310_v16 = vld [vmem:[%s3541_s8 + $0x20] sm:$0xff]  ;;  %s2663_s15 = sshll.u32 %s286_s14, 4  ;;  %s4913_s15 = int_to_ptr.vmem [resolvable:$true] %s2663_s15 }
  0x1e   : > { %v311_v17 = vld [vmem:[%s3541_s8 + $0x28] sm:$0xff]  ;;  %v347_v18 = vpack.c.bf16 %v325_v15, %v324_v14  ;;  %v326_v20 = vld [vmem:[%s3541_s8 + $0xa0] sm:$0xff]  ;;  %v312_v22 = vld [vmem:[%s3541_s8 + $0x30] sm:$0xff]  ;;  %s3365_s19 = scalar_lea.vmem %s4913_s15, 16 }
  0x1f   : > { %2782 = vmatmul.mubr.msk.bf16.vlgmr.msra.gmra.mrb[0].mxu0 %vm379_vm0, %v338_v7  ;;  %2790 = vmatmul.mubr.msk.bf16.vlgmr.msra.gmra.mrb[0].mxu1 %vm379_vm0, %v346_v12  ;;  %v340_v19 = vpack.c.bf16 %v311_v17, %v310_v16  ;;  %v327_v21 = vld [vmem:[%s3541_s8 + $0xa8] sm:$0xff]  ;;  %v313_v23 = vld [vmem:[%s3541_s8 + $0x38] sm:$0xff]  ;;  %v328_v26 = vld [vmem:[%s3541_s8 + $0xb0] sm:$0xff]  ;;  %p3366_p11 = scmp.ne.s32.totalorder %s4913_s15, %s3365_s19 }
  0x20   : > { %470 = vmatprep.mubr.bf16.mxu0 %v3429_v2  ;;  %550 = vmatprep.mubr.bf16.mxu1 %v3429_v2  ;;  %v348_v24 = vpack.c.bf16 %v327_v21, %v326_v20  ;;  %v341_v25 = vpack.c.bf16 %v313_v23, %v312_v22  ;;  %v329_v27 = vld [vmem:[%s3541_s8 + $0xb8] sm:$0xff]  ;;  %v314_v28 = vld [vmem:[%s3541_s8 + $0x40] sm:$0xff]  ;;  %v315_v29 = vld [vmem:[%s3541_s8 + $0x48] sm:$0xff] }
  0x21   : > { %v349_v30 = vpack.c.bf16 %v329_v27, %v328_v26  ;;  %v342_v31 = vpack.c.bf16 %v315_v29, %v314_v28  ;;  %v330_v32 = vld [vmem:[%s3541_s8 + $0xc0] sm:$0xff]  ;;  %v331_v33 = vld [vmem:[%s3541_s8 + $0xc8] sm:$0xff]  ;;  %v316_v34 = vld [vmem:[%s3541_s8 + $0x50] sm:$0xff]  ;;  %p3367_p12 = pnand %p3366_p11, %p3510_p5 }
  0x22   : > { %v317_v35 = vld [vmem:[%s3541_s8 + $0x58] sm:$0xff]  ;;  %v350_v36 = vpack.c.bf16 %v331_v33, %v330_v32  ;;  %v332_v38 = vld [vmem:[%s3541_s8 + $0xd0] sm:$0xff]  ;;  %v318_v40 = vld [vmem:[%s3541_s8 + $0x60] sm:$0xff] }
  0x23   : > { %v343_v37 = vpack.c.bf16 %v317_v35, %v316_v34  ;;  %v333_v39 = vld [vmem:[%s3541_s8 + $0xd8] sm:$0xff]  ;;  %v319_v41 = vld [vmem:[%s3541_s8 + $0x68] sm:$0xff]  ;;  %v334_v44 = vld [vmem:[%s3541_s8 + $0xe0] sm:$0xff]  ;;  %p3368_p13 = pneg %p3367_p12 }
  0x24   : > { %v351_v42 = vpack.c.bf16 %v333_v39, %v332_v38  ;;  %v344_v43 = vpack.c.bf16 %v319_v41, %v318_v40  ;;  %v335_v45 = vld [vmem:[%s3541_s8 + $0xe8] sm:$0xff]  ;;  %v320_v46 = vld [vmem:[%s3541_s8 + $0x70] sm:$0xff]  ;;  %v321_v47 = vld [vmem:[%s3541_s8 + $0x78] sm:$0xff] }
  0x25   : > { %v352_v48 = vpack.c.bf16 %v335_v45, %v334_v44  ;;  %v345_v49 = vpack.c.bf16 %v321_v47, %v320_v46  ;;  %v336_v50 = vld [vmem:[%s3541_s8 + $0xf0] sm:$0xff]  ;;  %v337_v51 = vld [vmem:[%s3541_s8 + $0xf8] sm:$0xff] }
  0x26   : > { %v353_v52 = vpack.c.bf16 %v337_v51, %v336_v50 }
  0x27   : > { %2783 = vmatmul.mubr.msk.bf16.gmra.mrb[4].mxu0 %vm379_vm0, %v339_v13  ;;  %2791 = vmatmul.mubr.msk.bf16.gmra.mrb[4].mxu1 %vm379_vm0, %v347_v18 }
  0x28   : > { %480 = vmatprep.mubr.bf16.mxu0 %v3429_v2  ;;  %560 = vmatprep.mubr.bf16.mxu1 %v3429_v2 }
  0x2f   : > { %2784 = vmatmul.mubr.msk.bf16.gmra.mrb[8].mxu0 %vm379_vm0, %v340_v19  ;;  %2792 = vmatmul.mubr.msk.bf16.gmra.mrb[8].mxu1 %vm379_vm0, %v348_v24 }
  0x30   : > { %490 = vmatprep.mubr.bf16.mxu0 %v3429_v2  ;;  %570 = vmatprep.mubr.bf16.mxu1 %v3429_v2 }
  0x37   : > { %2785 = vmatmul.mubr.msk.bf16.gmra.mrb[12].mxu0 %vm379_vm0, %v341_v25  ;;  %2793 = vmatmul.mubr.msk.bf16.gmra.mrb[12].mxu1 %vm379_vm0, %v349_v30 }
  0x38   : > { %500 = vmatprep.mubr.bf16.mxu0 %v3429_v2  ;;  %580 = vmatprep.mubr.bf16.mxu1 %v3429_v2 }
  0x3f   : > { %2786 = vmatmul.mubr.msk.bf16.gmra.mrb[16].mxu0 %vm379_vm0, %v342_v31  ;;  %2794 = vmatmul.mubr.msk.bf16.gmra.mrb[16].mxu1 %vm379_vm0, %v350_v36 }
  0x40   : > { %510 = vmatprep.mubr.bf16.mxu0 %v3429_v2  ;;  %590 = vmatprep.mubr.bf16.mxu1 %v3429_v2 }
  0x47   : > { %2787 = vmatmul.mubr.msk.bf16.gmra.mrb[20].mxu0 %vm379_vm0, %v343_v37  ;;  %2795 = vmatmul.mubr.msk.bf16.gmra.mrb[20].mxu1 %vm379_vm0, %v351_v42 }
  0x48   : > { %520 = vmatprep.mubr.bf16.mxu0 %v3429_v2  ;;  %600 = vmatprep.mubr.bf16.mxu1 %v3429_v2 }
  0x4f   : > { %2788 = vmatmul.mubr.msk.bf16.gmra.mrb[24].mxu0 %vm379_vm0, %v344_v43  ;;  %2796 = vmatmul.mubr.msk.bf16.gmra.mrb[24].mxu1 %vm379_vm0, %v352_v48 }
  0x50   : > { %530 = vmatprep.mubr.bf16.mxu0 %v3429_v2  ;;  %610 = vmatprep.mubr.bf16.mxu1 %v3429_v2 }
  0x57   : > { %2789 = vmatmul.mubr.msk.bf16.gmra.mrb[28].mxu0 %vm379_vm0, %v345_v49  ;;  %2797 = vmatmul.mubr.msk.bf16.gmra.mrb[28].mxu1 %vm379_vm0, %v353_v52 }
  0xf2   : > { %v462_v60 = vpop.f32.mrb[0].mxu0  ;;  %v3631_v5 = vpop.f32.mrb[0].mxu1 }
  0xf3   : > { %v3618_v61 = vsub.f32 %v3613_v58, %v462_v60  ;;  %v464_v62 = vpop.f32.mrb[1].mxu0  ;;  %v3633_v6 = vpop.f32.mrb[1].mxu1 }
  0xf4   : > { %v3621_v63 = vsub.f32 %v3615_v59, %v464_v62  ;;  %v466_v0 = vpop.f32.mrb[2].mxu0  ;;  %v3635_v7 = vpop.f32.mrb[2].mxu1 }
  0xf5   : > { %v468_v1 = vpop.f32.mrb[3].mxu0  ;;  %v3624_v2 = vsub.f32 %v3613_v58, %v466_v0  ;;  %v3639_v10 = vpop.f32.mrb[3].mxu1 }
  0xf6   : > { %v3627_v3 = vsub.f32 %v3615_v59, %v468_v1  ;;  %v699_v4 = vmin.f32 %v3618_v61, %v3621_v63 }
  0xf8   : > { %700 = vmin.xlane.f32.xlu0 %v699_v4  ;;  %v702_v9 = vmin.f32 %v3624_v2, %v3627_v3 }
  0xfa   : > { %v472_v8 = vpop.f32.mrb[4].mxu0  ;;  %v552_v19 = vpop.f32.mrb[4].mxu1 }
  0xfb   : > { %v3642_v11 = vsub.f32 %v3613_v58, %v472_v8  ;;  %v474_v12 = vpop.f32.mrb[5].mxu0  ;;  %v3656_v20 = vsub.f32 %v3613_v58, %v552_v19  ;;  %v554_v21 = vpop.f32.mrb[5].mxu1 }
  0xfc   : > { %v3645_v13 = vsub.f32 %v3615_v59, %v474_v12  ;;  %703 = vmin.xlane.f32.xlu0 %v702_v9  ;;  %v476_v14 = vpop.f32.mrb[6].mxu0  ;;  %v3659_v22 = vsub.f32 %v3615_v59, %v554_v21  ;;  %v556_v23 = vpop.f32.mrb[6].mxu1 }
  0xfd   : > { %v478_v15 = vpop.f32.mrb[7].mxu0  ;;  %v3648_v16 = vsub.f32 %v3613_v58, %v476_v14  ;;  %v3664_v26 = vsub.f32 %v3613_v58, %v556_v23  ;;  %v558_v27 = vpop.f32.mrb[7].mxu1 }
  0xfe   : > { %v3651_v17 = vsub.f32 %v3615_v59, %v478_v15  ;;  %v705_v18 = vmin.f32 %v3642_v11, %v3645_v13  ;;  %v3670_v30 = vsub.f32 %v3615_v59, %v558_v27 }
 0x100   : > { %706 = vmin.xlane.f32.xlu1 %v705_v18  ;;  %v708_v25 = vmin.f32 %v3648_v16, %v3651_v17 }
 0x102   : > { %v482_v24 = vpop.f32.mrb[8].mxu0  ;;  %v562_v37 = vpop.f32.mrb[8].mxu1 }
 0x103   : > { %v3667_v28 = vsub.f32 %v3613_v58, %v482_v24  ;;  %v484_v29 = vpop.f32.mrb[9].mxu0  ;;  %v3686_v39 = vsub.f32 %v3613_v58, %v562_v37  ;;  %v564_v40 = vpop.f32.mrb[9].mxu1 }
 0x104   : > { %v3673_v31 = vsub.f32 %v3615_v59, %v484_v29  ;;  %709 = vmin.xlane.f32.xlu1 %v708_v25  ;;  %v486_v32 = vpop.f32.mrb[10].mxu0  ;;  %v3689_v41 = vsub.f32 %v3615_v59, %v564_v40  ;;  %v566_v42 = vpop.f32.mrb[10].mxu1 }
 0x105   : > { %v3676_v33 = vsub.f32 %v3613_v58, %v486_v32  ;;  %v488_v34 = vpop.f32.mrb[11].mxu0  ;;  %v3692_v44 = vsub.f32 %v3613_v58, %v566_v42  ;;  %v568_v45 = vpop.f32.mrb[11].mxu1 }
 0x106   : > { %v3679_v35 = vsub.f32 %v3615_v59, %v488_v34  ;;  %v711_v36 = vmin.f32 %v3667_v28, %v3673_v31  ;;  %v3698_v48 = vsub.f32 %v3615_v59, %v568_v45 }
 0x108   : > { %712 = vmin.xlane.f32.xlu0 %v711_v36  ;;  %v714_v38 = vmin.f32 %v3676_v33, %v3679_v35  ;;  %4989 = vst [vmem:[#allocation6_spill] sm:$0xff] %v3698_v48 }
 0x10a   : > { %715 = vmin.xlane.f32.xlu1 %v714_v38  ;;  %v492_v43 = vpop.f32.mrb[12].mxu0  ;;  %v572_v57 = vpop.f32.mrb[12].mxu1 }
 0x10b   : > { %v3695_v46 = vsub.f32 %v3613_v58, %v492_v43  ;;  %v494_v47 = vpop.f32.mrb[13].mxu0  ;;  %v3714_v62 = vsub.f32 %v3613_v58, %v572_v57  ;;  %v574_v0 = vpop.f32.mrb[13].mxu1 }
 0x10c   : > { %v3701_v49 = vsub.f32 %v3615_v59, %v494_v47  ;;  %v496_v50 = vpop.f32.mrb[14].mxu0  ;;  %v3717_v1 = vsub.f32 %v3615_v59, %v574_v0  ;;  %v576_v4 = vpop.f32.mrb[14].mxu1 }
 0x10d   : > { %v3704_v51 = vsub.f32 %v3613_v58, %v496_v50  ;;  %v498_v52 = vpop.f32.mrb[15].mxu0  ;;  %v3720_v9 = vsub.f32 %v3613_v58, %v576_v4  ;;  %v578_v12 = vpop.f32.mrb[15].mxu1 }
 0x10e   : > { %v3707_v55 = vsub.f32 %v3615_v59, %v498_v52  ;;  %v717_v56 = vmin.f32 %v3695_v46, %v3701_v49  ;;  %v3726_v18 = vsub.f32 %v3615_v59, %v578_v12 }
 0x110   : > { %718 = vmin.xlane.f32.xlu0 %v717_v56  ;;  %v720_v60 = vmin.f32 %v3704_v51, %v3707_v55 }
 0x112   : > { %721 = vmin.xlane.f32.xlu1 %v720_v60  ;;  %v502_v8 = vpop.f32.mrb[16].mxu0  ;;  %v582_v29 = vpop.f32.mrb[16].mxu1 }
 0x113   : > { %v3723_v14 = vsub.f32 %v3613_v58, %v502_v8  ;;  %v504_v15 = vpop.f32.mrb[17].mxu0  ;;  %v3742_v34 = vsub.f32 %v3613_v58, %v582_v29  ;;  %v584_v36 = vpop.f32.mrb[17].mxu1 }
 0x114   : > { %v3729_v19 = vsub.f32 %v3615_v59, %v504_v15  ;;  %v506_v21 = vpop.f32.mrb[18].mxu0  ;;  %v3745_v37 = vsub.f32 %v3615_v59, %v584_v36  ;;  %v586_v38 = vpop.f32.mrb[18].mxu1 }
 0x115   : > { %v3732_v23 = vsub.f32 %v3613_v58, %v506_v21  ;;  %v508_v24 = vpop.f32.mrb[19].mxu0  ;;  %v3748_v42 = vsub.f32 %v3613_v58, %v586_v38  ;;  %v588_v43 = vpop.f32.mrb[19].mxu1 }
 0x116   : > { %v3735_v25 = vsub.f32 %v3615_v59, %v508_v24  ;;  %v723_v27 = vmin.f32 %v3723_v14, %v3729_v19  ;;  %4990 = vst [vmem:[#allocation7_spill] sm:$0xff] %v3745_v37  ;;  %v3754_v50 = vsub.f32 %v3615_v59, %v588_v43 }
 0x118   : > { %724 = vmin.xlane.f32.xlu0 %v723_v27  ;;  %v726_v32 = vmin.f32 %v3732_v23, %v3735_v25 }
 0x11a   : > { %727 = vmin.xlane.f32.xlu1 %v726_v32  ;;  %v512_v40 = vpop.f32.mrb[20].mxu0  ;;  %v592_v8 = vpop.f32.mrb[20].mxu1 }
 0x11b   : > { %v3751_v45 = vsub.f32 %v3613_v58, %v512_v40  ;;  %v514_v47 = vpop.f32.mrb[21].mxu0  ;;  %v3770_v15 = vsub.f32 %v3613_v58, %v592_v8  ;;  %v594_v21 = vpop.f32.mrb[21].mxu1 }
 0x11c   : > { %v3757_v52 = vsub.f32 %v3615_v59, %v514_v47  ;;  %v516_v56 = vpop.f32.mrb[22].mxu0  ;;  %v3773_v24 = vsub.f32 %v3615_v59, %v594_v21  ;;  %v596_v27 = vpop.f32.mrb[22].mxu1 }
 0x11d   : > { %v3760_v57 = vsub.f32 %v3613_v58, %v516_v56  ;;  %v518_v60 = vpop.f32.mrb[23].mxu0  ;;  %v3776_v32 = vsub.f32 %v3613_v58, %v596_v27  ;;  %v598_v36 = vpop.f32.mrb[23].mxu1 }
 0x11e   : > { %v3763_v0 = vsub.f32 %v3615_v59, %v518_v60  ;;  %v729_v4 = vmin.f32 %v3751_v45, %v3757_v52  ;;  %v3782_v43 = vsub.f32 %v3615_v59, %v598_v36 }
 0x11f   : > { %4991 = vst [vmem:[#allocation8_spill] sm:$0xff] %v3760_v57 }
 0x120   : > { %4992 = vst [vmem:[#allocation9_spill] sm:$0xff] %v3763_v0  ;;  %730 = vmin.xlane.f32.xlu0 %v729_v4  ;;  %v732_v12 = vmin.f32 %v3760_v57, %v3763_v0 }
 0x122   : > { %733 = vmin.xlane.f32.xlu1 %v732_v12  ;;  %v522_v29 = vpop.f32.mrb[24].mxu0  ;;  %v602_v21 = vpop.f32.mrb[24].mxu1 }
 0x123   : > { %v3779_v38 = vsub.f32 %v3613_v58, %v522_v29  ;;  %v524_v40 = vpop.f32.mrb[25].mxu0  ;;  %v3798_v29 = vsub.f32 %v3613_v58, %v602_v21  ;;  %v604_v36 = vpop.f32.mrb[25].mxu1 }
 0x124   : > { %v3785_v47 = vsub.f32 %v3615_v59, %v524_v40  ;;  %v526_v56 = vpop.f32.mrb[26].mxu0  ;;  %v3801_v40 = vsub.f32 %v3615_v59, %v604_v36  ;;  %v3817_v36 = vsub.f32 %v3613_v58, %v3631_v5  ;;  %v3837_v5 = vsub.f32 %v3615_v59, %v3639_v10 }
 0x125   : > { %4993 = vst [vmem:[#allocation10_spill] sm:$0xff] %v3779_v38  ;;  %v3788_v60 = vsub.f32 %v3613_v58, %v526_v56  ;;  %v528_v4 = vpop.f32.mrb[27].mxu0  ;;  %v606_v56 = vpop.f32.mrb[26].mxu1 }
 0x126   : > { %4994 = vst [vmem:[#allocation11_spill] sm:$0xff] %v3785_v47  ;;  %v3791_v8 = vsub.f32 %v3615_v59, %v528_v4  ;;  %v735_v12 = vmin.f32 %v3779_v38, %v3785_v47  ;;  %v3804_v4 = vsub.f32 %v3613_v58, %v606_v56  ;;  %v608_v54 = vpop.f32.mrb[27].mxu1 }
 0x127   : > { %4995 = vst [vmem:[#allocation12_spill] sm:$0xff] %v3788_v60 }
 0x128   : > { %4996 = vst [vmem:[#allocation13_spill] sm:$0xff] %v3791_v8  ;;  %736 = vmin.xlane.f32.xlu0 %v735_v12  ;;  %v738_v27 = vmin.f32 %v3788_v60, %v3791_v8  ;;  %v3810_v8 = vsub.f32 %v3615_v59, %v608_v54  ;;  %v3831_v54 = vsub.f32 %v3613_v58, %v3635_v7 }
 0x12a   : > { %739 = vmin.xlane.f32.xlu1 %v738_v27  ;;  %v532_v53 = vpop.f32.mrb[28].mxu0  ;;  %v3821_v27 = vsub.f32 %v3615_v59, %v3633_v6  ;;  %v612_v6 = vpop.f32.mrb[28].mxu1  ;;  %v750_v10 = vmin.f32 %v3831_v54, %v3837_v5 }
 0x12b   : > { %v3807_v47 = vsub.f32 %v3613_v58, %v532_v53  ;;  %v534_v12 = vpop.f32.mrb[29].mxu0  ;;  %v3844_v0 = vsub.f32 %v3613_v58, %v612_v6  ;;  %v614_v7 = vpop.f32.mrb[29].mxu1  ;;  %v753_v6 = vmin.f32 %v3656_v20, %v3659_v22 }
 0x12c   : > { %v3813_v21 = vsub.f32 %v3615_v59, %v534_v12  ;;  %v536_v60 = vpop.f32.mrb[30].mxu0  ;;  %v3847_v57 = vsub.f32 %v3615_v59, %v614_v7  ;;  %v756_v7 = vmin.f32 %v3664_v26, %v3670_v30 }
 0x12d   : > { %4997 = vst [vmem:[#allocation14_spill] sm:$0xff] %v3807_v47  ;;  %v3824_v56 = vsub.f32 %v3613_v58, %v536_v60  ;;  %v538_v53 = vpop.f32.mrb[31].mxu0  ;;  %5000 = vst [vmem:[#allocation17_spill] sm:$0xff] %v3844_v0 }
 0x12e   : > { %4998 = vst [vmem:[#allocation15_spill] sm:$0xff] %v3813_v21  ;;  %v3827_v38 = vsub.f32 %v3615_v59, %v538_v53  ;;  %v741_v12 = vmin.f32 %v3807_v47, %v3813_v21  ;;  %v747_v53 = vmin.f32 %v3817_v36, %v3821_v27  ;;  %5001 = vst [vmem:[#allocation18_spill] sm:$0xff] %v3847_v57  ;;  %v616_v21 = vpop.f32.mrb[30].mxu1 }
 0x12f   : > { %v618_v47 = vpop.f32.mrb[31].mxu1 }
 0x130   : > { %4999 = vst [vmem:[#allocation16_spill] sm:$0xff] %v3827_v38  ;;  %742 = vmin.xlane.f32.xlu0 %v741_v12  ;;  %v744_v60 = vmin.f32 %v3824_v56, %v3827_v38  ;;  %v3852_v12 = vsub.f32 %v3613_v58, %v616_v21  ;;  %v3855_v38 = vsub.f32 %v3615_v59, %v618_v47  ;;  %v5004_v59 = vlaneseq }
 0x131   : > { %v762_v58 = vmin.f32 %v3692_v44, %v3698_v48 }
 0x132   : > { %745 = vmin.xlane.f32.xlu1 %v744_v60  ;;  %5002 = vst [vmem:[#allocation19_spill] sm:$0xff] %v3852_v12  ;;  %5003 = vst [vmem:[#allocation20_spill] sm:$0xff] %v3855_v38  ;;  %v759_v60 = vmin.f32 %v3686_v39, %v3689_v41  ;;  %v3866_v47 = vand.u32 127, %v5004_v59 }
 0x134   : > { %748 = vmin.xlane.f32.xlu0 %v747_v53  ;;  %v3869_v21 = vadd.s32 128, %v3866_v47 }
 0x136   : > { %751 = vmin.xlane.f32.xlu1 %v750_v10 }
 0x138   : > { %754 = vmin.xlane.f32.xlu0 %v753_v6 }
 0x13a   : > { %757 = vmin.xlane.f32.xlu1 %v756_v7 }
 0x13c   : > { %760 = vmin.xlane.f32.xlu0 %v759_v60 }
 0x13e   : > { %763 = vmin.xlane.f32.xlu1 %v762_v58 }
 0x185   : > { %v701_v53 = vpop.xlane.xlu0 %700 }
 0x186   : > { %vm795_vm1 = vcmp.eq.f32.partialorder %v3618_v61, %v701_v53  ;;  %vm796_vm2 = vcmp.eq.f32.partialorder %v3621_v63, %v701_v53 }
 0x187   : > { %v859_v10 = vsel %vm795_vm1, %v3866_v47, 256  ;;  %v860_v6 = vsel %vm796_vm2, %v3869_v21, 256 }
 0x188   : > { %vm923_vm3 = vcmp.lt.s32.totalorder %v859_v10, %v860_v6 }
 0x189   : > { %v704_v7 = vpop.xlane.xlu0 %703  ;;  %v3875_v48 = vsel %vm923_vm3, %v859_v10, %v860_v6 }
 0x18a   : > { %vm797_vm4 = vcmp.eq.f32.partialorder %v3624_v2, %v704_v7  ;;  %vm798_vm5 = vcmp.eq.f32.partialorder %v3627_v3, %v704_v7  ;;  %v926_v60 = vshra.s32 %v3875_v48, 16  ;;  %v765_v2 = vmin.f32 %v3714_v62, %v3717_v1 }
 0x18b   : > { %v861_v58 = vsel %vm797_vm4, %v3866_v47, 256  ;;  %v862_v61 = vsel %vm798_vm5, %v3869_v21, 256 }
 0x18c   : > { %vm939_vm6 = vcmp.lt.s32.totalorder %v861_v58, %v862_v61  ;;  %v3882_v63 = vcvt.s32.f32 %v926_v60 }
 0x18d   : > { %v707_v59 = vpop.xlane.xlu1 %706  ;;  %v3884_v53 = vsel %vm939_vm6, %v861_v58, %v862_v61 }
 0x18e   : > { %vm799_vm7 = vcmp.eq.f32.partialorder %v3642_v11, %v707_v59  ;;  %vm800_vm8 = vcmp.eq.f32.partialorder %v3645_v13, %v707_v59  ;;  %929 = vmin.xlane.f32.xlu0 %v3882_v63  ;;  %v942_v3 = vshra.s32 %v3884_v53, 16 }
 0x18f   : > { %v863_v10 = vsel %vm799_vm7, %v3866_v47, 256  ;;  %v864_v6 = vsel %vm800_vm8, %v3869_v21, 256 }
 0x190   : > { %vm955_vm9 = vcmp.lt.s32.totalorder %v863_v10, %v864_v6  ;;  %v3894_v7 = vcvt.s32.f32 %v942_v3  ;;  %v768_v3 = vmin.f32 %v3720_v9, %v3726_v18 }
 0x191   : > { %v710_v60 = vpop.xlane.xlu1 %709  ;;  %v3896_v58 = vsel %vm955_vm9, %v863_v10, %v864_v6 }
 0x192   : > { %vm801_vm10 = vcmp.eq.f32.partialorder %v3648_v16, %v710_v60  ;;  %vm802_vm11 = vcmp.eq.f32.partialorder %v3651_v17, %v710_v60  ;;  %766 = vmin.xlane.f32.xlu0 %v765_v2  ;;  %945 = vmin.xlane.f32.xlu1 %v3894_v7  ;;  %v958_v11 = vshra.s32 %v3896_v58, 16  ;;  %v771_v16 = vmin.f32 %v3742_v34, %v3745_v37 }
 0x193   : > { %v865_v13 = vsel %vm801_vm10, %v3866_v47, 256  ;;  %v866_v61 = vsel %vm802_vm11, %v3869_v21, 256 }
 0x194   : > { %vm971_vm12 = vcmp.lt.s32.totalorder %v865_v13, %v866_v61  ;;  %v3904_v59 = vcvt.s32.f32 %v958_v11 }
 0x195   : > { %v713_v10 = vpop.xlane.xlu0 %712  ;;  %v3908_v6 = vsel %vm971_vm12, %v865_v13, %v866_v61 }
 0x196   : > { %vm803_vm13 = vcmp.eq.f32.partialorder %v3667_v28, %v713_v10  ;;  %vm804_vm14 = vcmp.eq.f32.partialorder %v3673_v31, %v713_v10  ;;  %961 = vmin.xlane.f32.xlu0 %v3904_v59  ;;  %769 = vmin.xlane.f32.xlu1 %v768_v3  ;;  %v974_v17 = vshra.s32 %v3908_v6, 16 }
 0x197   : > { %v867_v2 = vsel %vm803_vm13, %v3866_v47, 256  ;;  %v868_v60 = vsel %vm804_vm14, %v3869_v21, 256  ;;  %v716_v11 = vpop.xlane.xlu1 %715 }
 0x198   : > { %vm987_vm15 = vcmp.lt.s32.totalorder %v867_v2, %v868_v60  ;;  %vm805_vm1 = vcmp.eq.f32.partialorder %v3676_v33, %v716_v11  ;;  %vm806_vm2 = vcmp.eq.f32.partialorder %v3679_v35, %v716_v11  ;;  %v3920_v28 = vcvt.s32.f32 %v974_v17 }
 0x199   : > { %v869_v31 = vsel %vm805_vm1, %v3866_v47, 256  ;;  %v870_v13 = vsel %vm806_vm2, %v3869_v21, 256  ;;  %v3924_v61 = vsel %vm987_vm15, %v867_v2, %v868_v60  ;;  %v774_v33 = vmin.f32 %v3748_v42, %v3754_v50 }
 0x19a   : > { %vm1003_vm3 = vcmp.lt.s32.totalorder %v869_v31, %v870_v13  ;;  %772 = vmin.xlane.f32.xlu0 %v771_v16  ;;  %977 = vmin.xlane.f32.xlu1 %v3920_v28  ;;  %v990_v3 = vshra.s32 %v3924_v61, 16  ;;  %v777_v16 = vmin.f32 %v3770_v15, %v3773_v24 }
 0x19b   : > { %v3928_v10 = vsel %vm1003_vm3, %v869_v31, %v870_v13 }
 0x19c   : > { %v3930_v37 = vcvt.s32.f32 %v990_v3  ;;  %v1006_v35 = vshra.s32 %v3928_v10, 16 }
 0x19d   : > { %v719_v17 = vpop.xlane.xlu0 %718 }
 0x19e   : > { %vm807_vm4 = vcmp.eq.f32.partialorder %v3695_v46, %v719_v17  ;;  %vm808_vm5 = vcmp.eq.f32.partialorder %v3701_v49, %v719_v17  ;;  %993 = vmin.xlane.f32.xlu0 %v3930_v37  ;;  %775 = vmin.xlane.f32.xlu1 %v774_v33  ;;  %v3944_v31 = vcvt.s32.f32 %v1006_v35 }
 0x19f   : > { %v871_v2 = vsel %vm807_vm4, %v3866_v47, 256  ;;  %v872_v60 = vsel %vm808_vm5, %v3869_v21, 256  ;;  %v722_v11 = vpop.xlane.xlu1 %721 }
 0x1a0   : > { %vm1019_vm6 = vcmp.lt.s32.totalorder %v871_v2, %v872_v60  ;;  %vm809_vm7 = vcmp.eq.f32.partialorder %v3704_v51, %v722_v11  ;;  %vm810_vm8 = vcmp.eq.f32.partialorder %v3707_v55, %v722_v11  ;;  %v780_v51 = vmin.f32 %v3776_v32, %v3782_v43 }
 0x1a1   : > { %v873_v46 = vsel %vm809_vm7, %v3866_v47, 256  ;;  %v874_v49 = vsel %vm810_vm8, %v3869_v21, 256  ;;  %v3948_v13 = vsel %vm1019_vm6, %v871_v2, %v872_v60 }
 0x1a2   : > { %vm1035_vm9 = vcmp.lt.s32.totalorder %v873_v46, %v874_v49  ;;  %778 = vmin.xlane.f32.xlu0 %v777_v16  ;;  %1009 = vmin.xlane.f32.xlu1 %v3944_v31  ;;  %v1022_v3 = vshra.s32 %v3948_v13, 16  ;;  %v783_v16 = vmin.f32 %v3798_v29, %v3801_v40 }
 0x1a3   : > { %v3952_v33 = vsel %vm1035_vm9, %v873_v46, %v874_v49 }
 0x1a4   : > { %v3954_v17 = vcvt.s32.f32 %v1022_v3  ;;  %v1038_v55 = vshra.s32 %v3952_v33, 16 }
 0x1a5   : > { %v725_v35 = vpop.xlane.xlu0 %724 }
 0x1a6   : > { %vm811_vm10 = vcmp.eq.f32.partialorder %v3723_v14, %v725_v35  ;;  %vm812_vm11 = vcmp.eq.f32.partialorder %v3729_v19, %v725_v35  ;;  %1025 = vmin.xlane.f32.xlu0 %v3954_v17  ;;  %781 = vmin.xlane.f32.xlu1 %v780_v51  ;;  %v3968_v46 = vcvt.s32.f32 %v1038_v55 }
 0x1a7   : > { %v875_v2 = vsel %vm811_vm10, %v3866_v47, 256  ;;  %v876_v60 = vsel %vm812_vm11, %v3869_v21, 256  ;;  %v728_v11 = vpop.xlane.xlu1 %727 }
 0x1a8   : > { %vm1051_vm12 = vcmp.lt.s32.totalorder %v875_v2, %v876_v60  ;;  %vm813_vm13 = vcmp.eq.f32.partialorder %v3732_v23, %v728_v11  ;;  %vm814_vm14 = vcmp.eq.f32.partialorder %v3735_v25, %v728_v11  ;;  %v786_v23 = vmin.f32 %v3804_v4, %v3810_v8 }
 0x1a9   : > { %v877_v14 = vsel %vm813_vm13, %v3866_v47, 256  ;;  %v878_v19 = vsel %vm814_vm14, %v3869_v21, 256  ;;  %v3972_v49 = vsel %vm1051_vm12, %v875_v2, %v876_v60 }
 0x1aa   : > { %vm1067_vm15 = vcmp.lt.s32.totalorder %v877_v14, %v878_v19  ;;  %784 = vmin.xlane.f32.xlu0 %v783_v16  ;;  %1041 = vmin.xlane.f32.xlu1 %v3968_v46  ;;  %v1054_v3 = vshra.s32 %v3972_v49, 16  ;;  %v789_v16 = vmin.f32 %v3844_v0, %v3847_v57 }
 0x1ab   : > { %v3976_v51 = vsel %vm1067_vm15, %v877_v14, %v878_v19  ;;  %v5005_v14 = vld [vmem:[#allocation8_spill] sm:$0xff]  ;;  %v5006_v19 = vld [vmem:[#allocation9_spill] sm:$0xff] }
 0x1ac   : > { %v3978_v35 = vcvt.s32.f32 %v1054_v3  ;;  %v1070_v25 = vshra.s32 %v3976_v51, 16 }
 0x1ad   : > { %v731_v55 = vpop.xlane.xlu0 %730 }
 0x1ae   : > { %vm815_vm1 = vcmp.eq.f32.partialorder %v3751_v45, %v731_v55  ;;  %vm816_vm2 = vcmp.eq.f32.partialorder %v3757_v52, %v731_v55  ;;  %1057 = vmin.xlane.f32.xlu0 %v3978_v35  ;;  %787 = vmin.xlane.f32.xlu1 %v786_v23  ;;  %v3992_v3 = vcvt.s32.f32 %v1070_v25  ;;  %v792_v25 = vmin.f32 %v3852_v12, %v3855_v38 }
 0x1af   : > { %v879_v2 = vsel %vm815_vm1, %v3866_v47, 256  ;;  %v880_v60 = vsel %vm816_vm2, %v3869_v21, 256  ;;  %v734_v11 = vpop.xlane.xlu1 %733 }
 0x1b0   : > { %vm1083_vm3 = vcmp.lt.s32.totalorder %v879_v2, %v880_v60  ;;  %vm817_vm4 = vcmp.eq.f32.partialorder %v5005_v14, %v734_v11  ;;  %vm818_vm5 = vcmp.eq.f32.partialorder %v5006_v19, %v734_v11  ;;  %v5008_v19 = vld [vmem:[#allocation10_spill] sm:$0xff] }
 0x1b1   : > { %v881_v45 = vsel %vm817_vm4, %v3866_v47, 256  ;;  %v882_v52 = vsel %vm818_vm5, %v3869_v21, 256  ;;  %v3996_v23 = vsel %vm1083_vm3, %v879_v2, %v880_v60  ;;  %v5009_v2 = vld [vmem:[#allocation11_spill] sm:$0xff] }
 0x1b2   : > { %vm1099_vm6 = vcmp.lt.s32.totalorder %v881_v45, %v882_v52  ;;  %790 = vmin.xlane.f32.xlu0 %v789_v16  ;;  %1073 = vmin.xlane.f32.xlu1 %v3992_v3  ;;  %v1086_v55 = vshra.s32 %v3996_v23, 16 }
 0x1b3   : > { %v4000_v57 = vsel %vm1099_vm6, %v881_v45, %v882_v52  ;;  %v5010_v52 = vld [vmem:[#allocation12_spill] sm:$0xff] }
 0x1b4   : > { %v4002_v0 = vcvt.s32.f32 %v1086_v55  ;;  %v1102_v11 = vshra.s32 %v4000_v57, 16  ;;  %v5011_v55 = vld [vmem:[#allocation13_spill] sm:$0xff] }
 0x1b5   : > { %v737_v14 = vpop.xlane.xlu0 %736 }
 0x1b6   : > { %5007 = vst [vmem:[#allocation8_spill] sm:$0xff] %v4002_v0  ;;  %vm819_vm7 = vcmp.eq.f32.partialorder %v5008_v19, %v737_v14  ;;  %vm820_vm8 = vcmp.eq.f32.partialorder %v5009_v2, %v737_v14  ;;  %1089 = vmin.xlane.f32.xlu0 %v4002_v0  ;;  %793 = vmin.xlane.f32.xlu1 %v792_v25  ;;  %v4014_v38 = vcvt.s32.f32 %v1102_v11  ;;  %v5014_v11 = vld [vmem:[#allocation14_spill] sm:$0xff] }
 0x1b7   : > { %v883_v16 = vsel %vm819_vm7, %v3866_v47, 256  ;;  %v884_v60 = vsel %vm820_vm8, %v3869_v21, 256  ;;  %v740_v45 = vpop.xlane.xlu1 %739 }
 0x1b8   : > { %vm1115_vm9 = vcmp.lt.s32.totalorder %v883_v16, %v884_v60  ;;  %vm821_vm10 = vcmp.eq.f32.partialorder %v5010_v52, %v740_v45  ;;  %vm822_vm11 = vcmp.eq.f32.partialorder %v5011_v55, %v740_v45  ;;  %5012 = vst [vmem:[#allocation9_spill] sm:$0xff] %v4014_v38  ;;  %v5015_v55 = vld [vmem:[#allocation15_spill] sm:$0xff] }
 0x1b9   : > { %v885_v12 = vsel %vm821_vm10, %v3866_v47, 256  ;;  %v886_v19 = vsel %vm822_vm11, %v3869_v21, 256  ;;  %v4018_v14 = vsel %vm1115_vm9, %v883_v16, %v884_v60 }
 0x1ba   : > { %5013 = vst [vmem:[#allocation10_spill] sm:$0xff] %v4018_v14  ;;  %vm1131_vm12 = vcmp.lt.s32.totalorder %v885_v12, %v886_v19  ;;  %1105 = vmin.xlane.f32.xlu1 %v4014_v38  ;;  %v1118_v25 = vshra.s32 %v4018_v14, 16 }
 0x1bb   : > { %v4022_v2 = vsel %vm1131_vm12, %v885_v12, %v886_v19  ;;  %v5016_v12 = vld [vmem:[#allocation16_spill] sm:$0xff] }
 0x1bc   : > { %v4024_v0 = vcvt.s32.f32 %v1118_v25  ;;  %v1134_v52 = vshra.s32 %v4022_v2, 16 }
 0x1bd   : > { %v743_v45 = vpop.xlane.xlu0 %742 }
 0x1be   : > { %vm823_vm13 = vcmp.eq.f32.partialorder %v5014_v11, %v743_v45  ;;  %vm824_vm14 = vcmp.eq.f32.partialorder %v5015_v55, %v743_v45  ;;  %1121 = vmin.xlane.f32.xlu0 %v4024_v0  ;;  %v4030_v16 = vcvt.s32.f32 %v1134_v52 }
 0x1bf   : > { %v887_v60 = vsel %vm823_vm13, %v3866_v47, 256  ;;  %v888_v38 = vsel %vm824_vm14, %v3869_v21, 256  ;;  %v746_v14 = vpop.xlane.xlu1 %745 }
 0x1c0   : > { %vm1147_vm15 = vcmp.lt.s32.totalorder %v887_v60, %v888_v38  ;;  %vm825_vm1 = vcmp.eq.f32.partialorder %v3824_v56, %v746_v14  ;;  %vm826_vm2 = vcmp.eq.f32.partialorder %v5016_v12, %v746_v14  ;;  %1137 = vmin.xlane.f32.xlu1 %v4030_v16 }
 0x1c1   : > { %v889_v19 = vsel %vm825_vm1, %v3866_v47, 256  ;;  %v890_v25 = vsel %vm826_vm2, %v3869_v21, 256  ;;  %v749_v45 = vpop.xlane.xlu0 %748  ;;  %v4039_v11 = vsel %vm1147_vm15, %v887_v60, %v888_v38 }
 0x1c2   : > { %5017 = vst [vmem:[#allocation11_spill] sm:$0xff] %v4039_v11  ;;  %vm1163_vm3 = vcmp.lt.s32.totalorder %v889_v19, %v890_v25  ;;  %vm827_vm4 = vcmp.eq.f32.partialorder %v3817_v36, %v749_v45  ;;  %vm828_vm5 = vcmp.eq.f32.partialorder %v3821_v27, %v749_v45  ;;  %v1150_v52 = vshra.s32 %v4039_v11, 16 }
 0x1c3   : > { %v891_v56 = vsel %vm827_vm4, %v3866_v47, 256  ;;  %v892_v14 = vsel %vm828_vm5, %v3869_v21, 256  ;;  %v752_v55 = vpop.xlane.xlu1 %751  ;;  %v4046_v12 = vsel %vm1163_vm3, %v889_v19, %v890_v25 }
 0x1c4   : > { %vm1179_vm6 = vcmp.lt.s32.totalorder %v891_v56, %v892_v14  ;;  %vm829_vm7 = vcmp.eq.f32.partialorder %v3831_v54, %v752_v55  ;;  %vm830_vm8 = vcmp.eq.f32.partialorder %v3837_v5, %v752_v55  ;;  %v4050_v38 = vcvt.s32.f32 %v1150_v52 }
 0x1c5   : > { %v893_v36 = vsel %vm829_vm7, %v3866_v47, 256  ;;  %v894_v27 = vsel %vm830_vm8, %v3869_v21, 256  ;;  %v755_v60 = vpop.xlane.xlu0 %754  ;;  %v1166_v45 = vshra.s32 %v4046_v12, 16  ;;  %v4055_v11 = vsel %vm1179_vm6, %v891_v56, %v892_v14 }
 0x1c6   : > { %vm1195_vm9 = vcmp.lt.s32.totalorder %v893_v36, %v894_v27  ;;  %vm831_vm10 = vcmp.eq.f32.partialorder %v3656_v20, %v755_v60  ;;  %vm832_vm11 = vcmp.eq.f32.partialorder %v3659_v22, %v755_v60  ;;  %1153 = vmin.xlane.f32.xlu0 %v4050_v38  ;;  %v1182_v54 = vshra.s32 %v4055_v11, 16 }
 0x1c7   : > { %v895_v5 = vsel %vm831_vm10, %v3866_v47, 256  ;;  %v896_v19 = vsel %vm832_vm11, %v3869_v21, 256  ;;  %v758_v25 = vpop.xlane.xlu1 %757  ;;  %v4063_v52 = vcvt.s32.f32 %v1166_v45  ;;  %v4065_v55 = vsel %vm1195_vm9, %v893_v36, %v894_v27 }
 0x1c8   : > { %vm1211_vm12 = vcmp.lt.s32.totalorder %v895_v5, %v896_v19  ;;  %vm833_vm13 = vcmp.eq.f32.partialorder %v3664_v26, %v758_v25  ;;  %vm834_vm14 = vcmp.eq.f32.partialorder %v3670_v30, %v758_v25  ;;  %v4069_v20 = vcvt.s32.f32 %v1182_v54  ;;  %v3303_v25 = vld [vmem:[%s4957_s4] sm:$0xff]  }
 0x1c9   : > { %v897_v22 = vsel %vm833_vm13, %v3866_v47, 256  ;;  %v898_v56 = vsel %vm834_vm14, %v3869_v21, 256  ;;  %1169 = vmin.xlane.f32.xlu1 %v4063_v52  ;;  %v1198_v14 = vshra.s32 %v4065_v55, 16  ;;  %v4075_v60 = vsel %vm1211_vm12, %v895_v5, %v896_v19  ;;  %v3301_v5 = vld [vmem:[%s4957_s4 + $0x40] sm:$0xff]  }
 0x1ca   : > { %vm1227_vm15 = vcmp.lt.s32.totalorder %v897_v22, %v898_v56  ;;  %1185 = vmin.xlane.f32.xlu0 %v4069_v20  ;;  %v1214_v36 = vshra.s32 %v4075_v60, 16  ;;  %v3302_v19 = vld [vmem:[%s4956_s3 + $0x40] sm:$0xff]   ;;  %3026 = vmatprep.subr.bf16.mxu1 %v3301_v5  ;;  %v3310_v5 = vld [vmem:[%s4956_s3 + $0x50] sm:$0xff]  }
 0x1cb   : > { %v4079_v26 = vcvt.s32.f32 %v1198_v14  ;;  %v4081_v30 = vsel %vm1227_vm15, %v897_v22, %v898_v56  ;;  %v3304_v22 = vld [vmem:[%s4956_s3] sm:$0xff]   ;;  %v3305_v56 = vld [vmem:[%s4957_s4 + $0x48] sm:$0xff]   ;;  %3138 = vmatprep.subr.bf16.mxu0 %v3302_v19  ;;  %3027 = vmatpush3.bf16.msra.mxu1 %v3303_v25  ;;  %v3311_v19 = vld [vmem:[%s4957_s4 + $0x10] sm:$0xff]  }
 0x1cc   : > { %v4083_v27 = vcvt.s32.f32 %v1214_v36  ;;  %v1230_v45 = vshra.s32 %v4081_v30, 16  ;;  %v3306_v14 = vld [vmem:[%s4956_s3 + $0x48] sm:$0xff]   ;;  %3139 = vmatpush3.bf16.msra.mxu0 %v3304_v22  ;;  %3028 = vmatprep.subr.bf16.mxu1 %v3305_v56  ;;  %v3312_v25 = vld [vmem:[%s4956_s3 + $0x10] sm:$0xff]   ;;  %v3313_v22 = vld [vmem:[%s4957_s4 + $0x58] sm:$0xff]  }
 0x1cd   : > { %5018 = vst [vmem:[#allocation12_spill] sm:$0xff] %v4079_v26  ;;  %1201 = vmin.xlane.f32.xlu1 %v4079_v26  ;;  %v3307_v36 = vld [vmem:[%s4957_s4 + $0x8] sm:$0xff]   ;;  %3140 = vmatprep.subr.bf16.mxu0 %v3306_v14  ;;  %v3314_v56 = vld [vmem:[%s4956_s3 + $0x58] sm:$0xff]  }
 0x1ce   : > { %5019 = vst [vmem:[#allocation13_spill] sm:$0xff] %v4083_v27  ;;  %1217 = vmin.xlane.f32.xlu0 %v4083_v27  ;;  %v4088_v54 = vcvt.s32.f32 %v1230_v45  ;;  %v3308_v45 = vld [vmem:[%s4956_s3 + $0x8] sm:$0xff]   ;;  %v3315_v14 = vld [vmem:[%s4957_s4 + $0x18] sm:$0xff]   ;;  %v941_v27 = vand.u32 65535, %v3884_v53 }
 0x1cf   : > { %3029 = vmatpush3.bf16.msra.mxu1 %v3307_v36  ;;  %v3316_v36 = vld [vmem:[%s4956_s3 + $0x18] sm:$0xff]  }
 0x1d0   : > { %5020 = vst [vmem:[#allocation14_spill] sm:$0xff] %v4088_v54  ;;  %3141 = vmatpush3.bf16.msra.mxu0 %v3308_v45  ;;  %v3318_v45 = vld [vmem:[%s4956_s3 + $0x60] sm:$0xff]  }
 0x1d1   : > { %1233 = vmin.xlane.f32.xlu1 %v4088_v54  ;;  %v3309_v54 = vld [vmem:[%s4957_s4 + $0x50] sm:$0xff]   ;;  %3142 = vmatprep.subr.bf16.mxu0 %v3310_v5  ;;  %v3319_v5 = vld [vmem:[%s4957_s4 + $0x20] sm:$0xff]  }
 0x1d2   : > { %3030 = vmatprep.subr.bf16.mxu1 %v3309_v54  ;;  %v3317_v54 = vld [vmem:[%s4957_s4 + $0x60] sm:$0xff]  }
 0x1d3   : > { %3031 = vmatpush3.bf16.msra.mxu1 %v3311_v19  ;;  %v3320_v19 = vld [vmem:[%s4956_s3 + $0x20] sm:$0xff]  }
 0x1d4   : > { %3143 = vmatpush3.bf16.msra.mxu0 %v3312_v25  ;;  %3032 = vmatprep.subr.bf16.mxu1 %v3313_v22  ;;  %v3321_v25 = vld [vmem:[%s4957_s4 + $0x68] sm:$0xff]  }
 0x1d5   : > { %3144 = vmatprep.subr.bf16.mxu0 %v3314_v56  ;;  %v3322_v22 = vld [vmem:[%s4956_s3 + $0x68] sm:$0xff]   ;;  %v761_v56 = vpop.xlane.xlu0 %760 }
 0x1d6   : > { %vm835_vm1 = vcmp.eq.f32.partialorder %v3686_v39, %v761_v56  ;;  %vm836_vm2 = vcmp.eq.f32.partialorder %v3689_v41, %v761_v56 }
 0x1d7   : > { %3033 = vmatpush3.bf16.msra.mxu1 %v3315_v14  ;;  %v764_v14 = vpop.xlane.xlu1 %763 }
 0x1d8   : > { %3145 = vmatpush3.bf16.msra.mxu0 %v3316_v36  ;;  %3034 = vmatprep.subr.bf16.mxu1 %v3317_v54  ;;  %v899_v36 = vsel %vm835_vm1, %v3866_v47, 256  ;;  %v900_v54 = vsel %vm836_vm2, %v3869_v21, 256  ;;  %vm837_vm3 = vcmp.eq.f32.partialorder %v3692_v44, %v764_v14 }
 0x1d9   : > { %3146 = vmatprep.subr.bf16.mxu0 %v3318_v45  ;;  %v5021_v45 = vld [vmem:[#allocation6_spill] sm:$0xff]  ;;  %vm1243_vm5 = vcmp.lt.s32.totalorder %v899_v36, %v900_v54 }
 0x1da   : > { %vm838_vm4 = vcmp.eq.f32.partialorder %v5021_v45, %v764_v14 }
 0x1db   : > { %3035 = vmatpush3.bf16.msra.mxu1 %v3319_v5  ;;  %v901_v5 = vsel %vm837_vm3, %v3866_v47, 256 }
 0x1dc   : > { %3147 = vmatpush3.bf16.msra.mxu0 %v3320_v19  ;;  %3036 = vmatprep.subr.bf16.mxu1 %v3321_v25  ;;  %v902_v19 = vsel %vm838_vm4, %v3869_v21, 256  ;;  %v925_v25 = vand.u32 65535, %v3875_v48 }
 0x1dd   : > { %3148 = vmatprep.subr.bf16.mxu0 %v3322_v22  ;;  %v4166_v22 = vsel %vm1243_vm5, %v899_v36, %v900_v54  ;;  %vm1259_vm6 = vcmp.lt.s32.totalorder %v901_v5, %v902_v19  ;;  %v943_v36 = vcvt.s32.f32 %v941_v27  ;;  %v957_v54 = vand.u32 65535, %v3896_v58 }
 0x1de   : > { %v927_v41 = vcvt.s32.f32 %v925_v25  ;;  %v1246_v56 = vshra.s32 %v4166_v22, 16  ;;  %v4174_v14 = vsel %vm1259_vm6, %v901_v5, %v902_v19 }
 0x1e0   : > { %v4178_v48 = vcvt.s32.f32 %v1246_v56 }
 0x21b   : > { %v4168_v39 = vpop.xlane.xlu0 %929 }
 0x21c   : > { %vm931_vm7 = vcmp.eq.f32.partialorder %v3882_v63, %v4168_v39  ;;  %v1262_v63 = vshra.s32 %v4174_v14, 16 }
 0x21d   : > { %v932_v44 = vsel %vm931_vm7, %v927_v41, inf }
 0x21e   : > { %933 = vmin.xlane.f32.xlu0 %v932_v44 }
 0x21f   : > { %v767_v45 = vpop.xlane.xlu0 %766  ;;  %v4176_v26 = vpop.xlane.xlu1 %945 }
 0x220   : > { %vm839_vm8 = vcmp.eq.f32.partialorder %v3714_v62, %v767_v45  ;;  %vm840_vm9 = vcmp.eq.f32.partialorder %v3717_v1, %v767_v45  ;;  %vm947_vm10 = vcmp.eq.f32.partialorder %v3894_v7, %v4176_v26  ;;  %v959_v62 = vcvt.s32.f32 %v957_v54  ;;  %v5022_v54 = vld [vmem:[#allocation7_spill] sm:$0xff] }
 0x221   : > { %v903_v53 = vsel %vm839_vm8, %v3866_v47, 256  ;;  %v904_v5 = vsel %vm840_vm9, %v3869_v21, 256  ;;  %v948_v19 = vsel %vm947_vm10, %v943_v36, inf  ;;  %v973_v1 = vand.u32 65535, %v3908_v6 }
 0x222   : > { %vm1275_vm11 = vcmp.lt.s32.totalorder %v903_v53, %v904_v5  ;;  %1249 = vmin.xlane.f32.xlu0 %v4178_v48  ;;  %949 = vmin.xlane.f32.xlu1 %v948_v19  ;;  %v4198_v7 = vcvt.s32.f32 %v1262_v63  ;;  %v989_v36 = vand.u32 65535, %v3924_v61 }
 0x223   : > { %v4189_v27 = vpop.xlane.xlu0 %961  ;;  %v770_v58 = vpop.xlane.xlu1 %769  ;;  %v4191_v25 = vsel %vm1275_vm11, %v903_v53, %v904_v5 }
 0x224   : > { %vm841_vm12 = vcmp.eq.f32.partialorder %v3720_v9, %v770_v58  ;;  %vm842_vm13 = vcmp.eq.f32.partialorder %v3726_v18, %v770_v58  ;;  %vm963_vm14 = vcmp.eq.f32.partialorder %v3904_v59, %v4189_v27  ;;  %v1278_v45 = vshra.s32 %v4191_v25, 16 }
 0x225   : > { %v905_v41 = vsel %vm841_vm12, %v3866_v47, 256  ;;  %v906_v56 = vsel %vm842_vm13, %v3869_v21, 256  ;;  %v964_v44 = vsel %vm963_vm14, %v959_v62, inf  ;;  %v975_v18 = vcvt.s32.f32 %v973_v1 }
 0x226   : > { %vm1291_vm15 = vcmp.lt.s32.totalorder %v905_v41, %v906_v56  ;;  %965 = vmin.xlane.f32.xlu0 %v964_v44  ;;  %1265 = vmin.xlane.f32.xlu1 %v4198_v7  ;;  %v4211_v63 = vcvt.s32.f32 %v1278_v45  ;;  %v991_v62 = vcvt.s32.f32 %v989_v36 }
 0x227   : > { %v773_v6 = vpop.xlane.xlu0 %772  ;;  %v4204_v9 = vpop.xlane.xlu1 %977  ;;  %v4207_v59 = vsel %vm1291_vm15, %v905_v41, %v906_v56  ;;  %v1005_v41 = vand.u32 65535, %v3928_v10 }
 0x228   : > { %vm843_vm1 = vcmp.eq.f32.partialorder %v3742_v34, %v773_v6  ;;  %vm844_vm2 = vcmp.eq.f32.partialorder %v5022_v54, %v773_v6  ;;  %vm979_vm3 = vcmp.eq.f32.partialorder %v3920_v28, %v4204_v9  ;;  %v1294_v58 = vshra.s32 %v4207_v59, 16  ;;  %v3323_v54 = vld [vmem:[%s4957_s4 + $0x28] sm:$0xff]  }
 0x229   : > { %v907_v53 = vsel %vm843_vm1, %v3866_v47, 256  ;;  %v908_v5 = vsel %vm844_vm2, %v3869_v21, 256  ;;  %v980_v19 = vsel %vm979_vm3, %v975_v18, inf  ;;  %v1021_v18 = vand.u32 65535, %v3948_v13  ;;  %v3325_v13 = vld [vmem:[%s4957_s4 + $0x70] sm:$0xff]   ;;  %3037 = vmatpush3.bf16.msra.mxu1 %v3323_v54 }
 0x22a   : > { %vm1307_vm4 = vcmp.lt.s32.totalorder %v907_v53, %v908_v5  ;;  %1281 = vmin.xlane.f32.xlu0 %v4211_v63  ;;  %981 = vmin.xlane.f32.xlu1 %v980_v19  ;;  %v4228_v28 = vcvt.s32.f32 %v1294_v58 }
 0x22b   : > { %v4219_v61 = vpop.xlane.xlu0 %993  ;;  %v776_v34 = vpop.xlane.xlu1 %775  ;;  %v4221_v1 = vsel %vm1307_vm4, %v907_v53, %v908_v5  ;;  %v3324_v53 = vld [vmem:[%s4956_s3 + $0x28] sm:$0xff]   ;;  %3038 = vmatprep.subr.bf16.mxu1 %v3325_v13  ;;  %v1053_v13 = vand.u32 65535, %v3972_v49  ;;  %v3332_v49 = vld [vmem:[%s4956_s3 + $0x38] sm:$0xff]  }
 0x22c   : > { %vm845_vm5 = vcmp.eq.f32.partialorder %v3748_v42, %v776_v34  ;;  %vm846_vm6 = vcmp.eq.f32.partialorder %v3754_v50, %v776_v34  ;;  %vm995_vm7 = vcmp.eq.f32.partialorder %v3930_v37, %v4219_v61  ;;  %v1310_v6 = vshra.s32 %v4221_v1, 16  ;;  %3149 = vmatpush3.bf16.msra.mxu0 %v3324_v53 }
 0x22d   : > { %v909_v56 = vsel %vm845_vm5, %v3866_v47, 256  ;;  %v910_v44 = vsel %vm846_vm6, %v3869_v21, 256  ;;  %v996_v45 = vsel %vm995_vm7, %v991_v62, inf  ;;  %v1007_v50 = vcvt.s32.f32 %v1005_v41 }
 0x22e   : > { %vm1323_vm8 = vcmp.lt.s32.totalorder %v909_v56, %v910_v44  ;;  %997 = vmin.xlane.f32.xlu0 %v996_v45  ;;  %1297 = vmin.xlane.f32.xlu1 %v4228_v28  ;;  %v4241_v36 = vcvt.s32.f32 %v1310_v6  ;;  %v1023_v62 = vcvt.s32.f32 %v1021_v18 }
 0x22f   : > { %v779_v10 = vpop.xlane.xlu0 %778  ;;  %v4234_v42 = vpop.xlane.xlu1 %1009  ;;  %v4237_v37 = vsel %vm1323_vm8, %v909_v56, %v910_v44  ;;  %v1037_v56 = vand.u32 65535, %v3952_v33 }
 0x230   : > { %vm847_vm9 = vcmp.eq.f32.partialorder %v3770_v15, %v779_v10  ;;  %vm848_vm10 = vcmp.eq.f32.partialorder %v3773_v24, %v779_v10  ;;  %vm1011_vm11 = vcmp.eq.f32.partialorder %v3944_v31, %v4234_v42  ;;  %v1326_v19 = vshra.s32 %v4237_v37, 16  ;;  %v3326_v31 = vld [vmem:[%s4956_s3 + $0x70] sm:$0xff]  }
 0x231   : > { %v911_v15 = vsel %vm847_vm9, %v3866_v47, 256  ;;  %v912_v24 = vsel %vm848_vm10, %v3869_v21, 256  ;;  %v1012_v5 = vsel %vm1011_vm11, %v1007_v50, inf  ;;  %3150 = vmatprep.subr.bf16.mxu0 %v3326_v31  ;;  %v3330_v50 = vld [vmem:[%s4956_s3 + $0x78] sm:$0xff]   ;;  %v1039_v53 = vcvt.s32.f32 %v1037_v56 }
 0x232   : > { %vm1339_vm12 = vcmp.lt.s32.totalorder %v911_v15, %v912_v24  ;;  %1313 = vmin.xlane.f32.xlu0 %v4241_v36  ;;  %1013 = vmin.xlane.f32.xlu1 %v1012_v5  ;;  %v4270_v44 = vcvt.s32.f32 %v1326_v19  ;;  %v3331_v5 = vld [vmem:[%s4957_s4 + $0x38] sm:$0xff]  }
 0x233   : > { %v4261_v58 = vpop.xlane.xlu0 %1025  ;;  %v782_v34 = vpop.xlane.xlu1 %781  ;;  %v4263_v41 = vsel %vm1339_vm12, %v911_v15, %v912_v24 }
 0x234   : > { %vm849_vm13 = vcmp.eq.f32.partialorder %v3776_v32, %v782_v34  ;;  %vm850_vm14 = vcmp.eq.f32.partialorder %v3782_v43, %v782_v34  ;;  %vm1027_vm15 = vcmp.eq.f32.partialorder %v3954_v17, %v4261_v58  ;;  %v1342_v33 = vshra.s32 %v4263_v41, 16  ;;  %v3327_v32 = vld [vmem:[%s4957_s4 + $0x30] sm:$0xff]   ;;  %v3329_v17 = vld [vmem:[%s4957_s4 + $0x78] sm:$0xff]  }
 0x235   : > { %v913_v45 = vsel %vm849_vm13, %v3866_v47, 256  ;;  %v914_v6 = vsel %vm850_vm14, %v3869_v21, 256  ;;  %v1028_v10 = vsel %vm1027_vm15, %v1023_v62, inf  ;;  %v3328_v43 = vld [vmem:[%s4956_s3 + $0x30] sm:$0xff]   ;;  %3039 = vmatpush3.bf16.msra.mxu1 %v3327_v32  ;;  %v1055_v62 = vcvt.s32.f32 %v1053_v13 }
 0x236   : > { %vm1355_vm1 = vcmp.lt.s32.totalorder %v913_v45, %v914_v6  ;;  %1029 = vmin.xlane.f32.xlu0 %v1028_v10  ;;  %1329 = vmin.xlane.f32.xlu1 %v4270_v44  ;;  %v4295_v24 = vcvt.s32.f32 %v1342_v33 }
 0x237   : > { %v785_v18 = vpop.xlane.xlu0 %784  ;;  %v4288_v54 = vpop.xlane.xlu1 %1041  ;;  %v4291_v15 = vsel %vm1355_vm1, %v913_v45, %v914_v6  ;;  %3151 = vmatpush3.bf16.msra.mxu0 %v3328_v43  ;;  %3040 = vmatprep.subr.bf16.mxu1 %v3329_v17  ;;  %v1069_v45 = vand.u32 65535, %v3976_v51  ;;  %v1085_v17 = vand.u32 65535, %v3996_v23 }
 0x238   : > { %vm851_vm2 = vcmp.eq.f32.partialorder %v3798_v29, %v785_v18  ;;  %vm852_vm3 = vcmp.eq.f32.partialorder %v3801_v40, %v785_v18  ;;  %vm1043_vm4 = vcmp.eq.f32.partialorder %v3968_v46, %v4288_v54  ;;  %3152 = vmatprep.subr.bf16.mxu0 %v3330_v50  ;;  %v1358_v31 = vshra.s32 %v4291_v15, 16  ;;  %v5023_v50 = vld [vmem:[#allocation17_spill] sm:$0xff]  ;;  %v5024_v18 = vld [vmem:[#allocation18_spill] sm:$0xff] }
 0x239   : > { %v915_v19 = vsel %vm851_vm2, %v3866_v47, 256  ;;  %v916_v29 = vsel %vm852_vm3, %v3869_v21, 256  ;;  %v1044_v40 = vsel %vm1043_vm4, %v1039_v53, inf  ;;  %3041 = vmatpush3.bf16.msra.mxu1 %v3331_v5 }
 0x23a   : > { %vm1371_vm5 = vcmp.lt.s32.totalorder %v915_v19, %v916_v29  ;;  %1345 = vmin.xlane.f32.xlu0 %v4295_v24  ;;  %1045 = vmin.xlane.f32.xlu1 %v1044_v40  ;;  %v4318_v6 = vcvt.s32.f32 %v1358_v31  ;;  %v1087_v40 = vcvt.s32.f32 %v1085_v17  ;;  %v5028_v17 = vld [vmem:[#allocation10_spill] sm:$0xff] }
 0x23b   : > { %v4309_v46 = vpop.xlane.xlu0 %1057  ;;  %v788_v34 = vpop.xlane.xlu1 %787  ;;  %v4311_v56 = vsel %vm1371_vm5, %v915_v19, %v916_v29  ;;  %3153 = vmatpush3.bf16.msra.mxu0 %v3332_v49 }
 0x23c   : > { %vm853_vm6 = vcmp.eq.f32.partialorder %v3804_v4, %v788_v34  ;;  %vm854_vm7 = vcmp.eq.f32.partialorder %v3810_v8, %v788_v34  ;;  %vm1059_vm8 = vcmp.eq.f32.partialorder %v3978_v35, %v4309_v46  ;;  %v1374_v43 = vshra.s32 %v4311_v56, 16 }
 0x23d   : > { %v917_v10 = vsel %vm853_vm6, %v3866_v47, 256  ;;  %v918_v33 = vsel %vm854_vm7, %v3869_v21, 256  ;;  %v1060_v32 = vsel %vm1059_vm8, %v1055_v62, inf  ;;  %v1071_v8 = vcvt.s32.f32 %v1069_v45  ;;  %v5026_v62 = vld [vmem:[#allocation20_spill] sm:$0xff] }
 0x23e   : > { %vm1387_vm9 = vcmp.lt.s32.totalorder %v917_v10, %v918_v33  ;;  %1061 = vmin.xlane.f32.xlu0 %v1060_v32  ;;  %1361 = vmin.xlane.f32.xlu1 %v4318_v6  ;;  %v4331_v53 = vcvt.s32.f32 %v1374_v43  ;;  %v1101_v34 = vand.u32 65535, %v4000_v57  ;;  %v5027_v45 = vld [vmem:[#allocation8_spill] sm:$0xff] }
 0x23f   : > { %v791_v51 = vpop.xlane.xlu0 %790  ;;  %v4324_v4 = vpop.xlane.xlu1 %1073  ;;  %v4327_v35 = vsel %vm1387_vm9, %v917_v10, %v918_v33 }
 0x240   : > { %vm855_vm10 = vcmp.eq.f32.partialorder %v5023_v50, %v791_v51  ;;  %vm856_vm11 = vcmp.eq.f32.partialorder %v5024_v18, %v791_v51  ;;  %vm1075_vm12 = vcmp.eq.f32.partialorder %v3992_v3, %v4324_v4  ;;  %v1390_v19 = vshra.s32 %v4327_v35, 16  ;;  %v5025_v3 = vld [vmem:[#allocation19_spill] sm:$0xff] }
 0x241   : > { %v919_v13 = vsel %vm855_vm10, %v3866_v47, 256  ;;  %v920_v5 = vsel %vm856_vm11, %v3869_v21, 256  ;;  %v1076_v49 = vsel %vm1075_vm12, %v1071_v8, inf  ;;  %v1103_v8 = vcvt.s32.f32 %v1101_v34 }
 0x242   : > { %vm1403_vm13 = vcmp.lt.s32.totalorder %v919_v13, %v920_v5  ;;  %1377 = vmin.xlane.f32.xlu0 %v4331_v53  ;;  %1077 = vmin.xlane.f32.xlu1 %v1076_v49  ;;  %v4348_v10 = vcvt.s32.f32 %v1390_v19  ;;  %v1117_v50 = vand.u32 65535, %v5028_v17  ;;  %v1133_v34 = vand.u32 65535, %v4022_v2 }
 0x243   : > { %v4339_v23 = vpop.xlane.xlu0 %1089  ;;  %v794_v29 = vpop.xlane.xlu1 %793  ;;  %v4341_v31 = vsel %vm1403_vm13, %v919_v13, %v920_v5  ;;  %v5029_v5 = vld [vmem:[#allocation9_spill] sm:$0xff]  ;;  %v1165_v2 = vand.u32 65535, %v4046_v12  ;;  %v1181_v17 = vand.u32 65535, %v4055_v11  ;;  %vm1435_vm12 = vcmask 7168  }
 0x244   : > { %vm857_vm14 = vcmp.eq.f32.partialorder %v5025_v3, %v794_v29  ;;  %vm858_vm15 = vcmp.eq.f32.partialorder %v5026_v62, %v794_v29  ;;  %vm1091_vm1 = vcmp.eq.f32.partialorder %v5027_v45, %v4339_v23  ;;  %v1406_v51 = vshra.s32 %v4341_v31, 16 }
 0x245   : > { %v921_v33 = vsel %vm857_vm14, %v3866_v47, 256  ;;  %v922_v32 = vsel %vm858_vm15, %v3869_v21, 256  ;;  %v1092_v43 = vsel %vm1091_vm1, %v1087_v40, inf  ;;  %v1119_v40 = vcvt.s32.f32 %v1117_v50 }
 0x246   : > { %vm1419_vm2 = vcmp.lt.s32.totalorder %v921_v33, %v922_v32  ;;  %1093 = vmin.xlane.f32.xlu0 %v1092_v43  ;;  %1393 = vmin.xlane.f32.xlu1 %v4348_v10  ;;  %v4359_v13 = vcvt.s32.f32 %v1406_v51  ;;  %v1183_v12 = vcvt.s32.f32 %v1181_v17  ;;  %v936_v17 = vcvt.f32.s32 %v4168_v39 }
 0x247   : > { %v4354_v57 = vpop.xlane.xlu1 %1105  ;;  %v4357_v18 = vsel %vm1419_vm2, %v921_v33, %v922_v32  ;;  %v1135_v33 = vcvt.s32.f32 %v1133_v34  ;;  %v5030_v32 = vld [vmem:[#allocation11_spill] sm:$0xff] }
 0x248   : > { %vm1107_vm3 = vcmp.eq.f32.partialorder %v5029_v5, %v4354_v57  ;;  %v1422_v49 = vshra.s32 %v4357_v18, 16  ;;  %v1149_v43 = vand.u32 65535, %v5030_v32  ;;  %v5031_v32 = vld [vmem:[#allocation12_spill] sm:$0xff] }
 0x249   : > { %v1108_v19 = vsel %vm1107_vm3, %v1103_v8, inf }
 0x24a   : > { %1409 = vmin.xlane.f32.xlu0 %v4359_v13  ;;  %1109 = vmin.xlane.f32.xlu1 %v1108_v19  ;;  %v4370_v3 = vcvt.s32.f32 %v1422_v49  ;;  %v1197_v49 = vand.u32 65535, %v4065_v55  ;;  %v1229_v55 = vand.u32 65535, %v4081_v30 }
 0x24b   : > { %v4365_v29 = vpop.xlane.xlu0 %1121 }
 0x24c   : > { %vm1123_vm4 = vcmp.eq.f32.partialorder %v4024_v0, %v4365_v29  ;;  %v1151_v0 = vcvt.s32.f32 %v1149_v43 }
 0x24d   : > { %v4372_v62 = vpop.xlane.xlu1 %1137  ;;  %v1124_v45 = vsel %vm1123_vm4, %v1119_v40, inf  ;;  %v1213_v40 = vand.u32 65535, %v4075_v60  ;;  %v5032_v60 = vld [vmem:[#allocation13_spill] sm:$0xff] }
 0x24e   : > { %1125 = vmin.xlane.f32.xlu0 %v1124_v45  ;;  %1425 = vmin.xlane.f32.xlu1 %v4370_v3  ;;  %vm1139_vm5 = vcmp.eq.f32.partialorder %v4030_v16, %v4372_v62  ;;  %v1167_v16 = vcvt.s32.f32 %v1165_v2  ;;  %v1199_v45 = vcvt.s32.f32 %v1197_v49  ;;  %v1231_v2 = vcvt.s32.f32 %v1229_v55 }
 0x24f   : > { %v1140_v51 = vsel %vm1139_vm5, %v1135_v33, inf  ;;  %v937_v49 = vshll.u32 %v936_v17, 16  ;;  %v1000_v17 = vcvt.f32.s32 %v4219_v61 }
 0x252   : > { %1141 = vmin.xlane.f32.xlu1 %v1140_v51 }
 0x253   : > { %v4379_v8 = vpop.xlane.xlu0 %1153 }
 0x254   : > { %vm1155_vm6 = vcmp.eq.f32.partialorder %v4050_v38, %v4379_v8 }
 0x255   : > { %v1156_v50 = vsel %vm1155_vm6, %v1151_v0, inf  ;;  %v5033_v0 = vld [vmem:[#allocation14_spill] sm:$0xff] }
 0x256   : > { %v4384_v5 = vpop.xlane.xlu1 %1169  ;;  %1157 = vmin.xlane.f32.xlu0 %v1156_v50 }
 0x257   : > { %v4387_v19 = vpop.xlane.xlu0 %1185  ;;  %vm1171_vm7 = vcmp.eq.f32.partialorder %v4063_v52, %v4384_v5  ;;  %v1215_v52 = vcvt.s32.f32 %v1213_v40 }
 0x258   : > { %v1172_v34 = vsel %vm1171_vm7, %v1167_v16, inf  ;;  %vm1187_vm8 = vcmp.eq.f32.partialorder %v4069_v20, %v4387_v19  ;;  %v1245_v16 = vand.u32 65535, %v4166_v22 }
 0x259   : > { %1173 = vmin.xlane.f32.xlu1 %v1172_v34  ;;  %v1188_v11 = vsel %vm1187_vm8, %v1183_v12, inf  ;;  %v952_v12 = vcvt.f32.s32 %v4176_v26 }
 0x25a   : > { %v4394_v38 = vpop.xlane.xlu1 %1201  ;;  %1189 = vmin.xlane.f32.xlu0 %v1188_v11  ;;  %v1261_v11 = vand.u32 65535, %v4174_v14  ;;  %v1247_v22 = vcvt.s32.f32 %v1245_v16  ;;  %v984_v14 = vcvt.f32.s32 %v4204_v9 }
 0x25b   : > { %v4397_v33 = vpop.xlane.xlu0 %1217  ;;  %vm1203_vm9 = vcmp.eq.f32.partialorder %v5031_v32, %v4394_v38  ;;  %v953_v32 = vshll.u32 %v952_v12, 16 }
 0x25c   : > { %v1204_v43 = vsel %vm1203_vm9, %v1199_v45, inf  ;;  %vm1219_vm10 = vcmp.eq.f32.partialorder %v5032_v60, %v4397_v33  ;;  %v968_v45 = vcvt.f32.s32 %v4189_v27  ;;  %v1263_v60 = vcvt.s32.f32 %v1261_v11 }
 0x25d   : > { %1205 = vmin.xlane.f32.xlu1 %v1204_v43  ;;  %v1220_v20 = vsel %vm1219_vm10, %v1215_v52, inf }
 0x25e   : > { %v4403_v51 = vpop.xlane.xlu1 %1233  ;;  %1221 = vmin.xlane.f32.xlu0 %v1220_v20  ;;  %v969_v20 = vshll.u32 %v968_v45, 16  ;;  %v1016_v45 = vcvt.f32.s32 %v4234_v42 }
 0x25f   : > { %vm1235_vm11 = vcmp.eq.f32.partialorder %v5033_v0, %v4403_v51  ;;  %v1277_v0 = vand.u32 65535, %v4191_v25 }
 0x260   : > { %v1236_v30 = vsel %vm1235_vm11, %v1231_v2, inf }
 0x261   : > { %1237 = vmin.xlane.f32.xlu1 %v1236_v30  ;;  %v1279_v12 = vcvt.s32.f32 %v1277_v0 }
 0x2ab   : > { %v934_v50 = vpop.xlane.xlu0 %933 }
 0x2ac   : > { %v935_v40 = vcvt.f32.s32 %v934_v50  ;;  %v3430_v50 = vmov 1.0|1.0  }
 0x2ae   : > { %v938_v34 = vadd.s32 %v937_v49, %v935_v40  ;;  %v1293_v40 = vand.u32 65535, %v4207_v59  ;;  %v1001_v59 = vshll.u32 %v1000_v17, 16  ;;  %v1341_v17 = vand.u32 65535, %v4263_v41 }
 0x2af   : > { %v4418_v39 = vpop.xlane.xlu0 %1249  ;;  %v950_v55 = vpop.xlane.xlu1 %949  ;;  %v1064_v41 = vcvt.f32.s32 %v4309_v46 }
 0x2b0   : > { %1436 = vst.msk [vmem:[%s4414_s20] sm:$0xff] %vm1435_vm12, %v938_v34  ;;  %v951_v26 = vcvt.f32.s32 %v950_v55  ;;  %vm1251_vm13 = vcmp.eq.f32.partialorder %v4178_v48, %v4418_v39  ;;  %vm1468_vm14 = vcmp.eq.s32.totalorder %v3866_v47, %v938_v34  ;;  %vm1469_vm3 = vcmp.eq.s32.totalorder %v3869_v21, %v938_v34 }
 0x2b1   : > { %v1252_v52 = vsel %vm1251_vm13, %v1247_v22, inf  ;;  %v985_v34 = vshll.u32 %v984_v14, 16  ;;  %v1017_v14 = vshll.u32 %v1016_v45, 16  ;;  %v1048_v48 = vcvt.f32.s32 %v4288_v54 }
 0x2b2   : > { %v954_v43 = vadd.s32 %v953_v32, %v951_v26  ;;  %1253 = vmin.xlane.f32.xlu0 %v1252_v52  ;;  %v1295_v32 = vcvt.s32.f32 %v1293_v40  ;;  %v1309_v26 = vand.u32 65535, %v4221_v1  ;;  %v1032_v1 = vcvt.f32.s32 %v4261_v58 }
 0x2b3   : > { %v966_v27 = vpop.xlane.xlu0 %965  ;;  %v4425_v2 = vpop.xlane.xlu1 %1265  ;;  %v1080_v45 = vcvt.f32.s32 %v4324_v4 }
 0x2b4   : > { %1437 = vst.msk [vmem:[%s4414_s20 + $0x8] sm:$0xff] %vm1435_vm12, %v954_v43  ;;  %vm1470_vm15 = vcmp.eq.s32.totalorder %v3866_v47, %v954_v43  ;;  %v967_v30 = vcvt.f32.s32 %v966_v27  ;;  %vm1471_vm1 = vcmp.eq.s32.totalorder %v3869_v21, %v954_v43  ;;  %vm1267_vm4 = vcmp.eq.f32.partialorder %v4198_v7, %v4425_v2 }
 0x2b5   : > { %vm4433_vm2 = vmpackc.low %vm1470_vm15, %vm1468_vm14  ;;  %v1268_v9 = vsel %vm1267_vm4, %v1263_v60, inf }
 0x2b6   : > { %v970_v25 = vadd.s32 %v969_v20, %v967_v30  ;;  %vm2878_vm5 = vmpackc.low %vm1471_vm1, %vm1469_vm3  ;;  %1269 = vmin.xlane.f32.xlu1 %v1268_v9  ;;  %v1325_v20 = vand.u32 65535, %v4237_v37  ;;  %v1033_v30 = vshll.u32 %v1032_v1, 16  ;;  %v1389_v1 = vand.u32 65535, %v4327_v35 }
 0x2b7   : > { %2879 = vmatprep.mubr.msk.bf16.mxu1 %vm2878_vm5, %v3430_v50  ;;  %2959 = vmatprep.mubr.msk.bf16.mxu0 %vm2878_vm5, %v3430_v50  ;;  %v4443_v16 = vpop.xlane.xlu0 %1281  ;;  %v982_v49 = vpop.xlane.xlu1 %981 }
 0x2b8   : > { %1438 = vst.msk [vmem:[%s4414_s20 + $0x10] sm:$0xff] %vm1435_vm12, %v970_v25  ;;  %2881 = vmatmul.mubr.msk.bf16.vlgmr.msra.gmra.mrb[32].mxu1 %vm4433_vm2, %v3430_v50  ;;  %v983_v7 = vcvt.f32.s32 %v982_v49  ;;  %vm1283_vm6 = vcmp.eq.f32.partialorder %v4211_v63, %v4443_v16  ;;  %2961 = vmatmul.mubr.msk.bf16.vlgmr.msra.gmra.mrb[32].mxu0 %vm4433_vm2, %v3430_v50  ;;  %vm1473_vm7 = vcmp.eq.s32.totalorder %v3869_v21, %v970_v25  ;;  %v1327_v9 = vcvt.s32.f32 %v1325_v20 }
 0x2b9   : > { %v1284_v61 = vsel %vm1283_vm6, %v1279_v12, inf  ;;  %vm1472_vm11 = vcmp.eq.s32.totalorder %v3866_v47, %v970_v25 }
 0x2ba   : > { %v986_v11 = vadd.s32 %v985_v34, %v983_v7  ;;  %1285 = vmin.xlane.f32.xlu0 %v1284_v61  ;;  %v1357_v34 = vand.u32 65535, %v4291_v15  ;;  %v1049_v7 = vshll.u32 %v1048_v48, 16 }
 0x2bb   : > { %v998_v55 = vpop.xlane.xlu0 %997  ;;  %v4457_v22 = vpop.xlane.xlu1 %1297 }
 0x2bc   : > { %1439 = vst.msk [vmem:[%s4414_s20 + $0x18] sm:$0xff] %vm1435_vm12, %v986_v11  ;;  %v999_v52 = vcvt.f32.s32 %v998_v55  ;;  %vm1475_vm8 = vcmp.eq.s32.totalorder %v3869_v21, %v986_v11  ;;  %vm1299_vm9 = vcmp.eq.f32.partialorder %v4228_v28, %v4457_v22  ;;  %vm1474_vm13 = vcmp.eq.s32.totalorder %v3866_v47, %v986_v11 }
 0x2bd   : > { %vm2882_vm10 = vmpackc.low %vm1475_vm8, %vm1473_vm7  ;;  %v1300_v63 = vsel %vm1299_vm9, %v1295_v32, inf  ;;  %v1311_v28 = vcvt.s32.f32 %v1309_v26  ;;  %v1359_v32 = vcvt.s32.f32 %v1357_v34  ;;  %v1373_v26 = vand.u32 65535, %v4311_v56 }
 0x2be   : > { %v1002_v42 = vadd.s32 %v1001_v59, %v999_v52  ;;  %2883 = vmatprep.mubr.msk.bf16.mxu1 %vm2882_vm10, %v3430_v50  ;;  %2963 = vmatprep.mubr.msk.bf16.mxu0 %vm2882_vm10, %v3430_v50  ;;  %vm2884_vm14 = vmpackc.low %vm1474_vm13, %vm1472_vm11  ;;  %v1065_v59 = vshll.u32 %v1064_v41, 16  ;;  %v1096_v56 = vcvt.f32.s32 %v4339_v23 }
 0x2bf   : > { %1301 = vmin.xlane.f32.xlu1 %v1300_v63  ;;  %v4471_v43 = vpop.xlane.xlu0 %1313  ;;  %v1014_v60 = vpop.xlane.xlu1 %1013 }
 0x2c0   : > { %1440 = vst.msk [vmem:[%s4414_s20 + $0x20] sm:$0xff] %vm1435_vm12, %v1002_v42  ;;  %2885 = vmatmul.mubr.msk.bf16.gmra.mrb[36].mxu1 %vm2884_vm14, %v3430_v50  ;;  %v1015_v27 = vcvt.f32.s32 %v1014_v60  ;;  %vm1315_vm15 = vcmp.eq.f32.partialorder %v4241_v36, %v4471_v43  ;;  %2965 = vmatmul.mubr.msk.bf16.gmra.mrb[36].mxu0 %vm2884_vm14, %v3430_v50  ;;  %vm1477_vm1 = vcmp.eq.s32.totalorder %v3869_v21, %v1002_v42  ;;  %v1081_v60 = vshll.u32 %v1080_v45, 16 }
 0x2c1   : > { %v1316_v58 = vsel %vm1315_vm15, %v1311_v28, inf  ;;  %vm1476_vm5 = vcmp.eq.s32.totalorder %v3866_v47, %v1002_v42 }
 0x2c2   : > { %v1018_v0 = vadd.s32 %v1017_v14, %v1015_v27  ;;  %1317 = vmin.xlane.f32.xlu0 %v1316_v58  ;;  %v1097_v14 = vshll.u32 %v1096_v56, 16  ;;  %v1112_v27 = vcvt.f32.s32 %v4354_v57 }
 0x2c3   : > { %v1030_v25 = vpop.xlane.xlu0 %1029  ;;  %v4481_v37 = vpop.xlane.xlu1 %1329 }
 0x2c4   : > { %1441 = vst.msk [vmem:[%s4414_s20 + $0x28] sm:$0xff] %vm1435_vm12, %v1018_v0  ;;  %v1031_v49 = vcvt.f32.s32 %v1030_v25  ;;  %vm1479_vm2 = vcmp.eq.s32.totalorder %v3869_v21, %v1018_v0  ;;  %vm1331_vm3 = vcmp.eq.f32.partialorder %v4270_v44, %v4481_v37  ;;  %vm1478_vm6 = vcmp.eq.s32.totalorder %v3866_v47, %v1018_v0 }
 0x2c5   : > { %vm2886_vm4 = vmpackc.low %vm1479_vm2, %vm1477_vm1  ;;  %v1332_v36 = vsel %vm1331_vm3, %v1327_v9, inf  ;;  %v1343_v44 = vcvt.s32.f32 %v1341_v17  ;;  %v1391_v0 = vcvt.s32.f32 %v1389_v1  ;;  %v1421_v17 = vand.u32 65535, %v4357_v18 }
 0x2c6   : > { %v1034_v54 = vadd.s32 %v1033_v30, %v1031_v49  ;;  %2887 = vmatprep.mubr.msk.bf16.mxu1 %vm2886_vm4, %v3430_v50  ;;  %2967 = vmatprep.mubr.msk.bf16.mxu0 %vm2886_vm4, %v3430_v50  ;;  %vm2888_vm7 = vmpackc.low %vm1478_vm6, %vm1476_vm5  ;;  %v1405_v30 = vand.u32 65535, %v4341_v31  ;;  %v1128_v31 = vcvt.f32.s32 %v4365_v29  ;;  %v1113_v49 = vshll.u32 %v1112_v27, 16 }
 0x2c7   : > { %1333 = vmin.xlane.f32.xlu1 %v1332_v36  ;;  %v4495_v12 = vpop.xlane.xlu0 %1345  ;;  %v1046_v40 = vpop.xlane.xlu1 %1045  ;;  %v1423_v18 = vcvt.s32.f32 %v1421_v17 }
 0x2c8   : > { %1442 = vst.msk [vmem:[%s4414_s20 + $0x30] sm:$0xff] %vm1435_vm12, %v1034_v54  ;;  %2889 = vmatmul.mubr.msk.bf16.gmra.mrb[40].mxu1 %vm2888_vm7, %v3430_v50  ;;  %v1047_v61 = vcvt.f32.s32 %v1046_v40  ;;  %vm1347_vm8 = vcmp.eq.f32.partialorder %v4295_v24, %v4495_v12  ;;  %2969 = vmatmul.mubr.msk.bf16.gmra.mrb[40].mxu0 %vm2888_vm7, %v3430_v50  ;;  %vm1481_vm9 = vcmp.eq.s32.totalorder %v3869_v21, %v1034_v54  ;;  %v1129_v41 = vshll.u32 %v1128_v31, 16 }
 0x2c9   : > { %v1348_v46 = vsel %vm1347_vm8, %v1343_v44, inf  ;;  %vm1480_vm14 = vcmp.eq.s32.totalorder %v3866_v47, %v1034_v54  ;;  %v1144_v40 = vcvt.f32.s32 %v4372_v62  ;;  %v1256_v31 = vcvt.f32.s32 %v4418_v39 }
 0x2ca   : > { %v1050_v11 = vadd.s32 %v1049_v7, %v1047_v61  ;;  %1349 = vmin.xlane.f32.xlu0 %v1348_v46  ;;  %v1160_v61 = vcvt.f32.s32 %v4379_v8  ;;  %v1304_v39 = vcvt.f32.s32 %v4457_v22 }
 0x2cb   : > { %v1062_v55 = vpop.xlane.xlu0 %1061  ;;  %v4505_v15 = vpop.xlane.xlu1 %1361 }
 0x2cc   : > { %1443 = vst.msk [vmem:[%s4414_s20 + $0x38] sm:$0xff] %vm1435_vm12, %v1050_v11  ;;  %v1063_v52 = vcvt.f32.s32 %v1062_v55  ;;  %vm1483_vm10 = vcmp.eq.s32.totalorder %v3869_v21, %v1050_v11  ;;  %vm1363_vm11 = vcmp.eq.f32.partialorder %v4318_v6, %v4505_v15  ;;  %vm1482_vm15 = vcmp.eq.s32.totalorder %v3866_v47, %v1050_v11 }
 0x2cd   : > { %vm2890_vm13 = vmpackc.low %vm1483_vm10, %vm1481_vm9  ;;  %v1364_v24 = vsel %vm1363_vm11, %v1359_v32, inf  ;;  %v1375_v6 = vcvt.s32.f32 %v1373_v26  ;;  %v1145_v11 = vshll.u32 %v1144_v40, 16  ;;  %v1161_v45 = vshll.u32 %v1160_v61, 16 }
 0x2ce   : > { %v1066_v4 = vadd.s32 %v1065_v59, %v1063_v52  ;;  %2891 = vmatprep.mubr.msk.bf16.mxu1 %vm2890_vm13, %v3430_v50  ;;  %2971 = vmatprep.mubr.msk.bf16.mxu0 %vm2890_vm13, %v3430_v50  ;;  %vm2892_vm1 = vmpackc.low %vm1482_vm15, %vm1480_vm14  ;;  %v1176_v55 = vcvt.f32.s32 %v4384_v5  ;;  %v1192_v32 = vcvt.f32.s32 %v4387_v19  ;;  %v1208_v52 = vcvt.f32.s32 %v4394_v38 }
 0x2cf   : > { %1365 = vmin.xlane.f32.xlu1 %v1364_v24  ;;  %v4519_v63 = vpop.xlane.xlu0 %1377  ;;  %v1078_v42 = vpop.xlane.xlu1 %1077  ;;  %v1305_v22 = vshll.u32 %v1304_v39, 16 }
 0x2d0   : > { %1444 = vst.msk [vmem:[%s4414_s20 + $0x40] sm:$0xff] %vm1435_vm12, %v1066_v4  ;;  %2893 = vmatmul.mubr.msk.bf16.gmra.mrb[44].mxu1 %vm2892_vm1, %v3430_v50  ;;  %v1079_v28 = vcvt.f32.s32 %v1078_v42  ;;  %vm1379_vm2 = vcmp.eq.f32.partialorder %v4331_v53, %v4519_v63  ;;  %2973 = vmatmul.mubr.msk.bf16.gmra.mrb[44].mxu0 %vm2892_vm1, %v3430_v50  ;;  %vm1485_vm3 = vcmp.eq.s32.totalorder %v3869_v21, %v1066_v4  ;;  %v1177_v19 = vshll.u32 %v1176_v55, 16 }
 0x2d1   : > { %v1380_v23 = vsel %vm1379_vm2, %v1375_v6, inf  ;;  %vm1484_vm7 = vcmp.eq.s32.totalorder %v3866_v47, %v1066_v4  ;;  %v1193_v42 = vshll.u32 %v1192_v32, 16  ;;  %v1224_v6 = vcvt.f32.s32 %v4397_v33 }
 0x2d2   : > { %v1082_v20 = vadd.s32 %v1081_v60, %v1079_v28  ;;  %1381 = vmin.xlane.f32.xlu0 %v1380_v23  ;;  %v1209_v60 = vshll.u32 %v1208_v52, 16  ;;  %v1240_v28 = vcvt.f32.s32 %v4403_v51 }
 0x2d3   : > { %v1094_v58 = vpop.xlane.xlu0 %1093  ;;  %v4529_v35 = vpop.xlane.xlu1 %1393  ;;  %v1225_v33 = vshll.u32 %v1224_v6, 16 }
 0x2d4   : > { %1445 = vst.msk [vmem:[%s4414_s20 + $0x48] sm:$0xff] %vm1435_vm12, %v1082_v20  ;;  %v1095_v48 = vcvt.f32.s32 %v1094_v58  ;;  %vm1487_vm4 = vcmp.eq.s32.totalorder %v3869_v21, %v1082_v20  ;;  %vm1395_vm5 = vcmp.eq.f32.partialorder %v4348_v10, %v4529_v35  ;;  %vm1486_vm8 = vcmp.eq.s32.totalorder %v3866_v47, %v1082_v20 }
 0x2d5   : > { %vm2894_vm6 = vmpackc.low %vm1487_vm4, %vm1485_vm3  ;;  %v1396_v53 = vsel %vm1395_vm5, %v1391_v0, inf  ;;  %v1407_v10 = vcvt.s32.f32 %v1405_v30  ;;  %v1241_v0 = vshll.u32 %v1240_v28, 16  ;;  %v1400_v28 = vcvt.f32.s32 %v4529_v35 }
 0x2d6   : > { %v1098_v57 = vadd.s32 %v1097_v14, %v1095_v48  ;;  %2895 = vmatprep.mubr.msk.bf16.mxu1 %vm2894_vm6, %v3430_v50  ;;  %2975 = vmatprep.mubr.msk.bf16.mxu0 %vm2894_vm6, %v3430_v50  ;;  %vm2896_vm9 = vmpackc.low %vm1486_vm8, %vm1484_vm7 }
 0x2d7   : > { %1397 = vmin.xlane.f32.xlu1 %v1396_v53  ;;  %v4543_v25 = vpop.xlane.xlu0 %1409  ;;  %v1110_v9 = vpop.xlane.xlu1 %1109 }
 0x2d8   : > { %1446 = vst.msk [vmem:[%s4414_s20 + $0x50] sm:$0xff] %vm1435_vm12, %v1098_v57  ;;  %2897 = vmatmul.mubr.msk.bf16.gmra.mrb[48].mxu1 %vm2896_vm9, %v3430_v50  ;;  %v1111_v36 = vcvt.f32.s32 %v1110_v9  ;;  %vm1411_vm10 = vcmp.eq.f32.partialorder %v4359_v13, %v4543_v25  ;;  %2977 = vmatmul.mubr.msk.bf16.gmra.mrb[48].mxu0 %vm2896_vm9, %v3430_v50  ;;  %vm1489_vm11 = vcmp.eq.s32.totalorder %v3869_v21, %v1098_v57  ;;  %v1416_v35 = vcvt.f32.s32 %v4543_v25 }
 0x2d9   : > { %v1412_v29 = vsel %vm1411_vm10, %v1407_v10, inf  ;;  %vm1488_vm1 = vcmp.eq.s32.totalorder %v3866_v47, %v1098_v57  ;;  %v1257_v10 = vshll.u32 %v1256_v31, 16 }
 0x2da   : > { %v1114_v54 = vadd.s32 %v1113_v49, %v1111_v36  ;;  %1413 = vmin.xlane.f32.xlu0 %v1412_v29  ;;  %v1272_v49 = vcvt.f32.s32 %v4425_v2  ;;  %v1288_v29 = vcvt.f32.s32 %v4443_v16  ;;  %v1320_v2 = vcvt.f32.s32 %v4471_v43 }
 0x2db   : > { %v1126_v44 = vpop.xlane.xlu0 %1125  ;;  %v4553_v34 = vpop.xlane.xlu1 %1425  ;;  %v1336_v43 = vcvt.f32.s32 %v4481_v37  ;;  %v1352_v37 = vcvt.f32.s32 %v4495_v12 }
 0x2dc   : > { %1447 = vst.msk [vmem:[%s4414_s20 + $0x58] sm:$0xff] %vm1435_vm12, %v1114_v54  ;;  %v1127_v7 = vcvt.f32.s32 %v1126_v44  ;;  %vm1491_vm13 = vcmp.eq.s32.totalorder %v3869_v21, %v1114_v54  ;;  %vm1427_vm14 = vcmp.eq.f32.partialorder %v4370_v3, %v4553_v34  ;;  %vm1490_vm2 = vcmp.eq.s32.totalorder %v3866_v47, %v1114_v54 }
 0x2dd   : > { %vm2898_vm15 = vmpackc.low %vm1491_vm13, %vm1489_vm11  ;;  %v1428_v13 = vsel %vm1427_vm14, %v1423_v18, inf  ;;  %v1289_v18 = vshll.u32 %v1288_v29, 16  ;;  %v1337_v32 = vshll.u32 %v1336_v43, 16 }
 0x2de   : > { %v1130_v62 = vadd.s32 %v1129_v41, %v1127_v7  ;;  %2899 = vmatprep.mubr.msk.bf16.mxu1 %vm2898_vm15, %v3430_v50  ;;  %2979 = vmatprep.mubr.msk.bf16.mxu0 %vm2898_vm15, %v3430_v50  ;;  %vm2900_vm3 = vmpackc.low %vm1490_vm2, %vm1488_vm1  ;;  %v1273_v41 = vshll.u32 %v1272_v49, 16 }
 0x2df   : > { %1429 = vmin.xlane.f32.xlu1 %v1428_v13  ;;  %v1142_v46 = vpop.xlane.xlu1 %1141 }
 0x2e0   : > { %1448 = vst.msk [vmem:[%s4414_s20 + $0x60] sm:$0xff] %vm1435_vm12, %v1130_v62  ;;  %2901 = vmatmul.mubr.msk.bf16.gmra.mrb[52].mxu1 %vm2900_vm3, %v3430_v50  ;;  %v1143_v3 = vcvt.f32.s32 %v1142_v46  ;;  %2981 = vmatmul.mubr.msk.bf16.gmra.mrb[52].mxu0 %vm2900_vm3, %v3430_v50  ;;  %vm1493_vm4 = vcmp.eq.s32.totalorder %v3869_v21, %v1130_v62  ;;  %vm1492_vm8 = vcmp.eq.s32.totalorder %v3866_v47, %v1130_v62 }
 0x2e2   : > { %v1146_v59 = vadd.s32 %v1145_v11, %v1143_v3  ;;  %v1321_v3 = vshll.u32 %v1320_v2, 16 }
 0x2e3   : > { %v1158_v26 = vpop.xlane.xlu0 %1157 }
 0x2e4   : > { %1449 = vst.msk [vmem:[%s4414_s20 + $0x68] sm:$0xff] %vm1435_vm12, %v1146_v59  ;;  %v1159_v8 = vcvt.f32.s32 %v1158_v26  ;;  %vm1495_vm5 = vcmp.eq.s32.totalorder %v3869_v21, %v1146_v59  ;;  %vm1494_vm6 = vcmp.eq.s32.totalorder %v3866_v47, %v1146_v59 }
 0x2e5   : > { %vm2902_vm7 = vmpackc.low %vm1495_vm5, %vm1493_vm4 }
 0x2e6   : > { %v1162_v24 = vadd.s32 %v1161_v45, %v1159_v8  ;;  %v1174_v5 = vpop.xlane.xlu1 %1173  ;;  %2903 = vmatprep.mubr.msk.bf16.mxu1 %vm2902_vm7, %v3430_v50  ;;  %2983 = vmatprep.mubr.msk.bf16.mxu0 %vm2902_vm7, %v3430_v50  ;;  %vm2904_vm9 = vmpackc.low %vm1494_vm6, %vm1492_vm8 }
 0x2e7   : > { %v1175_v4 = vcvt.f32.s32 %v1174_v5  ;;  %v1190_v56 = vpop.xlane.xlu0 %1189 }
 0x2e8   : > { %1450 = vst.msk [vmem:[%s4414_s20 + $0x70] sm:$0xff] %vm1435_vm12, %v1162_v24  ;;  %v1191_v1 = vcvt.f32.s32 %v1190_v56  ;;  %2905 = vmatmul.mubr.msk.bf16.gmra.mrb[56].mxu1 %vm2904_vm9, %v3430_v50  ;;  %2985 = vmatmul.mubr.msk.bf16.gmra.mrb[56].mxu0 %vm2904_vm9, %v3430_v50  ;;  %vm1497_vm10 = vcmp.eq.s32.totalorder %v3869_v21, %v1162_v24  ;;  %vm1496_vm15 = vcmp.eq.s32.totalorder %v3866_v47, %v1162_v24  ;;  %v1353_v24 = vshll.u32 %v1352_v37, 16 }
 0x2e9   : > { %v1178_v38 = vadd.s32 %v1177_v19, %v1175_v4  ;;  %v1368_v19 = vcvt.f32.s32 %v4505_v15  ;;  %v1384_v15 = vcvt.f32.s32 %v4519_v63 }
 0x2ea   : > { %v1194_v23 = vadd.s32 %v1193_v42, %v1191_v1  ;;  %v1206_v20 = vpop.xlane.xlu1 %1205 }
 0x2eb   : > { %1451 = vst.msk [vmem:[%s4414_s20 + $0x78] sm:$0xff] %vm1435_vm12, %v1178_v38  ;;  %v1207_v14 = vcvt.f32.s32 %v1206_v20  ;;  %v1222_v27 = vpop.xlane.xlu0 %1221  ;;  %vm1499_vm11 = vcmp.eq.s32.totalorder %v3869_v21, %v1178_v38  ;;  %vm1498_vm13 = vcmp.eq.s32.totalorder %v3866_v47, %v1178_v38  ;;  %v1369_v56 = vshll.u32 %v1368_v19, 16 }
 0x2ec   : > { %1452 = vst.msk [vmem:[%s4414_s20 + $0x80] sm:$0xff] %vm1435_vm12, %v1194_v23  ;;  %v1223_v58 = vcvt.f32.s32 %v1222_v27  ;;  %vm2906_vm14 = vmpackc.low %vm1499_vm11, %vm1497_vm10  ;;  %vm1501_vm2 = vcmp.eq.s32.totalorder %v3869_v21, %v1194_v23  ;;  %vm1500_vm6 = vcmp.eq.s32.totalorder %v3866_v47, %v1194_v23  ;;  %v1385_v38 = vshll.u32 %v1384_v15, 16 }
 0x2ed   : > { %v1210_v51 = vadd.s32 %v1209_v60, %v1207_v14  ;;  %2907 = vmatprep.mubr.msk.bf16.mxu1 %vm2906_vm14, %v3430_v50  ;;  %2987 = vmatprep.mubr.msk.bf16.mxu0 %vm2906_vm14, %v3430_v50  ;;  %vm2908_vm1 = vmpackc.low %vm1498_vm13, %vm1496_vm15  ;;  %v1401_v20 = vshll.u32 %v1400_v28, 16  ;;  %v3335_v28 = vld [vmem:[%s3541_s8 + $0x10] sm:$0xff] }
 0x2ee   : > { %v1226_v30 = vadd.s32 %v1225_v33, %v1223_v58  ;;  %v1238_v48 = vpop.xlane.xlu1 %1237  ;;  %v1417_v58 = vshll.u32 %v1416_v35, 16 }
 0x2ef   : > { %1453 = vst.msk [vmem:[%s4414_s20 + $0x88] sm:$0xff] %vm1435_vm12, %v1210_v51  ;;  %v1239_v53 = vcvt.f32.s32 %v1238_v48  ;;  %vm1503_vm3 = vcmp.eq.s32.totalorder %v3869_v21, %v1210_v51  ;;  %vm1502_vm4 = vcmp.eq.s32.totalorder %v3866_v47, %v1210_v51 }
 0x2f0   : > { %1454 = vst.msk [vmem:[%s4414_s20 + $0x90] sm:$0xff] %vm1435_vm12, %v1226_v30  ;;  %2909 = vmatmul.mubr.msk.bf16.gmra.mrb[60].mxu1 %vm2908_vm1, %v3430_v50  ;;  %vm2910_vm5 = vmpackc.low %vm1503_vm3, %vm1501_vm2  ;;  %2989 = vmatmul.mubr.msk.bf16.gmra.mrb[60].mxu0 %vm2908_vm1, %v3430_v50  ;;  %vm1505_vm9 = vcmp.eq.s32.totalorder %v3869_v21, %v1226_v30  ;;  %vm1504_vm13 = vcmp.eq.s32.totalorder %v3866_v47, %v1226_v30 }
 0x2f1   : > { %v1242_v57 = vadd.s32 %v1241_v0, %v1239_v53  ;;  %2911 = vmatprep.mubr.msk.bf16.mxu1 %vm2910_vm5, %v3430_v50  ;;  %vm2912_vm7 = vmpackc.low %vm1502_vm4, %vm1500_vm6  ;;  %2991 = vmatprep.mubr.msk.bf16.mxu0 %vm2910_vm5, %v3430_v50  ;;  %v1432_v0 = vcvt.f32.s32 %v4553_v34 }
 0x2f3   : > { %1455 = vst.msk [vmem:[%s4414_s20 + $0x98] sm:$0xff] %vm1435_vm12, %v1242_v57  ;;  %vm1507_vm8 = vcmp.eq.s32.totalorder %v3869_v21, %v1242_v57  ;;  %vm1506_vm11 = vcmp.eq.s32.totalorder %v3866_v47, %v1242_v57  ;;  %v1433_v30 = vshll.u32 %v1432_v0, 16  ;;  %v4706_v57 = vstv %s3022_s21 }
 0x2f4   : > { %vm2914_vm10 = vmpackc.low %vm1507_vm8, %vm1505_vm9 }
 0x2f5   : > { %vm2916_vm14 = vmpackc.low %vm1506_vm11, %vm1504_vm13 }
 0x2f8   : > { %2913 = vmatmul.mubr.msk.bf16.gmra.mrb[64].mxu1 %vm2912_vm7, %v3430_v50  ;;  %2993 = vmatmul.mubr.msk.bf16.gmra.mrb[64].mxu0 %vm2912_vm7, %v3430_v50 }
 0x2f9   : > { %2915 = vmatprep.mubr.msk.bf16.mxu1 %vm2914_vm10, %v3430_v50  ;;  %2995 = vmatprep.mubr.msk.bf16.mxu0 %vm2914_vm10, %v3430_v50 }
 0x300   : > { %2917 = vmatmul.mubr.msk.bf16.gmra.mrb[68].mxu1 %vm2916_vm14, %v3430_v50  ;;  %2997 = vmatmul.mubr.msk.bf16.gmra.mrb[68].mxu0 %vm2916_vm14, %v3430_v50 }
 0x33f   : > { %v1254_v9 = vpop.xlane.xlu0 %1253 }
 0x340   : > { %v1255_v17 = vcvt.f32.s32 %v1254_v9 }
 0x342   : > { %v1258_v36 = vadd.s32 %v1257_v10, %v1255_v17 }
 0x343   : > { %v1270_v54 = vpop.xlane.xlu1 %1269 }
 0x344   : > { %1456 = vst.msk [vmem:[%s4414_s20 + $0xa0] sm:$0xff] %vm1435_vm12, %v1258_v36  ;;  %v1271_v40 = vcvt.f32.s32 %v1270_v54  ;;  %vm1509_vm15 = vcmp.eq.s32.totalorder %v3869_v21, %v1258_v36  ;;  %vm1508_vm4 = vcmp.eq.s32.totalorder %v3866_v47, %v1258_v36 }
 0x346   : > { %v1274_v7 = vadd.s32 %v1273_v41, %v1271_v40 }
 0x347   : > { %v1286_v44 = vpop.xlane.xlu0 %1285 }
 0x348   : > { %v1287_v13 = vcvt.f32.s32 %v1286_v44  ;;  %1457 = vst.msk [vmem:[%s4414_s20 + $0xa8] sm:$0xff] %vm1435_vm12, %v1274_v7  ;;  %vm1511_vm1 = vcmp.eq.s32.totalorder %v3869_v21, %v1274_v7  ;;  %vm1510_vm2 = vcmp.eq.s32.totalorder %v3866_v47, %v1274_v7 }
 0x349   : > { %vm2918_vm3 = vmpackc.low %vm1511_vm1, %vm1509_vm15 }
 0x34a   : > { %v1290_v62 = vadd.s32 %v1289_v18, %v1287_v13  ;;  %2919 = vmatprep.mubr.msk.bf16.mxu1 %vm2918_vm3, %v3430_v50  ;;  %2999 = vmatprep.mubr.msk.bf16.mxu0 %vm2918_vm3, %v3430_v50  ;;  %vm2920_vm5 = vmpackc.low %vm1510_vm2, %vm1508_vm4 }
 0x34b   : > { %2921 = vmatmul.mubr.msk.bf16.gmra.mrb[72].mxu1 %vm2920_vm5, %v3430_v50  ;;  %3001 = vmatmul.mubr.msk.bf16.gmra.mrb[72].mxu0 %vm2920_vm5, %v3430_v50 }
 0x34c   : > { %1458 = vst.msk [vmem:[%s4414_s20 + $0xb0] sm:$0xff] %vm1435_vm12, %v1290_v62  ;;  %v1302_v16 = vpop.xlane.xlu1 %1301  ;;  %vm1513_vm6 = vcmp.eq.s32.totalorder %v3869_v21, %v1290_v62  ;;  %vm1512_vm10 = vcmp.eq.s32.totalorder %v3866_v47, %v1290_v62  ;;  %v3333_v62 = vld [vmem:[%s3541_s8] sm:$0xff] }
 0x34d   : > { %v1303_v61 = vcvt.f32.s32 %v1302_v16 }
 0x34f   : > { %v1306_v46 = vadd.s32 %v1305_v22, %v1303_v61  ;;  %v1318_v11 = vpop.xlane.xlu0 %1317 }
 0x350   : > { %v1319_v59 = vcvt.f32.s32 %v1318_v11  ;;  %v3334_v11 = vld [vmem:[%s3541_s8 + $0x8] sm:$0xff] }
 0x351   : > { %1459 = vst.msk [vmem:[%s4414_s20 + $0xb8] sm:$0xff] %vm1435_vm12, %v1306_v46  ;;  %vm1515_vm7 = vcmp.eq.s32.totalorder %v3869_v21, %v1306_v46  ;;  %vm1514_vm8 = vcmp.eq.s32.totalorder %v3866_v47, %v1306_v46 }
 0x352   : > { %v1322_v45 = vadd.s32 %v1321_v3, %v1319_v59  ;;  %vm2922_vm9 = vmpackc.low %vm1515_vm7, %vm1513_vm6 }
 0x353   : > { %2923 = vmatprep.mubr.msk.bf16.mxu1 %vm2922_vm9, %v3430_v50  ;;  %3003 = vmatprep.mubr.msk.bf16.mxu0 %vm2922_vm9, %v3430_v50  ;;  %vm2924_vm11 = vmpackc.low %vm1514_vm8, %vm1512_vm10 }
 0x354   : > { %1460 = vst.msk [vmem:[%s4414_s20 + $0xc0] sm:$0xff] %vm1435_vm12, %v1322_v45  ;;  %v1334_v55 = vpop.xlane.xlu1 %1333  ;;  %2925 = vmatmul.mubr.msk.bf16.gmra.mrb[76].mxu1 %vm2924_vm11, %v3430_v50  ;;  %3005 = vmatmul.mubr.msk.bf16.gmra.mrb[76].mxu0 %vm2924_vm11, %v3430_v50  ;;  %vm1517_vm13 = vcmp.eq.s32.totalorder %v3869_v21, %v1322_v45  ;;  %vm1516_vm2 = vcmp.eq.s32.totalorder %v3866_v47, %v1322_v45 }
 0x355   : > { %v1335_v26 = vcvt.f32.s32 %v1334_v55 }
 0x357   : > { %v1338_v8 = vadd.s32 %v1337_v32, %v1335_v26  ;;  %v1350_v52 = vpop.xlane.xlu0 %1349 }
 0x358   : > { %v1351_v5 = vcvt.f32.s32 %v1350_v52 }
 0x359   : > { %1461 = vst.msk [vmem:[%s4414_s20 + $0xc8] sm:$0xff] %vm1435_vm12, %v1338_v8  ;;  %vm1519_vm14 = vcmp.eq.s32.totalorder %v3869_v21, %v1338_v8  ;;  %vm1518_vm15 = vcmp.eq.s32.totalorder %v3866_v47, %v1338_v8 }
 0x35a   : > { %v1354_v12 = vadd.s32 %v1353_v24, %v1351_v5  ;;  %vm2926_vm1 = vmpackc.low %vm1519_vm14, %vm1517_vm13 }
 0x35b   : > { %2927 = vmatprep.mubr.msk.bf16.mxu1 %vm2926_vm1, %v3430_v50  ;;  %3007 = vmatprep.mubr.msk.bf16.mxu0 %vm2926_vm1, %v3430_v50  ;;  %vm2928_vm3 = vmpackc.low %vm1518_vm15, %vm1516_vm2 }
 0x35c   : > { %1462 = vst.msk [vmem:[%s4414_s20 + $0xd0] sm:$0xff] %vm1435_vm12, %v1354_v12  ;;  %v1366_v4 = vpop.xlane.xlu1 %1365  ;;  %2929 = vmatmul.mubr.msk.bf16.gmra.mrb[80].mxu1 %vm2928_vm3, %v3430_v50  ;;  %3009 = vmatmul.mubr.msk.bf16.gmra.mrb[80].mxu0 %vm2928_vm3, %v3430_v50  ;;  %vm1521_vm4 = vcmp.eq.s32.totalorder %v3869_v21, %v1354_v12  ;;  %vm1520_vm8 = vcmp.eq.s32.totalorder %v3866_v47, %v1354_v12 }
 0x35d   : > { %v1367_v42 = vcvt.f32.s32 %v1366_v4 }
 0x35f   : > { %v1370_v6 = vadd.s32 %v1369_v56, %v1367_v42  ;;  %v1382_v1 = vpop.xlane.xlu0 %1381 }
 0x360   : > { %v1383_v60 = vcvt.f32.s32 %v1382_v1 }
 0x361   : > { %1463 = vst.msk [vmem:[%s4414_s20 + $0xd8] sm:$0xff] %vm1435_vm12, %v1370_v6  ;;  %vm1523_vm5 = vcmp.eq.s32.totalorder %v3869_v21, %v1370_v6  ;;  %vm1522_vm6 = vcmp.eq.s32.totalorder %v3866_v47, %v1370_v6 }
 0x362   : > { %v1386_v63 = vadd.s32 %v1385_v38, %v1383_v60  ;;  %vm2930_vm7 = vmpackc.low %vm1523_vm5, %vm1521_vm4 }
 0x363   : > { %2931 = vmatprep.mubr.msk.bf16.mxu1 %vm2930_vm7, %v3430_v50  ;;  %3011 = vmatprep.mubr.msk.bf16.mxu0 %vm2930_vm7, %v3430_v50  ;;  %vm2932_vm9 = vmpackc.low %vm1522_vm6, %vm1520_vm8 }
 0x364   : > { %1464 = vst.msk [vmem:[%s4414_s20 + $0xe0] sm:$0xff] %vm1435_vm12, %v1386_v63  ;;  %v1398_v23 = vpop.xlane.xlu1 %1397  ;;  %2933 = vmatmul.mubr.msk.bf16.gmra.mrb[84].mxu1 %vm2932_vm9, %v3430_v50  ;;  %3013 = vmatmul.mubr.msk.bf16.gmra.mrb[84].mxu0 %vm2932_vm9, %v3430_v50  ;;  %vm1525_vm10 = vcmp.eq.s32.totalorder %v3869_v21, %v1386_v63  ;;  %vm1524_vm15 = vcmp.eq.s32.totalorder %v3866_v47, %v1386_v63 }
 0x365   : > { %v1399_v14 = vcvt.f32.s32 %v1398_v23 }
 0x367   : > { %v1402_v27 = vadd.s32 %v1401_v20, %v1399_v14  ;;  %v1414_v33 = vpop.xlane.xlu0 %1413 }
 0x368   : > { %v1415_v51 = vcvt.f32.s32 %v1414_v33 }
 0x369   : > { %1465 = vst.msk [vmem:[%s4414_s20 + $0xe8] sm:$0xff] %vm1435_vm12, %v1402_v27  ;;  %vm1527_vm11 = vcmp.eq.s32.totalorder %v3869_v21, %v1402_v27  ;;  %vm1526_vm13 = vcmp.eq.s32.totalorder %v3866_v47, %v1402_v27  ;;  %v3336_v27 = vld [vmem:[%s3541_s8 + $0x18] sm:$0xff] }
 0x36a   : > { %v1418_v25 = vadd.s32 %v1417_v58, %v1415_v51  ;;  %vm2934_vm14 = vmpackc.low %vm1527_vm11, %vm1525_vm10 }
 0x36b   : > { %2935 = vmatprep.mubr.msk.bf16.mxu1 %vm2934_vm14, %v3430_v50  ;;  %3015 = vmatprep.mubr.msk.bf16.mxu0 %vm2934_vm14, %v3430_v50  ;;  %vm2936_vm1 = vmpackc.low %vm1526_vm13, %vm1524_vm15 }
 0x36c   : > { %1466 = vst.msk [vmem:[%s4414_s20 + $0xf0] sm:$0xff] %vm1435_vm12, %v1418_v25  ;;  %v1430_v34 = vpop.xlane.xlu1 %1429  ;;  %2937 = vmatmul.mubr.msk.bf16.gmra.mrb[88].mxu1 %vm2936_vm1, %v3430_v50  ;;  %3017 = vmatmul.mubr.msk.bf16.gmra.mrb[88].mxu0 %vm2936_vm1, %v3430_v50  ;;  %vm1529_vm2 = vcmp.eq.s32.totalorder %v3869_v21, %v1418_v25  ;;  %vm1528_vm6 = vcmp.eq.s32.totalorder %v3866_v47, %v1418_v25 }
 0x36d   : > { %v1431_v48 = vcvt.f32.s32 %v1430_v34 }
 0x36f   : > { %v1434_v53 = vadd.s32 %v1433_v30, %v1431_v48 }
 0x371   : > { %1467 = vst.msk [vmem:[%s4414_s20 + $0xf8] sm:$0xff] %vm1435_vm12, %v1434_v53  ;;  %vm1531_vm3 = vcmp.eq.s32.totalorder %v3869_v21, %v1434_v53  ;;  %vm1530_vm4 = vcmp.eq.s32.totalorder %v3866_v47, %v1434_v53  ;;  %v5036_v21 = vld [vmem:[#allocation5_spill] sm:$0xff]  ;;  %s3369_s20 = sshll.u32 %s3431_s28, 4  ;;  %s3370_s20 = int_to_ptr.vmem [resolvable:$false] %s3369_s20 }
 0x372   : > { %vm2938_vm5 = vmpackc.low %vm1531_vm3, %vm1529_vm2  ;;  %v2336_v9 = vadd.s32 8, %v5036_v21  ;;  %v2369_v36 = vadd.s32 %v4706_v57, %v5036_v21  ;;  %v2337_v39 = vadd.s32 16, %v5036_v21  ;;  %v2338_v61 = vadd.s32 24, %v5036_v21  ;;  %s3371_s21 = scalar_lea.vmem %s3370_s20, 32  ;;  %p3372_p0 = scmp.lt.s32.totalorder %s4913_s15, %s3370_s20 }
 0x373   : > { %2939 = vmatprep.mubr.msk.bf16.mxu1 %vm2938_vm5, %v3430_v50  ;;  %3019 = vmatprep.mubr.msk.bf16.mxu0 %vm2938_vm5, %v3430_v50  ;;  %vm2940_vm7 = vmpackc.low %vm1530_vm4, %vm1528_vm6  ;;  %v2339_v38 = vadd.s32 32, %v5036_v21  ;;  %v2340_v20 = vadd.s32 40, %v5036_v21  ;;  %p3373_p1 = scmp.lt.s32.totalorder %s3371_s21, %s3365_s19 }
 0x374   : > { %2941 = vmatmul.mubr.msk.bf16.gmra.mrb[92].mxu1 %vm2940_vm7, %v3430_v50  ;;  %3021 = vmatmul.mubr.msk.bf16.gmra.mrb[92].mxu0 %vm2940_vm7, %v3430_v50  ;;  %v2370_v18 = vadd.s32 %v4706_v57, %v2336_v9  ;;  %vm2401_vm12 = vcmp.lt.s32.totalorder %v2369_v36, 480  ;;  %v2371_v32 = vadd.s32 %v4706_v57, %v2337_v39  ;;  %v2372_v4 = vadd.s32 %v4706_v57, %v2338_v61 }
 0x375   : > { %v2373_v30 = vadd.s32 %v4706_v57, %v2339_v38  ;;  %v3339_v38 = vld [vmem:[%s3541_s8 + $0x30] sm:$0xff]  ;;  %p3374_p2 = por %p3373_p1, %p3372_p0 }
 0x376   : > { %vm2402_vm8 = vcmp.lt.s32.totalorder %v2370_v18, 480  ;;  %vm2403_vm9 = vcmp.lt.s32.totalorder %v2371_v32, 480  ;;  %vm2404_vm10 = vcmp.lt.s32.totalorder %v2372_v4, 480 }
 0x377   : > { %vm2405_vm11 = vcmp.lt.s32.totalorder %v2373_v30, 480  ;;  %p3375_p3 = pnand %p3374_p2, %p3368_p13 }
 0x38b   : > { %v3042_v31 = vpop.f32.mrb[32].mxu1  ;;  %v3154_v10 = vpop.f32.mrb[32].mxu0 }
 0x38c   : > { %v3043_v17 = vpop.f32.mrb[33].mxu1  ;;  %v3155_v47 = vpop.f32.mrb[33].mxu0 }
 0x38d   : > { %v3044_v49 = vadd.f32 %v3043_v17, %v3042_v31  ;;  %v3045_v29 = vpop.f32.mrb[34].mxu1  ;;  %v3156_v54 = vadd.f32 %v3155_v47, %v3154_v10  ;;  %v3157_v41 = vpop.f32.mrb[34].mxu0 }
 0x38e   : > { %v3046_v40 = vpop.f32.mrb[35].mxu1  ;;  %v3158_v44 = vpop.f32.mrb[35].mxu0 }
 0x38f   : > { %v3047_v50 = vadd.f32 %v3046_v40, %v3045_v29  ;;  %v2144_v7 = vadd.f32 %v3156_v54, %v3044_v49  ;;  %v3159_v13 = vadd.f32 %v3158_v44, %v3157_v41  ;;  %v2374_v29 = vadd.s32 %v4706_v57, %v2340_v20  ;;  %v3340_v20 = vld [vmem:[%s3541_s8 + $0x38] sm:$0xff] }
 0x390   : > { %v2341_v44 = vadd.s32 48, %v5036_v21 }
 0x391   : > { %2270 = vst.msk [vmem:[%s4715_s9] sm:$0xff] %vm379_vm0, %v2144_v7  ;;  %v2302_v2 = vsub.f32 %v2144_v7, %v3333_v62  ;;  %v2147_v16 = vadd.f32 %v3159_v13, %v3047_v50  ;;  %v3337_v7 = vld [vmem:[%s3541_s8 + $0x20] sm:$0xff]  ;;  %vm2406_vm13 = vcmp.lt.s32.totalorder %v2374_v29, 480 }
 0x393   : > { %v3048_v22 = vpop.f32.mrb[36].mxu1  ;;  %v2497_v46 = vsel %vm2401_vm12, %v2302_v2, 0.0  ;;  %2271 = vst.msk [vmem:[%s4715_s9 + $0x8] sm:$0xff] %vm379_vm0, %v2147_v16  ;;  %v2303_v3 = vsub.f32 %v2147_v16, %v3334_v11  ;;  %v3160_v59 = vpop.f32.mrb[36].mxu0  ;;  %v2342_v2 = vadd.s32 56, %v5036_v21 }
 0x394   : > { %v3049_v43 = vpop.f32.mrb[37].mxu1  ;;  %v2529_v45 = vmul.f32 %v2497_v46, %v2497_v46  ;;  %v3161_v55 = vpop.f32.mrb[37].mxu0 }
 0x395   : > { %v3050_v37 = vadd.f32 %v3049_v43, %v3048_v22  ;;  %v3051_v26 = vpop.f32.mrb[38].mxu1  ;;  %v2498_v8 = vsel %vm2402_vm8, %v2303_v3, 0.0  ;;  %v3162_v52 = vadd.f32 %v3161_v55, %v3160_v59  ;;  %v3163_v24 = vpop.f32.mrb[38].mxu0  ;;  %v3338_v22 = vld [vmem:[%s3541_s8 + $0x28] sm:$0xff] }
 0x396   : > { %v3052_v5 = vpop.f32.mrb[39].mxu1  ;;  %v2530_v19 = vmul.f32 %v2498_v8, %v2498_v8  ;;  %v3164_v15 = vpop.f32.mrb[39].mxu0  ;;  %v2561_v6 = vsel %vm379_vm0, %v2529_v45, 0.0  ;;  %v2375_v45 = vadd.s32 %v4706_v57, %v2341_v44  ;;  %v3341_v44 = vld [vmem:[%s3541_s8 + $0x40] sm:$0xff] }
 0x397   : > { %v3053_v12 = vadd.f32 %v3052_v5, %v3051_v26  ;;  %v2152_v56 = vadd.f32 %v3162_v52, %v3050_v37  ;;  %v3165_v42 = vadd.f32 %v3164_v15, %v3163_v24 }
 0x398   : > { %v2562_v1 = vsel %vm379_vm0, %v2530_v19, 0.0  ;;  %vm2407_vm14 = vcmp.lt.s32.totalorder %v2375_v45, 480 }
 0x399   : > { %v2563_v60 = vadd.f32 %v2562_v1, %v2561_v6  ;;  %2272 = vst.msk [vmem:[%s4715_s9 + $0x10] sm:$0xff] %vm379_vm0, %v2152_v56  ;;  %v2304_v63 = vsub.f32 %v2152_v56, %v3335_v28  ;;  %v2155_v35 = vadd.f32 %v3165_v42, %v3053_v12  ;;  %v2376_v12 = vadd.s32 %v4706_v57, %v2342_v2  ;;  %v3342_v2 = vld [vmem:[%s3541_s8 + $0x48] sm:$0xff] }
 0x39a   : > { %v2343_v6 = vadd.s32 64, %v5036_v21 }
 0x39b   : > { %v3054_v23 = vpop.f32.mrb[40].mxu1  ;;  %v2499_v14 = vsel %vm2403_vm9, %v2304_v63, 0.0  ;;  %2273 = vst.msk [vmem:[%s4715_s9 + $0x18] sm:$0xff] %vm379_vm0, %v2155_v35  ;;  %v2305_v33 = vsub.f32 %v2155_v35, %v3336_v27  ;;  %v3166_v58 = vpop.f32.mrb[40].mxu0  ;;  %vm2408_vm15 = vcmp.lt.s32.totalorder %v2376_v12, 480  ;;  %v2344_v35 = vadd.s32 72, %v5036_v21 }
 0x39c   : > { %v3055_v51 = vpop.f32.mrb[41].mxu1  ;;  %v2531_v0 = vmul.f32 %v2499_v14, %v2499_v14  ;;  %v3167_v34 = vpop.f32.mrb[41].mxu0 }
 0x39d   : > { %v3056_v25 = vadd.f32 %v3055_v51, %v3054_v23  ;;  %v3057_v48 = vpop.f32.mrb[42].mxu1  ;;  %v2500_v53 = vsel %vm2404_vm10, %v2305_v33, 0.0  ;;  %v3168_v31 = vadd.f32 %v3167_v34, %v3166_v58  ;;  %v3169_v9 = vpop.f32.mrb[42].mxu0 }
 0x39e   : > { %v3058_v10 = vpop.f32.mrb[43].mxu1  ;;  %v2564_v17 = vsel %vm379_vm0, %v2531_v0, 0.0  ;;  %v2532_v49 = vmul.f32 %v2500_v53, %v2500_v53  ;;  %v3170_v36 = vpop.f32.mrb[43].mxu0 }
 0x39f   : > { %v3059_v47 = vadd.f32 %v3058_v10, %v3057_v48  ;;  %v2565_v54 = vadd.f32 %v2564_v17, %v2563_v60  ;;  %v2160_v41 = vadd.f32 %v3168_v31, %v3056_v25  ;;  %v3171_v40 = vadd.f32 %v3170_v36, %v3169_v9 }
 0x3a0   : > { %v2566_v50 = vsel %vm379_vm0, %v2532_v49, 0.0  ;;  %v2377_v25 = vadd.s32 %v4706_v57, %v2343_v6  ;;  %v3343_v6 = vld [vmem:[%s3541_s8 + $0x50] sm:$0xff] }
 0x3a1   : > { %v2567_v18 = vadd.f32 %v2566_v50, %v2565_v54  ;;  %2274 = vst.msk [vmem:[%s4715_s9 + $0x20] sm:$0xff] %vm379_vm0, %v2160_v41  ;;  %v2306_v13 = vsub.f32 %v2160_v41, %v3337_v7  ;;  %v2163_v39 = vadd.f32 %v3171_v40, %v3059_v47  ;;  %v2378_v47 = vadd.s32 %v4706_v57, %v2344_v35  ;;  %v3344_v35 = vld [vmem:[%s3541_s8 + $0x58] sm:$0xff] }
 0x3a2   : > { %vm2409_vm1 = vcmp.lt.s32.totalorder %v2377_v25, 480  ;;  %v2345_v40 = vadd.s32 80, %v5036_v21 }
 0x3a3   : > { %v3060_v62 = vpop.f32.mrb[44].mxu1  ;;  %v2501_v16 = vsel %vm2405_vm11, %v2306_v13, 0.0  ;;  %2275 = vst.msk [vmem:[%s4715_s9 + $0x28] sm:$0xff] %vm379_vm0, %v2163_v39  ;;  %v2307_v61 = vsub.f32 %v2163_v39, %v3338_v22  ;;  %v3172_v46 = vpop.f32.mrb[44].mxu0  ;;  %vm2410_vm2 = vcmp.lt.s32.totalorder %v2378_v47, 480  ;;  %v2346_v39 = vadd.s32 88, %v5036_v21 }
 0x3a4   : > { %v3061_v11 = vpop.f32.mrb[45].mxu1  ;;  %v2533_v3 = vmul.f32 %v2501_v16, %v2501_v16  ;;  %v3173_v43 = vpop.f32.mrb[45].mxu0 }
 0x3a5   : > { %v3062_v59 = vadd.f32 %v3061_v11, %v3060_v62  ;;  %v3063_v37 = vpop.f32.mrb[46].mxu1  ;;  %v2502_v55 = vsel %vm2406_vm13, %v2307_v61, 0.0  ;;  %v3174_v32 = vadd.f32 %v3173_v43, %v3172_v46  ;;  %v3175_v26 = vpop.f32.mrb[46].mxu0 }
 0x3a6   : > { %v3064_v8 = vpop.f32.mrb[47].mxu1  ;;  %v2568_v52 = vsel %vm379_vm0, %v2533_v3, 0.0  ;;  %v2534_v24 = vmul.f32 %v2502_v55, %v2502_v55  ;;  %v3176_v19 = vpop.f32.mrb[47].mxu0 }
 0x3a7   : > { %v3065_v5 = vadd.f32 %v3064_v8, %v3063_v37  ;;  %v2569_v15 = vadd.f32 %v2568_v52, %v2567_v18  ;;  %v2168_v4 = vadd.f32 %v3174_v32, %v3062_v59  ;;  %v3177_v56 = vadd.f32 %v3176_v19, %v3175_v26 }
 0x3a8   : > { %v2570_v42 = vsel %vm379_vm0, %v2534_v24, 0.0  ;;  %v2379_v59 = vadd.s32 %v4706_v57, %v2345_v40  ;;  %v3345_v40 = vld [vmem:[%s3541_s8 + $0x60] sm:$0xff] }
 0x3a9   : > { %v2571_v1 = vadd.f32 %v2570_v42, %v2569_v15  ;;  %2276 = vst.msk [vmem:[%s4715_s9 + $0x30] sm:$0xff] %vm379_vm0, %v2168_v4  ;;  %v2308_v60 = vsub.f32 %v2168_v4, %v3339_v38  ;;  %v2171_v28 = vadd.f32 %v3177_v56, %v3065_v5  ;;  %v2380_v5 = vadd.s32 %v4706_v57, %v2346_v39  ;;  %v3346_v39 = vld [vmem:[%s3541_s8 + $0x68] sm:$0xff] }
 0x3aa   : > { %vm2411_vm3 = vcmp.lt.s32.totalorder %v2379_v59, 480  ;;  %v2347_v56 = vadd.s32 96, %v5036_v21 }
 0x3ab   : > { %v3066_v63 = vpop.f32.mrb[48].mxu1  ;;  %v2503_v23 = vsel %vm2407_vm14, %v2308_v60, 0.0  ;;  %2277 = vst.msk [vmem:[%s4715_s9 + $0x38] sm:$0xff] %vm379_vm0, %v2171_v28  ;;  %v2309_v14 = vsub.f32 %v2171_v28, %v3340_v20  ;;  %v3178_v27 = vpop.f32.mrb[48].mxu0  ;;  %vm2412_vm4 = vcmp.lt.s32.totalorder %v2380_v5, 480  ;;  %v2348_v28 = vadd.s32 104, %v5036_v21 }
 0x3ac   : > { %v3067_v33 = vpop.f32.mrb[49].mxu1  ;;  %v2535_v58 = vmul.f32 %v2503_v23, %v2503_v23  ;;  %v3179_v0 = vpop.f32.mrb[49].mxu0 }
 0x3ad   : > { %v3068_v51 = vadd.f32 %v3067_v33, %v3066_v63  ;;  %v3069_v34 = vpop.f32.mrb[50].mxu1  ;;  %v2504_v30 = vsel %vm2408_vm15, %v2309_v14, 0.0  ;;  %v3180_v48 = vadd.f32 %v3179_v0, %v3178_v27  ;;  %v3181_v53 = vpop.f32.mrb[50].mxu0 }
 0x3ae   : > { %v3070_v31 = vpop.f32.mrb[51].mxu1  ;;  %v2572_v9 = vsel %vm379_vm0, %v2535_v58, 0.0  ;;  %v2536_v10 = vmul.f32 %v2504_v30, %v2504_v30  ;;  %v3182_v49 = vpop.f32.mrb[51].mxu0 }
 0x3af   : > { %v3071_v17 = vadd.f32 %v3070_v31, %v3069_v34  ;;  %v2573_v36 = vadd.f32 %v2572_v9, %v2571_v1  ;;  %v2176_v29 = vadd.f32 %v3180_v48, %v3068_v51  ;;  %v3183_v54 = vadd.f32 %v3182_v49, %v3181_v53 }
 0x3b0   : > { %v2574_v41 = vsel %vm379_vm0, %v2536_v10, 0.0  ;;  %v2381_v51 = vadd.s32 %v4706_v57, %v2347_v56  ;;  %v3347_v56 = vld [vmem:[%s3541_s8 + $0x70] sm:$0xff] }
 0x3b1   : > { %v2575_v50 = vadd.f32 %v2574_v41, %v2573_v36  ;;  %2278 = vst.msk [vmem:[%s4715_s9 + $0x40] sm:$0xff] %vm379_vm0, %v2176_v29  ;;  %v2310_v18 = vsub.f32 %v2176_v29, %v3341_v44  ;;  %v2179_v7 = vadd.f32 %v3183_v54, %v3071_v17  ;;  %v2382_v17 = vadd.s32 %v4706_v57, %v2348_v28  ;;  %v3348_v28 = vld [vmem:[%s3541_s8 + $0x78] sm:$0xff] }
 0x3b2   : > { %vm2413_vm5 = vcmp.lt.s32.totalorder %v2381_v51, 480  ;;  %v2349_v54 = vadd.s32 112, %v5036_v21 }
 0x3b3   : > { %v3072_v13 = vpop.f32.mrb[52].mxu1  ;;  %v2505_v62 = vsel %vm2409_vm1, %v2310_v18, 0.0  ;;  %2279 = vst.msk [vmem:[%s4715_s9 + $0x48] sm:$0xff] %vm379_vm0, %v2179_v7  ;;  %v2311_v16 = vsub.f32 %v2179_v7, %v3342_v2  ;;  %v3184_v22 = vpop.f32.mrb[52].mxu0  ;;  %vm2414_vm6 = vcmp.lt.s32.totalorder %v2382_v17, 480  ;;  %v2350_v7 = vadd.s32 120, %v5036_v21 }
 0x3b4   : > { %v3073_v61 = vpop.f32.mrb[53].mxu1  ;;  %v2537_v46 = vmul.f32 %v2505_v62, %v2505_v62  ;;  %v3185_v3 = vpop.f32.mrb[53].mxu0 }
 0x3b5   : > { %v3074_v11 = vadd.f32 %v3073_v61, %v3072_v13  ;;  %v3075_v43 = vpop.f32.mrb[54].mxu1  ;;  %v2506_v45 = vsel %vm2410_vm2, %v2311_v16, 0.0  ;;  %v3186_v37 = vadd.f32 %v3185_v3, %v3184_v22  ;;  %v3187_v55 = vpop.f32.mrb[54].mxu0 }
 0x3b6   : > { %v3076_v32 = vpop.f32.mrb[55].mxu1  ;;  %v2576_v26 = vsel %vm379_vm0, %v2537_v46, 0.0  ;;  %v2538_v8 = vmul.f32 %v2506_v45, %v2506_v45  ;;  %v3188_v24 = vpop.f32.mrb[55].mxu0 }
 0x3b7   : > { %v3077_v52 = vadd.f32 %v3076_v32, %v3075_v43  ;;  %v2577_v19 = vadd.f32 %v2576_v26, %v2575_v50  ;;  %v2184_v12 = vadd.f32 %v3186_v37, %v3074_v11  ;;  %v3189_v15 = vadd.f32 %v3188_v24, %v3187_v55 }
 0x3b8   : > { %v2578_v4 = vsel %vm379_vm0, %v2538_v8, 0.0  ;;  %v2383_v11 = vadd.s32 %v4706_v57, %v2349_v54  ;;  %v3349_v54 = vld [vmem:[%s3541_s8 + $0x80] sm:$0xff] }
 0x3b9   : > { %v2579_v42 = vadd.f32 %v2578_v4, %v2577_v19  ;;  %2280 = vst.msk [vmem:[%s4715_s9 + $0x50] sm:$0xff] %vm379_vm0, %v2184_v12  ;;  %v2312_v1 = vsub.f32 %v2184_v12, %v3343_v6  ;;  %v2187_v38 = vadd.f32 %v3189_v15, %v3077_v52  ;;  %v2384_v52 = vadd.s32 %v4706_v57, %v2350_v7  ;;  %v3350_v7 = vld [vmem:[%s3541_s8 + $0x88] sm:$0xff] }
 0x3ba   : > { %vm2415_vm7 = vcmp.lt.s32.totalorder %v2383_v11, 480  ;;  %v2351_v15 = vadd.s32 128, %v5036_v21 }
 0x3bb   : > { %v3078_v60 = vpop.f32.mrb[56].mxu1  ;;  %v2507_v63 = vsel %vm2411_vm3, %v2312_v1, 0.0  ;;  %2281 = vst.msk [vmem:[%s4715_s9 + $0x58] sm:$0xff] %vm379_vm0, %v2187_v38  ;;  %v2313_v23 = vsub.f32 %v2187_v38, %v3344_v35  ;;  %v3190_v20 = vpop.f32.mrb[56].mxu0  ;;  %vm2416_vm12 = vcmp.lt.s32.totalorder %v2384_v52, 480  ;;  %v2352_v38 = vadd.s32 136, %v5036_v21 }
 0x3bc   : > { %v3079_v14 = vpop.f32.mrb[57].mxu1  ;;  %v2539_v27 = vmul.f32 %v2507_v63, %v2507_v63  ;;  %v3191_v58 = vpop.f32.mrb[57].mxu0 }
 0x3bd   : > { %v3080_v33 = vadd.f32 %v3079_v14, %v3078_v60  ;;  %v3081_v0 = vpop.f32.mrb[58].mxu1  ;;  %v2508_v25 = vsel %vm2412_vm4, %v2313_v23, 0.0  ;;  %v3192_v34 = vadd.f32 %v3191_v58, %v3190_v20  ;;  %v3193_v30 = vpop.f32.mrb[58].mxu0 }
 0x3be   : > { %v3082_v48 = vpop.f32.mrb[59].mxu1  ;;  %v2580_v53 = vsel %vm379_vm0, %v2539_v27, 0.0  ;;  %v2540_v31 = vmul.f32 %v2508_v25, %v2508_v25  ;;  %v3194_v10 = vpop.f32.mrb[59].mxu0 }
 0x3bf   : > { %v3083_v9 = vadd.f32 %v3082_v48, %v3081_v0  ;;  %v2581_v49 = vadd.f32 %v2580_v53, %v2579_v42  ;;  %v2192_v47 = vadd.f32 %v3192_v34, %v3080_v33  ;;  %v3195_v36 = vadd.f32 %v3194_v10, %v3193_v30 }
 0x3c0   : > { %v2582_v29 = vsel %vm379_vm0, %v2540_v31, 0.0  ;;  %v2385_v33 = vadd.s32 %v4706_v57, %v2351_v15 }
 0x3c1   : > { %v2583_v41 = vadd.f32 %v2582_v29, %v2581_v49  ;;  %2282 = vst.msk [vmem:[%s4715_s9 + $0x60] sm:$0xff] %vm379_vm0, %v2192_v47  ;;  %v2314_v50 = vsub.f32 %v2192_v47, %v3345_v40  ;;  %v2195_v44 = vadd.f32 %v3195_v36, %v3083_v9  ;;  %v2386_v9 = vadd.s32 %v4706_v57, %v2352_v38 }
 0x3c2   : > { %vm2417_vm8 = vcmp.lt.s32.totalorder %v2385_v33, 480  ;;  %v2353_v36 = vadd.s32 144, %v5036_v21 }
 0x3c3   : > { %v3084_v18 = vpop.f32.mrb[60].mxu1  ;;  %v2509_v13 = vsel %vm2413_vm5, %v2314_v50, 0.0  ;;  %2283 = vst.msk [vmem:[%s4715_s9 + $0x68] sm:$0xff] %vm379_vm0, %v2195_v44  ;;  %v2315_v62 = vsub.f32 %v2195_v44, %v3346_v39  ;;  %v3196_v2 = vpop.f32.mrb[60].mxu0  ;;  %vm2418_vm9 = vcmp.lt.s32.totalorder %v2386_v9, 480  ;;  %v2354_v44 = vadd.s32 152, %v5036_v21 }
 0x3c4   : > { %v3085_v16 = vpop.f32.mrb[61].mxu1  ;;  %v2541_v22 = vmul.f32 %v2509_v13, %v2509_v13  ;;  %v3197_v46 = vpop.f32.mrb[61].mxu0 }
 0x3c5   : > { %v3086_v61 = vadd.f32 %v3085_v16, %v3084_v18  ;;  %v3087_v3 = vpop.f32.mrb[62].mxu1  ;;  %v2510_v59 = vsel %vm2414_vm6, %v2315_v62, 0.0  ;;  %v3198_v43 = vadd.f32 %v3197_v46, %v3196_v2  ;;  %v3199_v45 = vpop.f32.mrb[62].mxu0 }
 0x3c6   : > { %v3088_v37 = vpop.f32.mrb[63].mxu1  ;;  %v2584_v55 = vsel %vm379_vm0, %v2541_v22, 0.0  ;;  %v2542_v32 = vmul.f32 %v2510_v59, %v2510_v59  ;;  %v3200_v8 = vpop.f32.mrb[63].mxu0 }
 0x3c7   : > { %v3089_v26 = vadd.f32 %v3088_v37, %v3087_v3  ;;  %v2585_v24 = vadd.f32 %v2584_v55, %v2583_v41  ;;  %v2200_v5 = vadd.f32 %v3198_v43, %v3086_v61  ;;  %v3201_v19 = vadd.f32 %v3200_v8, %v3199_v45 }
 0x3c8   : > { %v2586_v12 = vsel %vm379_vm0, %v2542_v32, 0.0  ;;  %v2387_v61 = vadd.s32 %v4706_v57, %v2353_v36  ;;  %v3353_v36 = vld [vmem:[%s3541_s8 + $0xa0] sm:$0xff] }
 0x3c9   : > { %v2587_v4 = vadd.f32 %v2586_v12, %v2585_v24  ;;  %2284 = vst.msk [vmem:[%s4715_s9 + $0x70] sm:$0xff] %vm379_vm0, %v2200_v5  ;;  %v2316_v42 = vsub.f32 %v2200_v5, %v3347_v56  ;;  %v2203_v6 = vadd.f32 %v3201_v19, %v3089_v26  ;;  %v2388_v26 = vadd.s32 %v4706_v57, %v2354_v44  ;;  %v3351_v12 = vld [vmem:[%s3541_s8 + $0x90] sm:$0xff] }
 0x3ca   : > { %vm2419_vm10 = vcmp.lt.s32.totalorder %v2387_v61, 480 }
 0x3cb   : > { %v3090_v1 = vpop.f32.mrb[64].mxu1  ;;  %v2511_v60 = vsel %vm2415_vm7, %v2316_v42, 0.0  ;;  %2285 = vst.msk [vmem:[%s4715_s9 + $0x78] sm:$0xff] %vm379_vm0, %v2203_v6  ;;  %v2317_v63 = vsub.f32 %v2203_v6, %v3348_v28  ;;  %v3202_v35 = vpop.f32.mrb[64].mxu0  ;;  %vm2420_vm11 = vcmp.lt.s32.totalorder %v2388_v26, 480  ;;  %v3352_v42 = vld [vmem:[%s3541_s8 + $0x98] sm:$0xff] }
 0x3cc   : > { %v3091_v23 = vpop.f32.mrb[65].mxu1  ;;  %v2543_v20 = vmul.f32 %v2511_v60, %v2511_v60  ;;  %v3203_v27 = vpop.f32.mrb[65].mxu0 }
 0x3cd   : > { %v3092_v14 = vadd.f32 %v3091_v23, %v3090_v1  ;;  %v3093_v58 = vpop.f32.mrb[66].mxu1  ;;  %v2512_v51 = vsel %vm2416_vm12, %v2317_v63, 0.0  ;;  %v3204_v0 = vadd.f32 %v3203_v27, %v3202_v35  ;;  %v3205_v25 = vpop.f32.mrb[66].mxu0 }
 0x3ce   : > { %v3094_v34 = vpop.f32.mrb[67].mxu1  ;;  %v2588_v30 = vsel %vm379_vm0, %v2543_v20, 0.0  ;;  %v2544_v48 = vmul.f32 %v2512_v51, %v2512_v51  ;;  %v3206_v31 = vpop.f32.mrb[67].mxu0  ;;  %v2355_v20 = vadd.s32 160, %v5036_v21 }
 0x3cf   : > { %v3095_v53 = vadd.f32 %v3094_v34, %v3093_v58  ;;  %v2589_v10 = vadd.f32 %v2588_v30, %v2587_v4  ;;  %v2208_v17 = vadd.f32 %v3204_v0, %v3092_v14  ;;  %v3207_v49 = vadd.f32 %v3206_v31, %v3205_v25 }
 0x3d0   : > { %v2590_v47 = vsel %vm379_vm0, %v2544_v48, 0.0  ;;  %v2356_v14 = vadd.s32 168, %v5036_v21  ;;  %v2389_v0 = vadd.s32 %v4706_v57, %v2355_v20 }
 0x3d1   : > { %v2591_v29 = vadd.f32 %v2590_v47, %v2589_v10  ;;  %2286 = vst.msk [vmem:[%s4715_s9 + $0x80] sm:$0xff] %vm379_vm0, %v2208_v17  ;;  %v2318_v41 = vsub.f32 %v2208_v17, %v3349_v54  ;;  %v2211_v40 = vadd.f32 %v3207_v49, %v3095_v53  ;;  %v2357_v47 = vadd.s32 176, %v5036_v21 }
 0x3d2   : > { %v2390_v9 = vadd.s32 %v4706_v57, %v2356_v14  ;;  %vm2421_vm13 = vcmp.lt.s32.totalorder %v2389_v0, 480 }
 0x3d3   : > { %v3096_v50 = vpop.f32.mrb[68].mxu1  ;;  %v2513_v18 = vsel %vm2417_vm8, %v2318_v41, 0.0  ;;  %2287 = vst.msk [vmem:[%s4715_s9 + $0x88] sm:$0xff] %vm379_vm0, %v2211_v40  ;;  %v2319_v13 = vsub.f32 %v2211_v40, %v3350_v7  ;;  %v3208_v39 = vpop.f32.mrb[68].mxu0  ;;  %v2358_v41 = vadd.s32 184, %v5036_v21 }
 0x3d4   : > { %v3097_v62 = vpop.f32.mrb[69].mxu1  ;;  %v2545_v2 = vmul.f32 %v2513_v18, %v2513_v18  ;;  %v3209_v22 = vpop.f32.mrb[69].mxu0  ;;  %vm2422_vm14 = vcmp.lt.s32.totalorder %v2390_v9, 480 }
 0x3d5   : > { %v3098_v16 = vadd.f32 %v3097_v62, %v3096_v50  ;;  %v3099_v46 = vpop.f32.mrb[70].mxu1  ;;  %v2514_v11 = vsel %vm2418_vm9, %v2319_v13, 0.0  ;;  %v3210_v3 = vadd.f32 %v3209_v22, %v3208_v39  ;;  %v3211_v59 = vpop.f32.mrb[70].mxu0  ;;  %v3354_v50 = vld [vmem:[%s3541_s8 + $0xa8] sm:$0xff]  ;;  %vm2630_vm9 = vcmask 253952  }
 0x3d6   : > { %v3100_v43 = vpop.f32.mrb[71].mxu1  ;;  %v2592_v45 = vsel %vm379_vm0, %v2545_v2, 0.0  ;;  %v2546_v37 = vmul.f32 %v2514_v11, %v2514_v11  ;;  %v3212_v32 = vpop.f32.mrb[71].mxu0  ;;  %v2391_v2 = vadd.s32 %v4706_v57, %v2357_v47 }
 0x3d7   : > { %v3101_v55 = vadd.f32 %v3100_v43, %v3099_v46  ;;  %v2593_v8 = vadd.f32 %v2592_v45, %v2591_v29  ;;  %v2216_v52 = vadd.f32 %v3210_v3, %v3098_v16  ;;  %v3213_v24 = vadd.f32 %v3212_v32, %v3211_v59 }
 0x3d8   : > { %v2594_v5 = vsel %vm379_vm0, %v2546_v37, 0.0  ;;  %v2392_v37 = vadd.s32 %v4706_v57, %v2358_v41  ;;  %vm2423_vm15 = vcmp.lt.s32.totalorder %v2391_v2, 480  ;;  %v3358_v41 = vld [vmem:[%s3541_s8 + $0xc8] sm:$0xff] }
 0x3d9   : > { %v2595_v19 = vadd.f32 %v2594_v5, %v2593_v8  ;;  %2288 = vst.msk [vmem:[%s4715_s9 + $0x90] sm:$0xff] %vm379_vm0, %v2216_v52  ;;  %v2320_v15 = vsub.f32 %v2216_v52, %v3351_v12  ;;  %v2219_v4 = vadd.f32 %v3213_v24, %v3101_v55  ;;  %v2359_v24 = vadd.s32 192, %v5036_v21 }
 0x3da   : > { %vm2424_vm1 = vcmp.lt.s32.totalorder %v2392_v37, 480 }
 0x3db   : > { %v2515_v56 = vsel %vm2419_vm10, %v2320_v15, 0.0  ;;  %2289 = vst.msk [vmem:[%s4715_s9 + $0x98] sm:$0xff] %vm379_vm0, %v2219_v4  ;;  %v2321_v6 = vsub.f32 %v2219_v4, %v3352_v42  ;;  %v2360_v4 = vadd.s32 200, %v5036_v21  ;;  %v3356_v42 = vld [vmem:[%s3541_s8 + $0xb8] sm:$0xff] }
 0x3dc   : > { %v2547_v1 = vmul.f32 %v2515_v56, %v2515_v56 }
 0x3dd   : > { %v2516_v38 = vsel %vm2420_vm11, %v2321_v6, 0.0 }
 0x3de   : > { %v2596_v60 = vsel %vm379_vm0, %v2547_v1, 0.0  ;;  %v2548_v28 = vmul.f32 %v2516_v38, %v2516_v38 }
 0x3df   : > { %v2597_v63 = vadd.f32 %v2596_v60, %v2595_v19  ;;  %v3355_v19 = vld [vmem:[%s3541_s8 + $0xb0] sm:$0xff] }
 0x3e0   : > { %v2598_v35 = vsel %vm379_vm0, %v2548_v28, 0.0 }
 0x3e1   : > { %v2599_v23 = vadd.f32 %v2598_v35, %v2597_v63  ;;  %v2393_v35 = vadd.s32 %v4706_v57, %v2359_v24  ;;  %v3359_v24 = vld [vmem:[%s3541_s8 + $0xd0] sm:$0xff] }
 0x3e3   : > { %vm2425_vm2 = vcmp.lt.s32.totalorder %v2393_v35, 480 }
 0x41e   : > { %v3102_v27 = vpop.f32.mrb[72].mxu1  ;;  %v3214_v33 = vpop.f32.mrb[72].mxu0 }
 0x41f   : > { %v3103_v58 = vpop.f32.mrb[73].mxu1  ;;  %v3215_v51 = vpop.f32.mrb[73].mxu0 }
 0x420   : > { %v3104_v25 = vadd.f32 %v3103_v58, %v3102_v27  ;;  %v3216_v34 = vadd.f32 %v3215_v51, %v3214_v33  ;;  %v3105_v30 = vpop.f32.mrb[74].mxu1  ;;  %v3217_v48 = vpop.f32.mrb[74].mxu0 }
 0x421   : > { %v3106_v53 = vpop.f32.mrb[75].mxu1  ;;  %v3218_v31 = vpop.f32.mrb[75].mxu0 }
 0x422   : > { %v2224_v10 = vadd.f32 %v3216_v34, %v3104_v25  ;;  %v3107_v17 = vadd.f32 %v3106_v53, %v3105_v30  ;;  %v3219_v49 = vadd.f32 %v3218_v31, %v3217_v48  ;;  %v2394_v34 = vadd.s32 %v4706_v57, %v2360_v4  ;;  %v3360_v4 = vld [vmem:[%s3541_s8 + $0xd8] sm:$0xff] }
 0x424   : > { %2290 = vst.msk [vmem:[%s4715_s9 + $0xa0] sm:$0xff] %vm379_vm0, %v2224_v10  ;;  %v2322_v29 = vsub.f32 %v2224_v10, %v3353_v36  ;;  %v2227_v54 = vadd.f32 %v3219_v49, %v3107_v17  ;;  %v2361_v10 = vadd.s32 208, %v5036_v21  ;;  %v3357_v49 = vld [vmem:[%s3541_s8 + $0xc0] sm:$0xff]  ;;  %vm2426_vm3 = vcmp.lt.s32.totalorder %v2394_v34, 480 }
 0x426   : > { %v2517_v40 = vsel %vm2421_vm13, %v2322_v29, 0.0  ;;  %2291 = vst.msk [vmem:[%s4715_s9 + $0xa8] sm:$0xff] %vm379_vm0, %v2227_v54  ;;  %v2323_v44 = vsub.f32 %v2227_v54, %v3354_v50  ;;  %v2362_v29 = vadd.s32 216, %v5036_v21 }
 0x427   : > { %v3108_v18 = vpop.f32.mrb[76].mxu1  ;;  %v3220_v7 = vpop.f32.mrb[76].mxu0  ;;  %v2549_v13 = vmul.f32 %v2517_v40, %v2517_v40 }
 0x428   : > { %v3109_v39 = vpop.f32.mrb[77].mxu1  ;;  %v3221_v62 = vpop.f32.mrb[77].mxu0  ;;  %v2518_v16 = vsel %vm2422_vm14, %v2323_v44, 0.0 }
 0x429   : > { %v3110_v22 = vadd.f32 %v3109_v39, %v3108_v18  ;;  %v3222_v61 = vadd.f32 %v3221_v62, %v3220_v7  ;;  %v3111_v46 = vpop.f32.mrb[78].mxu1  ;;  %v3223_v11 = vpop.f32.mrb[78].mxu0  ;;  %v2600_v3 = vsel %vm379_vm0, %v2549_v13, 0.0  ;;  %v2550_v59 = vmul.f32 %v2518_v16, %v2518_v16 }
 0x42a   : > { %v3112_v43 = vpop.f32.mrb[79].mxu1  ;;  %v3224_v45 = vpop.f32.mrb[79].mxu0  ;;  %v2601_v55 = vadd.f32 %v2600_v3, %v2599_v23  ;;  %v2395_v39 = vadd.s32 %v4706_v57, %v2361_v10  ;;  %v3361_v10 = vld [vmem:[%s3541_s8 + $0xe0] sm:$0xff] }
 0x42b   : > { %v2232_v32 = vadd.f32 %v3222_v61, %v3110_v22  ;;  %v3113_v26 = vadd.f32 %v3112_v43, %v3111_v46  ;;  %v3225_v8 = vadd.f32 %v3224_v45, %v3223_v11  ;;  %v2602_v52 = vsel %vm379_vm0, %v2550_v59, 0.0 }
 0x42c   : > { %v2603_v5 = vadd.f32 %v2602_v52, %v2601_v55  ;;  %v2396_v43 = vadd.s32 %v4706_v57, %v2362_v29  ;;  %vm2427_vm4 = vcmp.lt.s32.totalorder %v2395_v39, 480  ;;  %v3362_v29 = vld [vmem:[%s3541_s8 + $0xe8] sm:$0xff] }
 0x42d   : > { %2292 = vst.msk [vmem:[%s4715_s9 + $0xb0] sm:$0xff] %vm379_vm0, %v2232_v32  ;;  %v2324_v12 = vsub.f32 %v2232_v32, %v3355_v19  ;;  %v2235_v15 = vadd.f32 %v3225_v8, %v3113_v26  ;;  %v2363_v8 = vadd.s32 224, %v5036_v21 }
 0x42e   : > { %vm2428_vm5 = vcmp.lt.s32.totalorder %v2396_v43, 480 }
 0x42f   : > { %v2519_v56 = vsel %vm2423_vm15, %v2324_v12, 0.0  ;;  %2293 = vst.msk [vmem:[%s4715_s9 + $0xb8] sm:$0xff] %vm379_vm0, %v2235_v15  ;;  %v2325_v6 = vsub.f32 %v2235_v15, %v3356_v42  ;;  %v3114_v1 = vpop.f32.mrb[80].mxu1  ;;  %v3226_v38 = vpop.f32.mrb[80].mxu0  ;;  %v2364_v12 = vadd.s32 232, %v5036_v21 }
 0x430   : > { %v2551_v60 = vmul.f32 %v2519_v56, %v2519_v56  ;;  %v3115_v28 = vpop.f32.mrb[81].mxu1  ;;  %v3227_v63 = vpop.f32.mrb[81].mxu0 }
 0x431   : > { %v2520_v23 = vsel %vm2424_vm1, %v2325_v6, 0.0  ;;  %v3116_v20 = vadd.f32 %v3115_v28, %v3114_v1  ;;  %v3228_v14 = vadd.f32 %v3227_v63, %v3226_v38  ;;  %v3117_v27 = vpop.f32.mrb[82].mxu1  ;;  %v3229_v33 = vpop.f32.mrb[82].mxu0  ;;  %v2397_v28 = vadd.s32 %v4706_v57, %v2363_v8 }
 0x432   : > { %v2604_v58 = vsel %vm379_vm0, %v2551_v60, 0.0  ;;  %v2552_v51 = vmul.f32 %v2520_v23, %v2520_v23  ;;  %v3118_v0 = vpop.f32.mrb[83].mxu1  ;;  %v3230_v25 = vpop.f32.mrb[83].mxu0 }
 0x433   : > { %v2605_v30 = vadd.f32 %v2604_v58, %v2603_v5  ;;  %v2240_v48 = vadd.f32 %v3228_v14, %v3116_v20  ;;  %v3119_v53 = vadd.f32 %v3118_v0, %v3117_v27  ;;  %v3231_v31 = vadd.f32 %v3230_v25, %v3229_v33 }
 0x434   : > { %v2606_v9 = vsel %vm379_vm0, %v2552_v51, 0.0  ;;  %v2398_v0 = vadd.s32 %v4706_v57, %v2364_v12  ;;  %vm2429_vm6 = vcmp.lt.s32.totalorder %v2397_v28, 480 }
 0x435   : > { %v2607_v17 = vadd.f32 %v2606_v9, %v2605_v30  ;;  %2294 = vst.msk [vmem:[%s4715_s9 + $0xc0] sm:$0xff] %vm379_vm0, %v2240_v48  ;;  %v2326_v47 = vsub.f32 %v2240_v48, %v3357_v49  ;;  %v2243_v36 = vadd.f32 %v3231_v31, %v3119_v53  ;;  %v2365_v31 = vadd.s32 240, %v5036_v21 }
 0x436   : > { %vm2430_vm7 = vcmp.lt.s32.totalorder %v2398_v0, 480 }
 0x437   : > { %v2521_v54 = vsel %vm2425_vm2, %v2326_v47, 0.0  ;;  %2295 = vst.msk [vmem:[%s4715_s9 + $0xc8] sm:$0xff] %vm379_vm0, %v2243_v36  ;;  %v2327_v40 = vsub.f32 %v2243_v36, %v3358_v41  ;;  %v3120_v50 = vpop.f32.mrb[84].mxu1  ;;  %v3232_v44 = vpop.f32.mrb[84].mxu0  ;;  %v2366_v47 = vadd.s32 248, %v5036_v21 }
 0x438   : > { %v2553_v18 = vmul.f32 %v2521_v54, %v2521_v54  ;;  %v3121_v7 = vpop.f32.mrb[85].mxu1  ;;  %v3233_v13 = vpop.f32.mrb[85].mxu0 }
 0x439   : > { %v2522_v62 = vsel %vm2426_vm3, %v2327_v40, 0.0  ;;  %v3122_v2 = vadd.f32 %v3121_v7, %v3120_v50  ;;  %v3234_v16 = vadd.f32 %v3233_v13, %v3232_v44  ;;  %v3123_v22 = vpop.f32.mrb[86].mxu1  ;;  %v3235_v61 = vpop.f32.mrb[86].mxu0  ;;  %v2399_v7 = vadd.s32 %v4706_v57, %v2365_v31 }
 0x43a   : > { %v2608_v46 = vsel %vm379_vm0, %v2553_v18, 0.0  ;;  %v2554_v11 = vmul.f32 %v2522_v62, %v2522_v62  ;;  %v3124_v3 = vpop.f32.mrb[87].mxu1  ;;  %v3236_v59 = vpop.f32.mrb[87].mxu0 }
 0x43b   : > { %v2609_v45 = vadd.f32 %v2608_v46, %v2607_v17  ;;  %v2248_v37 = vadd.f32 %v3234_v16, %v3122_v2  ;;  %v3125_v55 = vadd.f32 %v3124_v3, %v3123_v22  ;;  %v3237_v32 = vadd.f32 %v3236_v59, %v3235_v61 }
 0x43c   : > { %v2610_v26 = vsel %vm379_vm0, %v2554_v11, 0.0  ;;  %v2400_v11 = vadd.s32 %v4706_v57, %v2366_v47  ;;  %vm2431_vm12 = vcmp.lt.s32.totalorder %v2399_v7, 480  ;;  %v3364_v57 = vld [vmem:[%s3541_s8 + $0xf8] sm:$0xff] }
 0x43d   : > { %v2611_v52 = vadd.f32 %v2610_v26, %v2609_v45  ;;  %2296 = vst.msk [vmem:[%s4715_s9 + $0xd0] sm:$0xff] %vm379_vm0, %v2248_v37  ;;  %v2328_v5 = vsub.f32 %v2248_v37, %v3359_v24  ;;  %v2251_v19 = vadd.f32 %v3237_v32, %v3125_v55  ;;  %v3363_v32 = vld [vmem:[%s3541_s8 + $0xf0] sm:$0xff] }
 0x43e   : > { %vm2432_vm8 = vcmp.lt.s32.totalorder %v2400_v11, 480 }
 0x43f   : > { %v2523_v15 = vsel %vm2427_vm4, %v2328_v5, 0.0  ;;  %2297 = vst.msk [vmem:[%s4715_s9 + $0xd8] sm:$0xff] %vm379_vm0, %v2251_v19  ;;  %v2329_v56 = vsub.f32 %v2251_v19, %v3360_v4  ;;  %v3126_v42 = vpop.f32.mrb[88].mxu1  ;;  %v3238_v6 = vpop.f32.mrb[88].mxu0 }
 0x440   : > { %v2555_v1 = vmul.f32 %v2523_v15, %v2523_v15  ;;  %v3127_v38 = vpop.f32.mrb[89].mxu1  ;;  %v3239_v60 = vpop.f32.mrb[89].mxu0 }
 0x441   : > { %v2524_v63 = vsel %vm2428_vm5, %v2329_v56, 0.0  ;;  %v3128_v35 = vadd.f32 %v3127_v38, %v3126_v42  ;;  %v3240_v23 = vadd.f32 %v3239_v60, %v3238_v6  ;;  %v3129_v20 = vpop.f32.mrb[90].mxu1  ;;  %v3241_v14 = vpop.f32.mrb[90].mxu0 }
 0x442   : > { %v2612_v27 = vsel %vm379_vm0, %v2555_v1, 0.0  ;;  %v2556_v33 = vmul.f32 %v2524_v63, %v2524_v63  ;;  %v3130_v58 = vpop.f32.mrb[91].mxu1  ;;  %v3242_v51 = vpop.f32.mrb[91].mxu0 }
 0x443   : > { %v2613_v25 = vadd.f32 %v2612_v27, %v2611_v52  ;;  %v2256_v34 = vadd.f32 %v3240_v23, %v3128_v35  ;;  %v3131_v30 = vadd.f32 %v3130_v58, %v3129_v20  ;;  %v3243_v48 = vadd.f32 %v3242_v51, %v3241_v14 }
 0x444   : > { %v2614_v53 = vsel %vm379_vm0, %v2556_v33, 0.0 }
 0x445   : > { %v2615_v9 = vadd.f32 %v2614_v53, %v2613_v25  ;;  %2298 = vst.msk [vmem:[%s4715_s9 + $0xe0] sm:$0xff] %vm379_vm0, %v2256_v34  ;;  %v2330_v17 = vsub.f32 %v2256_v34, %v3361_v10  ;;  %v2259_v49 = vadd.f32 %v3243_v48, %v3131_v30 }
 0x447   : > { %v2525_v36 = vsel %vm2429_vm6, %v2330_v17, 0.0  ;;  %2299 = vst.msk [vmem:[%s4715_s9 + $0xe8] sm:$0xff] %vm379_vm0, %v2259_v49  ;;  %v2331_v54 = vsub.f32 %v2259_v49, %v3362_v29  ;;  %v3132_v41 = vpop.f32.mrb[92].mxu1  ;;  %v3244_v40 = vpop.f32.mrb[92].mxu0 }
 0x448   : > { %v2557_v50 = vmul.f32 %v2525_v36, %v2525_v36  ;;  %v3133_v44 = vpop.f32.mrb[93].mxu1  ;;  %v3245_v18 = vpop.f32.mrb[93].mxu0 }
 0x449   : > { %v2526_v13 = vsel %vm2430_vm7, %v2331_v54, 0.0  ;;  %v3134_v39 = vadd.f32 %v3133_v44, %v3132_v41  ;;  %v3246_v62 = vadd.f32 %v3245_v18, %v3244_v40  ;;  %v3135_v2 = vpop.f32.mrb[94].mxu1  ;;  %v3247_v16 = vpop.f32.mrb[94].mxu0 }
 0x44a   : > { %v2616_v21 = vsel %vm379_vm0, %v2557_v50, 0.0  ;;  %v2558_v22 = vmul.f32 %v2526_v13, %v2526_v13  ;;  %v3136_v61 = vpop.f32.mrb[95].mxu1  ;;  %v3248_v46 = vpop.f32.mrb[95].mxu0 }
 0x44b   : > { %v2617_v3 = vadd.f32 %v2616_v21, %v2615_v9  ;;  %v2264_v59 = vadd.f32 %v3246_v62, %v3134_v39  ;;  %v3137_v43 = vadd.f32 %v3136_v61, %v3135_v2  ;;  %v3249_v45 = vadd.f32 %v3248_v46, %v3247_v16 }
 0x44c   : > { %v2618_v37 = vsel %vm379_vm0, %v2558_v22, 0.0 }
 0x44d   : > { %v2619_v55 = vadd.f32 %v2618_v37, %v2617_v3  ;;  %2300 = vst.msk [vmem:[%s4715_s9 + $0xf0] sm:$0xff] %vm379_vm0, %v2264_v59  ;;  %v2332_v26 = vsub.f32 %v2264_v59, %v3363_v32  ;;  %v2267_v8 = vadd.f32 %v3249_v45, %v3137_v43 }
 0x44f   : > { %v2527_v52 = vsel %vm2431_vm12, %v2332_v26, 0.0  ;;  %2301 = vst.msk [vmem:[%s4715_s9 + $0xf8] sm:$0xff] %vm379_vm0, %v2267_v8  ;;  %v2333_v24 = vsub.f32 %v2267_v8, %v3364_v57 }
 0x450   : > { %v2559_v5 = vmul.f32 %v2527_v52, %v2527_v52 }
 0x451   : > { %v2528_v19 = vsel %vm2432_vm8, %v2333_v24, 0.0 }
 0x452   : > { %v2620_v12 = vsel %vm379_vm0, %v2559_v5, 0.0  ;;  %v2560_v15 = vmul.f32 %v2528_v19, %v2528_v19 }
 0x453   : > { %v2621_v4 = vadd.f32 %v2620_v12, %v2619_v55 }
 0x454   : > { %v2622_v56 = vsel %vm379_vm0, %v2560_v15, 0.0 }
 0x455   : > { %v2623_v42 = vadd.f32 %v2622_v56, %v2621_v4 }
 0x457   : > { %v2624_v6 = vrot.slane %v2623_v42, 4 }
 0x459   : > { %v2625_v1 = vadd.f32 %v2624_v6, %v2623_v42 }
 0x45b   : > { %v2626_v38 = vrot.slane %v2625_v1, 2 }
 0x45d   : > { %v2627_v60 = vadd.f32 %v2626_v38, %v2625_v1 }
 0x45f   : > { %v2628_v28 = vrot.slane %v2627_v60, 1 }
 0x461   : > { %v2629_v63 = vadd.f32 %v2628_v28, %v2627_v60 }
 0x463   : > { %2631 = vst.msk [vmem:[%s286_s14] sm:$0x1] %vm2630_vm9, %v2629_v63 }
 0x464   : > { %3378 = shalt.err (!%p3375_p3)
}
 0x465   : > { %s3379_s23 = scalar_lea.hbm %s4911_s17, 16  ;;  %s3383_s22 = scalar_lea.hbm %s4960_s7, 32 }
 0x466   : > { %p3380_p4 = scmp.ne.s32.totalorder %s4911_s17, %s3379_s23  ;;  %p3384_p9 = scmp.lt.u32.totalorder %s4911_s17, %s4960_s7 }
 0x467   : > { %p3385_p10 = scmp.lt.u32.totalorder %s3383_s22, %s3379_s23  ;;  %p3387_p12 = scmp.lt.u32.totalorder %s3379_s23, %s4911_s17 }
 0x468   : > { %p3381_p7 = pnand %p3380_p4, %p3510_p5 }
 0x469   : > { %p3386_p11 = por %p3385_p10, %p3384_p9 }
 0x46a   : > { %p3382_p8 = pneg %p3381_p7 }
 0x46b   : > { %p3388_p13 = por %p3387_p12, %p3386_p11 }
 0x46d   : > { %p3389_p0 = pnand %p3388_p13, %p3382_p8 }
 0x46f   : > { %3392 = shalt.err (!%p3389_p0)
}
 0x470   : > { %3254 = dma.vmem_to_hbm [thread:$0]  (%p3510_p5), %s4913_s15, 16, %s4911_s17, %s2643_s18  }
 0x471 PF: > { %p3260_p1 = scmp.ge.s32.totalorder %s3427_s27, 2  ;;  %s2691_s8 = sand.u32 1, %s3415_s24  }
 0x472   : > { %s2692_s16 = scalar_lea.sflag [#allocation3], %s2691_s8 }
 0x473   : > { %p3257_p2 = pnand %p3260_p1, %p3514_p6 }
 0x475   : > { %3410 = dma.done.wait (!%p3257_p2), %s2692_s16, 16  }
 0x476   : > { %3412 = vsyncadd (!%p3257_p2), %s2692_s16, 4294967280  ;;  %p18_p3 = scmp.ge.s32.totalorder %s3497_s30, 4   ;;  %s5037_s24 = smov %s3419_s25 }
 0x477   : > { %s5038_s25 = smov %s3423_s26  ;;  %s5039_s26 = smov %s3508_s10 }
 0x478   : > { %s5040_s27 = smov %s3497_s30  ;;  %20 = sbr.rel (!%p18_p3) target bundleno = 3 (0x3), region = 99 }
 0x47f   :  { %2696 = vsyncpa [#allocation3], 1 }
 0x480   :  { %2698 = vsyncpa [#allocation3 + $0x1], 1 }

</bundles_post_ra>
